<compile_context>
chip_gen: v5e
topology: v5e:2x2
jax: 0.10.0
libtpu: 0.0.40
codegen_flags: <defaults>
</compile_context>

<pallas_src>
import functools

import jax
import jax.numpy as jnp
import numpy as np
from jax.experimental import pallas as pl
from jax.experimental.pallas import tpu as pltpu

EPS = 1e-5  # BatchNorm2d default eps


def _round_up(x, m):
    return ((x + m - 1) // m) * m


def _pick_tile(rows, row_width, max_rows=2048):
    """Largest divisor T of `rows` with T*row_width <= max_rows (>=1)."""
    best = 1
    for t in range(1, rows + 1):
        if rows % t == 0 and t * row_width <= max_rows:
            best = t
    return best


def _kaiming_uniform(key, shape, fan_in):
    bound = (6.0 / fan_in) ** 0.5
    return jax.random.uniform(key, shape, jnp.float32, -bound, bound)


# --------------------------------------------------------------------------
# Kernels
# --------------------------------------------------------------------------

def _s1_kernel(x_ref, m_ref, w1_ref, b1_ref, wd_ref, bd_ref, w2_ref, b2_ref,
               lm_ref, o_ref, h1_ref, *, T, Wq):
    """Stride-1 block, one (batch, row-tile) grid step.

    x_ref : ((T+3)*Wq, Cp) bf16  spatially padded, channel-permuted input tile
    m_ref : ((T+3)*Wq, 1)  f32   1 at real pixels, 0 at spatial padding
    o_ref : (T*Wq, Cp)     bf16  already channel-shuffled output tile
    """
    L = T * Wq
    # right branch: 1x1 conv (+folded BN) + ReLU; masked so the dw sees zeros
    # at the spatial padding (no separate buffer zeroing pass needed).
    h1 = jnp.dot(x_ref[...], w1_ref[...], preferred_element_type=jnp.float32)
    h1 = jnp.maximum(h1 + b1_ref[...], 0.0) * m_ref[...]
    h1_ref[...] = h1.astype(jnp.bfloat16)

    # right branch: depthwise 3x3 (+BN) as 9 whole-slab tap multiplies (VPU).
    wdv = wd_ref[...]
    acc = None
    for di in range(3):
        for dj in range(3):
            tap = h1_ref[pl.ds(di * Wq + dj, L), :] * wdv[3 * di + dj]
            acc = tap if acc is None else acc + tap
    acc = acc + bd_ref[...]

    # right branch: 1x1 conv (+BN) + ReLU, columns pre-scattered to the
    # shuffled output lanes.
    right = jnp.dot(acc.astype(jnp.bfloat16), w2_ref[...],
                    preferred_element_type=jnp.float32)
    right = jnp.maximum(right + b2_ref[...], 0.0)

    # left branch: identity pass-through; the input lane layout already places
    # the left channels on their shuffled output lanes, so this is just a mask.
    left = x_ref[pl.ds(Wq + 1, L), :] * lm_ref[...]

    o_ref[...] = (left + right).astype(o_ref.dtype)


# (phase, row-offset, col-offset, 3x3 tap index) of the stride-2 depthwise conv
# on the 2x2 phase decomposition of the padded input
# (phases: 0=even/even, 1=even/odd, 2=odd/even, 3=odd/odd rows/cols).
_S2_TAPS = ((0, 0, 0, 0), (0, 0, 1, 2), (0, 1, 0, 6), (0, 1, 1, 8),
            (1, 0, 0, 1), (1, 1, 0, 7),
            (2, 0, 0, 3), (2, 0, 1, 5),
            (3, 0, 0, 4))


def _s2_kernel(x_ref, m_ref, w1_ref, b1_ref, wdr_ref, bdr_ref, wdl_ref,
               bdl_ref, wo_ref, bo_ref, o_ref, h1_ref, cat_ref, *, T, Wq, Cp):
    """Stride-2 (downsampling) block, one (batch, row-tile) grid step.

    x_ref : (4*(T+2)*Wq, Cp) bf16  the 4 padded input phase planes, flattened
    m_ref : (4*(T+2)*Wq, 1)  f32
    cat_ref: (T*Wq, 2*Cp)    bf16  [left dw | right dw] for the fused K=2Cp 1x1
    o_ref : (T*Wq, Cp)       bf16  already channel-shuffled output tile
    """
    R = (T + 2) * Wq
    L = T * Wq
    # right branch: 1x1 conv (+BN) + ReLU over all 4 phase planes at once.
    h1 = jnp.dot(x_ref[...], w1_ref[...], preferred_element_type=jnp.float32)
    h1 = jnp.maximum(h1 + b1_ref[...], 0.0) * m_ref[...]
    h1_ref[...] = h1.astype(jnp.bfloat16)

    def dw(src_ref, wdv, bd):
        acc = None
        for ph, da, db, k in _S2_TAPS:
            tap = src_ref[pl.ds(ph * R + da * Wq + db, L), :] * wdv[k]
            acc = tap if acc is None else acc + tap
        return acc + bd

    dwl = dw(x_ref, wdl_ref[...], bdl_ref[...])    # left: dw on the raw input
    dwr = dw(h1_ref, wdr_ref[...], bdr_ref[...])   # right: dw on the pw1 output
    cat_ref[:, :Cp] = dwl.astype(jnp.bfloat16)
    cat_ref[:, Cp:] = dwr.astype(jnp.bfloat16)

    # both 1x1 convs (+BN) + ReLU fused into one K=2*Cp matmul; output columns
    # are pre-scattered to disjoint shuffled lanes so per-lane ReLU is correct.
    out = jnp.dot(cat_ref[...], wo_ref[...], preferred_element_type=jnp.float32)
    o_ref[...] = jnp.maximum(out + bo_ref[...], 0.0).astype(o_ref.dtype)


# --------------------------------------------------------------------------
# Parameter construction (mirrors the PyTorch module init) + host-side folding
# --------------------------------------------------------------------------

def init_block_raw(key, in_channels, out_channels, stride=1, splits_left=2):
    if stride not in (1, 2):
        raise ValueError("stride must be 1 or 2")
    kit = iter(jax.random.split(key, 6))
    raw = dict(stride=stride, in_channels=in_channels,
               out_channels=out_channels, splits_left=splits_left)

    def bn(c):
        gamma = jnp.ones((c,), jnp.float32)
        beta = jnp.zeros((c,), jnp.float32)
        mean = jnp.zeros((c,), jnp.float32)
        var = jnp.ones((c,), jnp.float32)
        scale = gamma / jnp.sqrt(var + EPS)
        shift = beta - mean * scale
        return scale, shift

    def add_pw(name, cin, cout):
        raw[name + "_w"] = _kaiming_uniform(next(kit), (cin, cout), cin)
        raw[name + "_b"] = jnp.zeros((cout,), jnp.float32)
        raw[name + "_scale"], raw[name + "_shift"] = bn(cout)

    def add_dw(name, c):
        raw[name + "_w"] = _kaiming_uniform(next(kit), (9, c), 9)
        raw[name + "_b"] = jnp.zeros((c,), jnp.float32)
        raw[name + "_scale"], raw[name + "_shift"] = bn(c)

    if stride == 2:
        half = out_channels // 2
        add_dw("left_dw", in_channels)
        add_pw("left_pw", in_channels, half)
        add_pw("right_pw1", in_channels, in_channels)
        add_dw("right_dw", in_channels)
        add_pw("right_pw2", in_channels, half)
    else:
        cr = in_channels - in_channels // splits_left
        add_pw("right_pw1", cr, cr)
        add_dw("right_dw", cr)
        add_pw("right_pw2", cr, cr)
    return raw


def pack_block(raw):
    """Fold BN/bias into weights, pad channels to 128 lanes and fold
    concat + channel_shuffle(groups=2) into the output-lane layout."""
    stride = raw["stride"]
    C = raw["in_channels"]
    sl = raw["splits_left"]
    if stride == 1:
        assert C % 2 == 0, "channel_shuffle(groups=2) needs an even channel count"
        C_out = C
        half = C_out // 2
        cl = C // sl
        cr = C - cl
    else:
        half = raw["out_channels"] // 2
        C_out = 2 * half
    Cp = _round_up(max(C, C_out), 128)

    cat = np.arange(C_out)
    # cat channel c lands on shuffled output lane dst[c]
    dst = np.where(cat < half, 2 * cat, 2 * (cat - half) + 1).astype(np.int32)

    def fold(name):
        s = np.asarray(raw[name + "_scale"], np.float32)
        t = np.asarray(raw[name + "_shift"], np.float32)
        w = np.asarray(raw[name + "_w"], np.float32) * s[None, :]
        b = np.asarray(raw[name + "_b"], np.float32) * s + t
        return w, b

    prep = dict(stride=stride, in_channels=C, out_channels=C_out, Cp=Cp)
    if stride == 1:
        w1f, b1f = fold("right_pw1")
        wdf, bdf = fold("right_dw")
        w2f, b2f = fold("right_pw2")
        dstL = dst[:cl]                                   # left -> output lanes
        lane_right = np.setdiff1d(np.arange(Cp), dstL)[:cr]
        perm_in = np.concatenate([dstL, lane_right]).astype(np.int32)
        lane_src = np.full((Cp,), C, np.int32)            # lane -> input channel
        lane_src[perm_in] = np.arange(C)

        W1 = np.zeros((Cp, Cp), np.float32); W1[lane_right, :cr] = w1f
        b1 = np.zeros((1, Cp), np.float32);  b1[0, :cr] = b1f
        WD = np.zeros((16, Cp), np.float32); WD[:9, :cr] = wdf
        BD = np.zeros((1, Cp), np.float32);  BD[0, :cr] = bdf
        dstR = dst[cl:]
        W2 = np.zeros((Cp, Cp), np.float32); W2[:cr, dstR] = w2f
        B2 = np.zeros((1, Cp), np.float32);  B2[0, dstR] = b2f
        LM = np.zeros((1, Cp), np.float32);  LM[0, dstL] = 1.0
        prep.update(lane_src=lane_src,
                    W1=jnp.asarray(W1, jnp.bfloat16), b1=jnp.asarray(b1),
                    WD=jnp.asarray(WD), BD=jnp.asarray(BD),
                    W2=jnp.asarray(W2, jnp.bfloat16), B2=jnp.asarray(B2),
                    LM=jnp.asarray(LM))
    else:
        w1f, b1f = fold("right_pw1")
        wdrf, bdrf = fold("right_dw")
        w2f, b2f = fold("right_pw2")
        wdlf, bdlf = fold("left_dw")
        wlf, blf = fold("left_pw")
        W1 = np.zeros((Cp, Cp), np.float32);  W1[:C, :C] = w1f
        b1 = np.zeros((1, Cp), np.float32);   b1[0, :C] = b1f
        WDR = np.zeros((16, Cp), np.float32); WDR[:9, :C] = wdrf
        BDR = np.zeros((1, Cp), np.float32);  BDR[0, :C] = bdrf
        WDL = np.zeros((16, Cp), np.float32); WDL[:9, :C] = wdlf
        BDL = np.zeros((1, Cp), np.float32);  BDL[0, :C] = bdlf
        dstL, dstR = dst[:half], dst[half:]
        WO = np.zeros((2 * Cp, Cp), np.float32)
        WO[:C, dstL] = wlf                     # rows [0,Cp): left-branch dw lanes
        WO[Cp:Cp + C, dstR] = w2f              # rows [Cp,2Cp): right-branch lanes
        BO = np.zeros((1, Cp), np.float32)
        BO[0, dstL] = blf
        BO[0, dstR] = b2f
        prep.update(W1=jnp.asarray(W1, jnp.bfloat16), b1=jnp.asarray(b1),
                    WDR=jnp.asarray(WDR), BDR=jnp.asarray(BDR),
                    WDL=jnp.asarray(WDL), BDL=jnp.asarray(BDL),
                    WO=jnp.asarray(WO, jnp.bfloat16), BO=jnp.asarray(BO))
    return prep


# --------------------------------------------------------------------------
# Forward wrappers
# --------------------------------------------------------------------------

def _forward_s1(prep, x_nchw, tile_rows=None):
    N, C, H, W = x_nchw.shape
    assert C == prep["in_channels"]
    Cp, C_out = prep["Cp"], prep["out_channels"]
    Wq = _round_up(W + 2, 8)                 # sublane-aligned padded row width
    T = tile_rows if tile_rows is not None else _pick_tile(H, Wq)
    assert H % T == 0, "tile_rows must divide H"
    nt = H // T
    R = (T + 3) * Wq

    xh = jnp.transpose(x_nchw, (0, 2, 3, 1)).astype(jnp.float32)
    xh = jnp.concatenate([xh, jnp.zeros(xh.shape[:-1] + (1,), xh.dtype)], -1)
    xl = xh[..., jnp.asarray(prep["lane_src"])].astype(jnp.bfloat16)

    def tiles(a):  # (B, H, W, ch) -> (B, nt, R, ch): padded + halo'd row tiles
        ap = jnp.pad(a, ((0, 0), (1, 2), (1, Wq - W - 1), (0, 0)))
        t = jnp.stack([ap[:, i * T:i * T + T + 3] for i in range(nt)], axis=1)
        return t.reshape(a.shape[0], nt, R, a.shape[-1])

    x_t = tiles(xl)
    m_t = tiles(jnp.ones((1, H, W, 1), jnp.float32))[0]

    out = pl.pallas_call(
        functools.partial(_s1_kernel, T=T, Wq=Wq),
        grid=(N, nt),
        in_specs=[
            pl.BlockSpec((None, None, R, Cp), lambda n, t: (n, t, 0, 0)),
            pl.BlockSpec((None, R, 1), lambda n, t: (t, 0, 0)),
            pl.BlockSpec((Cp, Cp), lambda n, t: (0, 0)),
            pl.BlockSpec((1, Cp), lambda n, t: (0, 0)),
            pl.BlockSpec((16, Cp), lambda n, t: (0, 0)),
            pl.BlockSpec((1, Cp), lambda n, t: (0, 0)),
            pl.BlockSpec((Cp, Cp), lambda n, t: (0, 0)),
            pl.BlockSpec((1, Cp), lambda n, t: (0, 0)),
            pl.BlockSpec((1, Cp), lambda n, t: (0, 0)),
        ],
        out_specs=pl.BlockSpec((None, None, T * Wq, Cp),
                               lambda n, t: (n, t, 0, 0)),
        out_shape=jax.ShapeDtypeStruct((N, nt, T * Wq, Cp), jnp.bfloat16),
        scratch_shapes=[pltpu.VMEM((R, Cp), jnp.bfloat16)],
        compiler_params=pltpu.CompilerParams(
            dimension_semantics=("parallel", "parallel"),
            vmem_limit_bytes=32 * 1024 * 1024),
    )(x_t, m_t, prep["W1"], prep["b1"], prep["WD"], prep["BD"],
      prep["W2"], prep["B2"], prep["LM"])

    y = out.reshape(N, H, Wq, Cp)[:, :, :W, :C_out].astype(jnp.float32)
    return jnp.transpose(y, (0, 3, 1, 2))


def _forward_s2(prep, x_nchw, tile_rows=None):
    N, C, H, W = x_nchw.shape
    assert C == prep["in_channels"]
    assert H % 2 == 0 and W % 2 == 0
    Cp, C_out = prep["Cp"], prep["out_channels"]
    Ho, Wo = H // 2, W // 2
    Wq = _round_up(Wo + 1, 8)
    T = tile_rows if tile_rows is not None else _pick_tile(Ho, Wq)
    assert Ho % T == 0, "tile_rows must divide H//2"
    nt = Ho // T
    R = (T + 2) * Wq

    xh = jnp.transpose(x_nchw, (0, 2, 3, 1)).astype(jnp.float32)
    xl = jnp.pad(xh, ((0, 0), (0, 0), (0, 0), (0, Cp - C))).astype(jnp.bfloat16)

    def tiles(a):  # (B, H, W, ch) -> (B, nt, 4*R, ch): padded 2x2 phase planes
        ap = jnp.pad(a, ((0, 0), (1, 1), (1, 1), (0, 0)))
        ph = jnp.stack([ap[:, 0::2, 0::2], ap[:, 0::2, 1::2],
                        ap[:, 1::2, 0::2], ap[:, 1::2, 1::2]], axis=1)
        ph = jnp.pad(ph, ((0, 0), (0, 0), (0, 1), (0, Wq - (Wo + 1)), (0, 0)))
        t = jnp.stack([ph[:, :, i * T:i * T + T + 2] for i in range(nt)], axis=1)
        return t.reshape(a.shape[0], nt, 4 * R, a.shape[-1])

    x_t = tiles(xl)
    m_t = tiles(jnp.ones((1, H, W, 1), jnp.float32))[0]

    out = pl.pallas_call(
        functools.partial(_s2_kernel, T=T, Wq=Wq, Cp=Cp),
        grid=(N, nt),
        in_specs=[
            pl.BlockSpec((None, None, 4 * R, Cp), lambda n, t: (n, t, 0, 0)),
            pl.BlockSpec((None, 4 * R, 1), lambda n, t: (t, 0, 0)),
            pl.BlockSpec((Cp, Cp), lambda n, t: (0, 0)),
            pl.BlockSpec((1, Cp), lambda n, t: (0, 0)),
            pl.BlockSpec((16, Cp), lambda n, t: (0, 0)),
            pl.BlockSpec((1, Cp), lambda n, t: (0, 0)),
            pl.BlockSpec((16, Cp), lambda n, t: (0, 0)),
            pl.BlockSpec((1, Cp), lambda n, t: (0, 0)),
            pl.BlockSpec((2 * Cp, Cp), lambda n, t: (0, 0)),
            pl.BlockSpec((1, Cp), lambda n, t: (0, 0)),
        ],
        out_specs=pl.BlockSpec((None, None, T * Wq, Cp),
                               lambda n, t: (n, t, 0, 0)),
        out_shape=jax.ShapeDtypeStruct((N, nt, T * Wq, Cp), jnp.bfloat16),
        scratch_shapes=[pltpu.VMEM((4 * R, Cp), jnp.bfloat16),
                        pltpu.VMEM((T * Wq, 2 * Cp), jnp.bfloat16)],
        compiler_params=pltpu.CompilerParams(
            dimension_semantics=("parallel", "parallel"),
            vmem_limit_bytes=32 * 1024 * 1024),
    )(x_t, m_t, prep["W1"], prep["b1"], prep["WDR"], prep["BDR"],
      prep["WDL"], prep["BDL"], prep["WO"], prep["BO"])

    y = out.reshape(N, Ho, Wq, Cp)[:, :, :Wo, :C_out].astype(jnp.float32)
    return jnp.transpose(y, (0, 3, 1, 2))


def shufflenet_v2_block_forward(prep, x_nchw, tile_rows=None):
    if prep["stride"] == 1:
        return _forward_s1(prep, x_nchw, tile_rows)
    return _forward_s2(prep, x_nchw, tile_rows)


# --------------------------------------------------------------------------
# Pure-JAX reference of the PyTorch module (inference-mode BN) for verification
# --------------------------------------------------------------------------

def _ref_conv1x1(x, w, b, scale, shift, relu):
    y = jnp.einsum("nhwc,co->nhwo", x, w) + b
    y = y * scale + shift
    return jnp.maximum(y, 0.0) if relu else y


def _ref_dw3x3(x, w9c, b, scale, shift, stride):
    N, H, W, C = x.shape
    xp = jnp.pad(x, ((0, 0), (1, 1), (1, 1), (0, 0)))
    Ho = (H - 1) // stride + 1
    Wo = (W - 1) // stride + 1
    acc = jnp.zeros((N, Ho, Wo, C), jnp.float32)
    for di in range(3):
        for dj in range(3):
            acc = acc + xp[:, di:di + (Ho - 1) * stride + 1:stride,
                           dj:dj + (Wo - 1) * stride + 1:stride, :] * w9c[3 * di + dj]
    return (acc + b) * scale + shift


def _ref_channel_shuffle(x, groups):
    N, H, W, C = x.shape
    x = x.reshape(N, H, W, groups, C // groups)
    x = jnp.swapaxes(x, 3, 4)
    return x.reshape(N, H, W, C)


def block_forward_reference(raw, x_nchw):
    stride = raw["stride"]
    C = raw["in_channels"]
    x = jnp.transpose(x_nchw, (0, 2, 3, 1)).astype(jnp.float32)

    def pw(t, name, relu):
        return _ref_conv1x1(t, raw[name + "_w"], raw[name + "_b"],
                            raw[name + "_scale"], raw[name + "_shift"], relu)

    def dw(t, name, s):
        return _ref_dw3x3(t, raw[name + "_w"], raw[name + "_b"],
                          raw[name + "_scale"], raw[name + "_shift"], s)

    if stride == 2:
        l = pw(dw(x, "left_dw", 2), "left_pw", True)
        r = pw(dw(pw(x, "right_pw1", True), "right_dw", 2), "right_pw2", True)
    else:
        cl = C // raw["splits_left"]
        l = x[..., :cl]
        r = pw(dw(pw(x[..., cl:], "right_pw1", True), "right_dw", 1),
               "right_pw2", True)
    y = jnp.concatenate([l, r], axis=-1)
    y = _ref_channel_shuffle(y, 2)
    return jnp.transpose(y, (0, 3, 1, 2))


# --------------------------------------------------------------------------

if __name__ == "__main__":
    key = jax.random.PRNGKey(0)
    k1, k2, kx = jax.random.split(key, 3)

    N, C, H, W = 2, 48, 16, 16
    x = jax.random.normal(kx, (N, C, H, W), jnp.float32)

    # stride-1 block (channel split + identity left branch), 48 -> 48
    raw1 = init_block_raw(k1, C, C, stride=1, splits_left=2)
    prep1 = pack_block(raw1)
    # stride-2 (downsampling) block, 48 -> 96
    raw2 = init_block_raw(k2, C, 96, stride=2, splits_left=2)
    prep2 = pack_block(raw2)

    y1 = jax.jit(functools.partial(shufflenet_v2_block_forward, prep1))(x)
    y2 = jax.jit(functools.partial(shufflenet_v2_block_forward, prep2))(x)
    # also exercise the halo'd row-tiled path (nt > 1)
    y1t = jax.jit(functools.partial(shufflenet_v2_block_forward, prep1,
                                    tile_rows=4))(x)
    y2t = jax.jit(functools.partial(shufflenet_v2_block_forward, prep2,
                                    tile_rows=4))(x)
    jax.block_until_ready((y1, y2, y1t, y2t))

    assert y1.shape == (N, C, H, W), y1.shape
    assert y1t.shape == (N, C, H, W), y1t.shape
    assert y2.shape == (N, 96, H // 2, W // 2), y2.shape
    assert y2t.shape == (N, 96, H // 2, W // 2), y2t.shape

    r1 = block_forward_reference(raw1, x)
    r2 = block_forward_reference(raw2, x)

    def rel_l2(a, b):
        return float(jnp.linalg.norm(a - b) / (jnp.linalg.norm(b) + 1e-12))

    for y, r in ((y1, r1), (y1t, r1), (y2, r2), (y2t, r2)):
        assert bool(jnp.all(jnp.isfinite(y)))
        err = rel_l2(y, r)
        assert err < 2e-2, err  # bf16 activations / MXU operands, f32 accumulation

    print("KERNEL_OK")
</pallas_src>

<mosaic_0001>
module attributes {stable_mosaic.version = 11 : i64} {
  func.func @_s1_kernel(%arg0: i32, %arg1: i32, %arg2: memref<1x1x456x128xbf16, #tpu.memory_space<vmem>>, %arg3: memref<1x456x1xf32, #tpu.memory_space<vmem>>, %arg4: memref<128x128xbf16, #tpu.memory_space<vmem>>, %arg5: memref<1x128xf32, #tpu.memory_space<vmem>>, %arg6: memref<16x128xf32, #tpu.memory_space<vmem>>, %arg7: memref<1x128xf32, #tpu.memory_space<vmem>>, %arg8: memref<128x128xbf16, #tpu.memory_space<vmem>>, %arg9: memref<1x128xf32, #tpu.memory_space<vmem>>, %arg10: memref<1x128xf32, #tpu.memory_space<vmem>>, %arg11: memref<1x1x384x128xbf16, #tpu.memory_space<vmem>>, %arg12: memref<456x128xbf16, #tpu.memory_space<vmem>>) attributes {dimension_semantics = [#tpu.dimension_semantics<parallel>, #tpu.dimension_semantics<parallel>], iteration_bounds = array<i64: 2, 1>, scalar_prefetch = 0 : i64, scratch_operands = 1 : i64, tpu.core_type = #tpu.core_type<tc>, window_params = [{transform_indices = @transform_0, window_bounds = array<i64: 1, 1, 456, 128>}, {transform_indices = @transform_1, window_bounds = array<i64: 1, 456, 1>}, {pipeline_mode = #tpu.pipeline_mode<synchronous>, transform_indices = @transform_2, window_bounds = array<i64: 128, 128>}, {pipeline_mode = #tpu.pipeline_mode<synchronous>, transform_indices = @transform_3, window_bounds = array<i64: 1, 128>}, {pipeline_mode = #tpu.pipeline_mode<synchronous>, transform_indices = @transform_4, window_bounds = array<i64: 16, 128>}, {pipeline_mode = #tpu.pipeline_mode<synchronous>, transform_indices = @transform_5, window_bounds = array<i64: 1, 128>}, {pipeline_mode = #tpu.pipeline_mode<synchronous>, transform_indices = @transform_6, window_bounds = array<i64: 128, 128>}, {pipeline_mode = #tpu.pipeline_mode<synchronous>, transform_indices = @transform_7, window_bounds = array<i64: 1, 128>}, {pipeline_mode = #tpu.pipeline_mode<synchronous>, transform_indices = @transform_8, window_bounds = array<i64: 1, 128>}, {transform_indices = @transform_9, window_bounds = array<i64: 1, 1, 384, 128>}]} {
    %c0 = arith.constant 0 : index
    %c0_0 = arith.constant 0 : index
    %c0_1 = arith.constant 0 : index
    %c0_2 = arith.constant 0 : index
    %0 = vector.load %arg2[%c0, %c0_0, %c0_1, %c0_2] : memref<1x1x456x128xbf16, #tpu.memory_space<vmem>>, vector<1x1x456x128xbf16>
    %1 = vector.shape_cast %0 : vector<1x1x456x128xbf16> to vector<456x128xbf16>
    %c0_3 = arith.constant 0 : index
    %c0_4 = arith.constant 0 : index
    %2 = vector.load %arg4[%c0_3, %c0_4] : memref<128x128xbf16, #tpu.memory_space<vmem>>, vector<128x128xbf16>
    %cst = arith.constant dense<0.000000e+00> : vector<456x128xf32>
    %3 = tpu.matmul %1, %2, %cst {dimension_numbers = #tpu.dot_dimension_numbers<[1], [0], [0], [1], [0, 0, 1, 1], [], []>} : vector<456x128xbf16>, vector<128x128xbf16>, vector<456x128xf32> -> vector<456x128xf32>
    %c0_5 = arith.constant 0 : index
    %c0_6 = arith.constant 0 : index
    %4 = vector.load %arg5[%c0_5, %c0_6] : memref<1x128xf32, #tpu.memory_space<vmem>>, vector<1x128xf32>
    %5 = vector.broadcast %4 : vector<1x128xf32> to vector<456x128xf32>
    %6 = arith.addf %3, %5 : vector<456x128xf32>
    %cst_7 = arith.constant 0.000000e+00 : f32
    %7 = vector.broadcast %cst_7 : f32 to vector<456x128xf32>
    %8 = arith.maximumf %6, %7 : vector<456x128xf32>
    %c0_8 = arith.constant 0 : index
    %c0_9 = arith.constant 0 : index
    %c0_10 = arith.constant 0 : index
    %9 = vector.load %arg3[%c0_8, %c0_9, %c0_10] : memref<1x456x1xf32, #tpu.memory_space<vmem>>, vector<1x456x1xf32>
    %10 = vector.shape_cast %9 : vector<1x456x1xf32> to vector<456x1xf32>
    %11 = vector.broadcast %10 : vector<456x1xf32> to vector<456x128xf32>
    %12 = arith.mulf %8, %11 : vector<456x128xf32>
    %13 = arith.truncf %12 : vector<456x128xf32> to vector<456x128xbf16>
    %c0_11 = arith.constant 0 : index
    %c0_12 = arith.constant 0 : index
    %14 = vector.load %arg12[%c0_11, %c0_12] : memref<456x128xbf16, #tpu.memory_space<vmem>>, vector<456x128xbf16>
    tpu.vector_store %arg12[%c0_11, %c0_12], %13 {strides = array<i32>} : memref<456x128xbf16, #tpu.memory_space<vmem>>, vector<456x128xbf16>,
    %c0_13 = arith.constant 0 : index
    %c0_14 = arith.constant 0 : index
    %15 = vector.load %arg6[%c0_13, %c0_14] : memref<16x128xf32, #tpu.memory_space<vmem>>, vector<16x128xf32>
    %c0_15 = arith.constant 0 : index
    %c0_16 = arith.constant 0 : index
    %16 = vector.load %arg12[%c0_15, %c0_16] : memref<456x128xbf16, #tpu.memory_space<vmem>>, vector<384x128xbf16>
    %17 = vector.extract_strided_slice %15 {offsets = [0, 0], sizes = [1, 128], strides = [1, 1]} : vector<16x128xf32> to vector<1x128xf32>
    %18 = vector.shape_cast %17 : vector<1x128xf32> to vector<128xf32>
    %19 = arith.extf %16 : vector<384x128xbf16> to vector<384x128xf32>
    %20 = vector.shape_cast %18 : vector<128xf32> to vector<1x128xf32>
    %21 = vector.broadcast %20 : vector<1x128xf32> to vector<384x128xf32>
    %22 = arith.mulf %19, %21 : vector<384x128xf32>
    %c1 = arith.constant 1 : index
    %c0_17 = arith.constant 0 : index
    %23 = vector.load %arg12[%c1, %c0_17] : memref<456x128xbf16, #tpu.memory_space<vmem>>, vector<384x128xbf16>
    %24 = vector.extract_strided_slice %15 {offsets = [1, 0], sizes = [1, 128], strides = [1, 1]} : vector<16x128xf32> to vector<1x128xf32>
    %25 = vector.shape_cast %24 : vector<1x128xf32> to vector<128xf32>
    %26 = arith.extf %23 : vector<384x128xbf16> to vector<384x128xf32>
    %27 = vector.shape_cast %25 : vector<128xf32> to vector<1x128xf32>
    %28 = vector.broadcast %27 : vector<1x128xf32> to vector<384x128xf32>
    %29 = arith.mulf %26, %28 : vector<384x128xf32>
    %30 = arith.addf %22, %29 : vector<384x128xf32>
    %c2 = arith.constant 2 : index
    %c0_18 = arith.constant 0 : index
    %31 = vector.load %arg12[%c2, %c0_18] : memref<456x128xbf16, #tpu.memory_space<vmem>>, vector<384x128xbf16>
    %32 = vector.extract_strided_slice %15 {offsets = [2, 0], sizes = [1, 128], strides = [1, 1]} : vector<16x128xf32> to vector<1x128xf32>
    %33 = vector.shape_cast %32 : vector<1x128xf32> to vector<128xf32>
    %34 = arith.extf %31 : vector<384x128xbf16> to vector<384x128xf32>
    %35 = vector.shape_cast %33 : vector<128xf32> to vector<1x128xf32>
    %36 = vector.broadcast %35 : vector<1x128xf32> to vector<384x128xf32>
    %37 = arith.mulf %34, %36 : vector<384x128xf32>
    %38 = arith.addf %30, %37 : vector<384x128xf32>
    %c24 = arith.constant 24 : index
    %c0_19 = arith.constant 0 : index
    %39 = vector.load %arg12[%c24, %c0_19] : memref<456x128xbf16, #tpu.memory_space<vmem>>, vector<384x128xbf16>
    %40 = vector.extract_strided_slice %15 {offsets = [3, 0], sizes = [1, 128], strides = [1, 1]} : vector<16x128xf32> to vector<1x128xf32>
    %41 = vector.shape_cast %40 : vector<1x128xf32> to vector<128xf32>
    %42 = arith.extf %39 : vector<384x128xbf16> to vector<384x128xf32>
    %43 = vector.shape_cast %41 : vector<128xf32> to vector<1x128xf32>
    %44 = vector.broadcast %43 : vector<1x128xf32> to vector<384x128xf32>
    %45 = arith.mulf %42, %44 : vector<384x128xf32>
    %46 = arith.addf %38, %45 : vector<384x128xf32>
    %c25 = arith.constant 25 : index
    %c0_20 = arith.constant 0 : index
    %47 = vector.load %arg12[%c25, %c0_20] : memref<456x128xbf16, #tpu.memory_space<vmem>>, vector<384x128xbf16>
    %48 = vector.extract_strided_slice %15 {offsets = [4, 0], sizes = [1, 128], strides = [1, 1]} : vector<16x128xf32> to vector<1x128xf32>
    %49 = vector.shape_cast %48 : vector<1x128xf32> to vector<128xf32>
    %50 = arith.extf %47 : vector<384x128xbf16> to vector<384x128xf32>
    %51 = vector.shape_cast %49 : vector<128xf32> to vector<1x128xf32>
    %52 = vector.broadcast %51 : vector<1x128xf32> to vector<384x128xf32>
    %53 = arith.mulf %50, %52 : vector<384x128xf32>
    %54 = arith.addf %46, %53 : vector<384x128xf32>
    %c26 = arith.constant 26 : index
    %c0_21 = arith.constant 0 : index
    %55 = vector.load %arg12[%c26, %c0_21] : memref<456x128xbf16, #tpu.memory_space<vmem>>, vector<384x128xbf16>
    %56 = vector.extract_strided_slice %15 {offsets = [5, 0], sizes = [1, 128], strides = [1, 1]} : vector<16x128xf32> to vector<1x128xf32>
    %57 = vector.shape_cast %56 : vector<1x128xf32> to vector<128xf32>
    %58 = arith.extf %55 : vector<384x128xbf16> to vector<384x128xf32>
    %59 = vector.shape_cast %57 : vector<128xf32> to vector<1x128xf32>
    %60 = vector.broadcast %59 : vector<1x128xf32> to vector<384x128xf32>
    %61 = arith.mulf %58, %60 : vector<384x128xf32>
    %62 = arith.addf %54, %61 : vector<384x128xf32>
    %c48 = arith.constant 48 : index
    %c0_22 = arith.constant 0 : index
    %63 = vector.load %arg12[%c48, %c0_22] : memref<456x128xbf16, #tpu.memory_space<vmem>>, vector<384x128xbf16>
    %64 = vector.extract_strided_slice %15 {offsets = [6, 0], sizes = [1, 128], strides = [1, 1]} : vector<16x128xf32> to vector<1x128xf32>
    %65 = vector.shape_cast %64 : vector<1x128xf32> to vector<128xf32>
    %66 = arith.extf %63 : vector<384x128xbf16> to vector<384x128xf32>
    %67 = vector.shape_cast %65 : vector<128xf32> to vector<1x128xf32>
    %68 = vector.broadcast %67 : vector<1x128xf32> to vector<384x128xf32>
    %69 = arith.mulf %66, %68 : vector<384x128xf32>
    %70 = arith.addf %62, %69 : vector<384x128xf32>
    %c49 = arith.constant 49 : index
    %c0_23 = arith.constant 0 : index
    %71 = vector.load %arg12[%c49, %c0_23] : memref<456x128xbf16, #tpu.memory_space<vmem>>, vector<384x128xbf16>
    %72 = vector.extract_strided_slice %15 {offsets = [7, 0], sizes = [1, 128], strides = [1, 1]} : vector<16x128xf32> to vector<1x128xf32>
    %73 = vector.shape_cast %72 : vector<1x128xf32> to vector<128xf32>
    %74 = arith.extf %71 : vector<384x128xbf16> to vector<384x128xf32>
    %75 = vector.shape_cast %73 : vector<128xf32> to vector<1x128xf32>
    %76 = vector.broadcast %75 : vector<1x128xf32> to vector<384x128xf32>
    %77 = arith.mulf %74, %76 : vector<384x128xf32>
    %78 = arith.addf %70, %77 : vector<384x128xf32>
    %c50 = arith.constant 50 : index
    %c0_24 = arith.constant 0 : index
    %79 = vector.load %arg12[%c50, %c0_24] : memref<456x128xbf16, #tpu.memory_space<vmem>>, vector<384x128xbf16>
    %80 = vector.extract_strided_slice %15 {offsets = [8, 0], sizes = [1, 128], strides = [1, 1]} : vector<16x128xf32> to vector<1x128xf32>
    %81 = vector.shape_cast %80 : vector<1x128xf32> to vector<128xf32>
    %82 = arith.extf %79 : vector<384x128xbf16> to vector<384x128xf32>
    %83 = vector.shape_cast %81 : vector<128xf32> to vector<1x128xf32>
    %84 = vector.broadcast %83 : vector<1x128xf32> to vector<384x128xf32>
    %85 = arith.mulf %82, %84 : vector<384x128xf32>
    %86 = arith.addf %78, %85 : vector<384x128xf32>
    %c0_25 = arith.constant 0 : index
    %c0_26 = arith.constant 0 : index
    %87 = vector.load %arg7[%c0_25, %c0_26] : memref<1x128xf32, #tpu.memory_space<vmem>>, vector<1x128xf32>
    %88 = vector.broadcast %87 : vector<1x128xf32> to vector<384x128xf32>
    %89 = arith.addf %86, %88 : vector<384x128xf32>
    %90 = arith.truncf %89 : vector<384x128xf32> to vector<384x128xbf16>
    %c0_27 = arith.constant 0 : index
    %c0_28 = arith.constant 0 : index
    %91 = vector.load %arg8[%c0_27, %c0_28] : memref<128x128xbf16, #tpu.memory_space<vmem>>, vector<128x128xbf16>
    %cst_29 = arith.constant dense<0.000000e+00> : vector<384x128xf32>
    %92 = tpu.matmul %90, %91, %cst_29 {dimension_numbers = #tpu.dot_dimension_numbers<[1], [0], [0], [1], [0, 0, 1, 1], [], []>} : vector<384x128xbf16>, vector<128x128xbf16>, vector<384x128xf32> -> vector<384x128xf32>
    %c0_30 = arith.constant 0 : index
    %c0_31 = arith.constant 0 : index
    %93 = vector.load %arg9[%c0_30, %c0_31] : memref<1x128xf32, #tpu.memory_space<vmem>>, vector<1x128xf32>
    %94 = vector.broadcast %93 : vector<1x128xf32> to vector<384x128xf32>
    %95 = arith.addf %92, %94 : vector<384x128xf32>
    %cst_32 = arith.constant 0.000000e+00 : f32
    %96 = vector.broadcast %cst_32 : f32 to vector<384x128xf32>
    %97 = arith.maximumf %95, %96 : vector<384x128xf32>
    %c0_33 = arith.constant 0 : index
    %c0_34 = arith.constant 0 : index
    %c25_35 = arith.constant 25 : index
    %c0_36 = arith.constant 0 : index
    %98 = vector.load %arg2[%c0_33, %c0_34, %c25_35, %c0_36] : memref<1x1x456x128xbf16, #tpu.memory_space<vmem>>, vector<1x1x384x128xbf16>
    %99 = vector.shape_cast %98 : vector<1x1x384x128xbf16> to vector<384x128xbf16>
    %c0_37 = arith.constant 0 : index
    %c0_38 = arith.constant 0 : index
    %100 = vector.load %arg10[%c0_37, %c0_38] : memref<1x128xf32, #tpu.memory_space<vmem>>, vector<1x128xf32>
    %101 = arith.extf %99 : vector<384x128xbf16> to vector<384x128xf32>
    %102 = vector.broadcast %100 : vector<1x128xf32> to vector<384x128xf32>
    %103 = arith.mulf %101, %102 : vector<384x128xf32>
    %104 = arith.addf %103, %97 : vector<384x128xf32>
    %105 = arith.truncf %104 : vector<384x128xf32> to vector<384x128xbf16>
    %c0_39 = arith.constant 0 : index
    %c0_40 = arith.constant 0 : index
    %c0_41 = arith.constant 0 : index
    %c0_42 = arith.constant 0 : index
    %106 = vector.load %arg11[%c0_39, %c0_40, %c0_41, %c0_42] : memref<1x1x384x128xbf16, #tpu.memory_space<vmem>>, vector<1x1x384x128xbf16>
    %107 = vector.shape_cast %106 : vector<1x1x384x128xbf16> to vector<384x128xbf16>
    %108 = vector.shape_cast %105 : vector<384x128xbf16> to vector<1x1x384x128xbf16>
    tpu.vector_store %arg11[%c0_39, %c0_40, %c0_41, %c0_42], %108 {strides = array<i32>} : memref<1x1x384x128xbf16, #tpu.memory_space<vmem>>, vector<1x1x384x128xbf16>,
    return
  }
  func.func @transform_0(%arg0: i32, %arg1: i32) -> (i32, i32, i32, i32) {
    %c0_i32 = arith.constant 0 : i32
    %c0_i32_0 = arith.constant 0 : i32
    %c0_i32_1 = arith.constant 0 : i32
    return %arg0, %arg1, %c0_i32, %c0_i32_0 : i32, i32, i32, i32
  }
  func.func @transform_1(%arg0: i32, %arg1: i32) -> (i32, i32, i32) {
    %c0_i32 = arith.constant 0 : i32
    %c0_i32_0 = arith.constant 0 : i32
    %c0_i32_1 = arith.constant 0 : i32
    return %arg1, %c0_i32, %c0_i32_0 : i32, i32, i32
  }
  func.func @transform_2(%arg0: i32, %arg1: i32) -> (i32, i32) {
    %c0_i32 = arith.constant 0 : i32
    %c0_i32_0 = arith.constant 0 : i32
    %c0_i32_1 = arith.constant 0 : i32
    return %c0_i32, %c0_i32_0 : i32, i32
  }
  func.func @transform_3(%arg0: i32, %arg1: i32) -> (i32, i32) {
    %c0_i32 = arith.constant 0 : i32
    %c0_i32_0 = arith.constant 0 : i32
    %c0_i32_1 = arith.constant 0 : i32
    return %c0_i32, %c0_i32_0 : i32, i32
  }
  func.func @transform_4(%arg0: i32, %arg1: i32) -> (i32, i32) {
    %c0_i32 = arith.constant 0 : i32
    %c0_i32_0 = arith.constant 0 : i32
    %c0_i32_1 = arith.constant 0 : i32
    return %c0_i32, %c0_i32_0 : i32, i32
  }
  func.func @transform_5(%arg0: i32, %arg1: i32) -> (i32, i32) {
    %c0_i32 = arith.constant 0 : i32
    %c0_i32_0 = arith.constant 0 : i32
    %c0_i32_1 = arith.constant 0 : i32
    return %c0_i32, %c0_i32_0 : i32, i32
  }
  func.func @transform_6(%arg0: i32, %arg1: i32) -> (i32, i32) {
    %c0_i32 = arith.constant 0 : i32
    %c0_i32_0 = arith.constant 0 : i32
    %c0_i32_1 = arith.constant 0 : i32
    return %c0_i32, %c0_i32_0 : i32, i32
  }
  func.func @transform_7(%arg0: i32, %arg1: i32) -> (i32, i32) {
    %c0_i32 = arith.constant 0 : i32
    %c0_i32_0 = arith.constant 0 : i32
    %c0_i32_1 = arith.constant 0 : i32
    return %c0_i32, %c0_i32_0 : i32, i32
  }
  func.func @transform_8(%arg0: i32, %arg1: i32) -> (i32, i32) {
    %c0_i32 = arith.constant 0 : i32
    %c0_i32_0 = arith.constant 0 : i32
    %c0_i32_1 = arith.constant 0 : i32
    return %c0_i32, %c0_i32_0 : i32, i32
  }
  func.func @transform_9(%arg0: i32, %arg1: i32) -> (i32, i32, i32, i32) {
    %c0_i32 = arith.constant 0 : i32
    %c0_i32_0 = arith.constant 0 : i32
    %c0_i32_1 = arith.constant 0 : i32
    return %arg0, %arg1, %c0_i32, %c0_i32_0 : i32, i32, i32, i32
  }
}

</mosaic_0001>

<bundles_post_ra>
// kernel: shufflenet_v2_block_forward.1
= control target key start
LH: loop header
LB: loop body
LE: loop exit
PB: predicated region body
PF: predicated region fallthrough
CT: control target
= control target key end

     0   :  { %s5766_s30 = smov 0   ;;  %s5768_s10 = smov 0   ;;  %s9237_s0 = inlined_call_operand.vmem [shape: bf16[2,1,456,128], index: 0, kind: input, shape index: {}]   ;;  %s9238_s1 = inlined_call_operand.vmem [shape: f32[1,456,1], index: 1, kind: input, shape index: {}]   ;;  %s9239_s2 = inlined_call_operand.vmem [shape: bf16[128,128], index: 2, kind: input, shape index: {}]   ;;  %s9240_s3 = inlined_call_operand.vmem [shape: f32[1,128], index: 3, kind: input, shape index: {}, may-alias: {3,5,7}]   ;;  %s9241_s4 = inlined_call_operand.vmem [shape: f32[16,128], index: 4, kind: input, shape index: {}]   ;;  %s9242_s5 = inlined_call_operand.vmem [shape: f32[1,128], index: 5, kind: input, shape index: {}, may-alias: {3,5,7}]   ;;  %s9243_s6 = inlined_call_operand.vmem [shape: bf16[128,128], index: 6, kind: input, shape index: {}]   ;;  %s9244_s7 = inlined_call_operand.vmem [shape: f32[1,128], index: 7, kind: input, shape index: {}, may-alias: {3,5,7}]   ;;  %s9245_s8 = inlined_call_operand.vmem [shape: f32[1,128], index: 8, kind: input, shape index: {}]   ;;  %s9246_s9 = inlined_call_operand.vmem [shape: bf16[2,1,384,128], index: 9, kind: output, shape index: {}]  }
   0x1   :  { %s5770_s11 = smov 0  }
   0x2 LB: > { %s31_s12 = sadd.s32 1, %s5709_s10  ;;  %p4987_p0 = scmp.ge.s32.totalorder %s5713_s11, 1  ;;  %s5713_s11 = sphi %s5770_s11, %s19_s11   ;;  %s5709_s10 = sphi %s5768_s10, %s9706_s10   ;;  %s5705_s30 = sphi %s5766_s30, %s9705_s30  }
   0x3   : > { %p33_p1 = scmp.ge.s32.totalorder %s31_s12, 2  ;;  %p317_p2 = scmp.lt.s32.totalorder %s5713_s11, 3 }
   0x5   : > { %s9708_s12 = smov (%p33_p1, %s31_s12), 0  ;;  %p318_p3 = pnand %p4987_p0, %p317_p2 }
   0x7   : > { %321 = sbr.rel (%p318_p3) target bundleno = 896 (0x380), region = 56 }
   0xc   : > { %v900_v0 = vld [vmem:[%s9238_s1 + $0x20] sm:$0xff]  ;;  %v898_v1 = vld [vmem:[%s9238_s1 + $0x10] sm:$0xff]  ;;  %v5715_v3 = vmov 0   ;;  %v5203_v4 = vld [vmem:[%s9239_s2 + $0x38] sm:$0xff]  ;;  %p366_p4 = scmp.lt.s32.totalorder %s5705_s30, 1  ;;  %vm1657_vm0 = vcmask 1046528  }
   0xd   : > { %v896_v2 = vld [vmem:[%s9238_s1] sm:$0xff]  ;;  %5676 = vset.pattern.permute.xlu2 %v5715_v3  ;;  %5675 = vset.pattern.permute.xlu1 %v5715_v3  ;;  %v5202_v5 = vld [vmem:[%s9239_s2 + $0x30] sm:$0xff]  ;;  %v901_v6 = vld [vmem:[%s9238_s1 + $0x28] sm:$0xff]  ;;  %vm1952_vm1 = vcmask 1045504   ;;  %vm4048_vm2 = vcmask 1040384  }
   0xe   : > { %5674 = vset.pattern.permute.xlu0 %v5715_v3  ;;  %975 = vperm.xlu2 %5676, %v900_v0   ;;  %v899_v7 = vld [vmem:[%s9238_s1 + $0x18] sm:$0xff]  ;;  %v897_v8 = vld [vmem:[%s9238_s1 + $0x8] sm:$0xff]  ;;  %v5200_v10 = vld [vmem:[%s9239_s2 + $0x20] sm:$0xff]  ;;  %s9710_s30 = smov (!%p366_p4, %s5705_s30), 1  ;;  %vm4291_vm3 = vsmask.f32 3328 }
   0xf   : > { %965 = vperm.xlu1 %5675, %v898_v1   ;;  %955 = vperm.xlu0 %5674, %v896_v2   ;;  %v5201_v9 = vld [vmem:[%s9239_s2 + $0x28] sm:$0xff]  ;;  %v904_v11 = vld [vmem:[%s9238_s1 + $0x40] sm:$0xff]  ;;  %v903_v12 = vld [vmem:[%s9238_s1 + $0x38] sm:$0xff]  ;;  %s5647_s17 = smul.u32 228, %s9710_s30  ;;  %vm4292_vm4 = vsmask.f32 7440 }
  0x10   : > { %686 = vmatpush.bf16.msra.mxu0 %v5203_v4  ;;  %5623 = vmatpush.bf16.msra.mxu2 %v5203_v4  ;;  %v902_v13 = vld [vmem:[%s9238_s1 + $0x30] sm:$0xff]  ;;  %v5199_v14 = vld [vmem:[%s9239_s2 + $0x18] sm:$0xff]  ;;  %v905_v18 = vld [vmem:[%s9238_s1 + $0x48] sm:$0xff]  ;;  %s5648_s20 = smul.u32 192, %s9710_s30 }
  0x11   : > { %5624 = vmatpush.bf16.msra.mxu3 %v5203_v4  ;;  %v5198_v15 = vld [vmem:[%s9239_s2 + $0x10] sm:$0xff]  ;;  %v907_v16 = vld [vmem:[%s9238_s1 + $0x58] sm:$0xff]  ;;  %v5197_v19 = vld [vmem:[%s9239_s2 + $0x8] sm:$0xff]  ;;  %s5854_s22 = scalar_lea.vmem %s9237_s0, %s5647_s17 }
  0x12   : > { %v906_v17 = vld [vmem:[%s9238_s1 + $0x50] sm:$0xff]  ;;  %v5196_v20 = vld [vmem:[%s9239_s2] sm:$0xff]  ;;  %v909_v22 = vld [vmem:[%s9238_s1 + $0x68] sm:$0xff]  ;;  %s8110_s23 = scalar_lea.vmem %s9246_s9, %s5648_s20 }
  0x13   : > { %v924_v21 = vld [vmem:[%s9238_s1 + $0xe0] sm:$0xff]  ;;  %v5181_v25 = vld [vmem:[%s5854_s22 + $0x68] sm:$0xff]  ;;  %v927_v26 = vld [vmem:[%s9238_s1 + $0xf8] sm:$0xff] }
  0x14   : > { %687 = vmatpush.bf16.msra.mxu0 %v5202_v5  ;;  %5625 = vmatpush.bf16.msra.mxu2 %v5202_v5  ;;  %v908_v23 = vld [vmem:[%s9238_s1 + $0x60] sm:$0xff]  ;;  %v926_v27 = vld [vmem:[%s9238_s1 + $0xf0] sm:$0xff]  ;;  %v925_v28 = vld [vmem:[%s9238_s1 + $0xe8] sm:$0xff] }
  0x15   : > { %5626 = vmatpush.bf16.msra.mxu3 %v5202_v5  ;;  %v5168_v24 = vld [vmem:[%s5854_s22] sm:$0xff]  ;;  %v911_v30 = vld [vmem:[%s9238_s1 + $0x78] sm:$0xff]  ;;  %v910_v31 = vld [vmem:[%s9238_s1 + $0x70] sm:$0xff] }
  0x16   : > { %980 = vperm.xlu2 %5676, %v901_v6   ;;  %v928_v29 = vld [vmem:[%s9238_s1 + $0x100] sm:$0xff]  ;;  %v5169_v32 = vld [vmem:[%s5854_s22 + $0x8] sm:$0xff]  ;;  %v5182_v33 = vld [vmem:[%s5854_s22 + $0x70] sm:$0xff] }
  0x17   : > { %970 = vperm.xlu1 %5675, %v899_v7   ;;  %960 = vperm.xlu0 %5674, %v897_v8   ;;  %v5195_v34 = vld [vmem:[%s5854_s22 + $0xd8] sm:$0xff]  ;;  %v930_v36 = vld [vmem:[%s9238_s1 + $0x110] sm:$0xff]  ;;  %v929_v37 = vld [vmem:[%s9238_s1 + $0x108] sm:$0xff] }
  0x18   : > { %688 = vmatpush.bf16.msra.mxu0 %v5201_v9  ;;  %5627 = vmatpush.bf16.msra.mxu2 %v5201_v9  ;;  %v931_v35 = vld [vmem:[%s9238_s1 + $0x118] sm:$0xff]  ;;  %v912_v38 = vld [vmem:[%s9238_s1 + $0x80] sm:$0xff]  ;;  %v933_v39 = vld [vmem:[%s9238_s1 + $0x128] sm:$0xff] }
  0x19   : > { %5628 = vmatpush.bf16.msra.mxu3 %v5201_v9  ;;  %v932_v40 = vld [vmem:[%s9238_s1 + $0x120] sm:$0xff]  ;;  %v5170_v41 = vld [vmem:[%s5854_s22 + $0x10] sm:$0xff]  ;;  %v5183_v42 = vld [vmem:[%s5854_s22 + $0x78] sm:$0xff] }
  0x1a   : > { %v445_v43 = vld [vmem:[%s5854_s22 + $0xe0] sm:$0xf]  ;;  %v935_v46 = vld [vmem:[%s9238_s1 + $0x138] sm:$0xff]  ;;  %v934_v47 = vld [vmem:[%s9238_s1 + $0x130] sm:$0xff] }
  0x1b   : > { %v579_v44 = vunpack.c.l.b16 %v445_v43  ;;  %v913_v48 = vld [vmem:[%s9238_s1 + $0x88] sm:$0xff]  ;;  %v936_v49 = vld [vmem:[%s9238_s1 + $0x140] sm:$0xff]  ;;  %v915_v50 = vld [vmem:[%s9238_s1 + $0x98] sm:$0xff] }
  0x1c   : > { %689 = vmatpush.bf16.msra.mxu0 %v5200_v10  ;;  %5629 = vmatpush.bf16.msra.mxu2 %v5200_v10  ;;  %v914_v51 = vld [vmem:[%s9238_s1 + $0x90] sm:$0xff]  ;;  %v5171_v52 = vld [vmem:[%s5854_s22 + $0x18] sm:$0xff]  ;;  %v5184_v53 = vld [vmem:[%s5854_s22 + $0x80] sm:$0xff] }
  0x1d   : > { %5630 = vmatpush.bf16.msra.mxu3 %v5200_v10  ;;  %v608_v45 = vpack.c.b16 %v579_v44, %v579_v44  ;;  %v917_v54 = vld [vmem:[%s9238_s1 + $0xa8] sm:$0xff]  ;;  %v916_v55 = vld [vmem:[%s9238_s1 + $0xa0] sm:$0xff]  ;;  %v918_v58 = vld [vmem:[%s9238_s1 + $0xb0] sm:$0xff] }
  0x1e   : > { %995 = vperm.xlu2 %5676, %v904_v11   ;;  %v937_v56 = vld [vmem:[%s9238_s1 + $0x148] sm:$0xff]  ;;  %v939_v59 = vld [vmem:[%s9238_s1 + $0x158] sm:$0xff]  ;;  %v938_v60 = vld [vmem:[%s9238_s1 + $0x150] sm:$0xff] }
  0x1f   : > { %990 = vperm.xlu1 %5675, %v903_v12   ;;  %985 = vperm.xlu0 %5674, %v902_v13   ;;  %v5172_v61 = vld [vmem:[%s5854_s22 + $0x20] sm:$0xff]  ;;  %v5185_v62 = vld [vmem:[%s5854_s22 + $0x88] sm:$0xff]  ;;  %v919_v2 = vld [vmem:[%s9238_s1 + $0xb8] sm:$0xff] }
  0x20   : > { %690 = vmatpush.bf16.msra.mxu0 %v5199_v14  ;;  %5631 = vmatpush.bf16.msra.mxu2 %v5199_v14  ;;  %v941_v0 = vld [vmem:[%s9238_s1 + $0x168] sm:$0xff]  ;;  %v940_v1 = vld [vmem:[%s9238_s1 + $0x160] sm:$0xff]  ;;  %v942_v4 = vld [vmem:[%s9238_s1 + $0x170] sm:$0xff] }
  0x21   : > { %5632 = vmatpush.bf16.msra.mxu3 %v5199_v14  ;;  %v921_v5 = vld [vmem:[%s9238_s1 + $0xc8] sm:$0xff]  ;;  %v920_v6 = vld [vmem:[%s9238_s1 + $0xc0] sm:$0xff]  ;;  %v5186_v8 = vld [vmem:[%s5854_s22 + $0x90] sm:$0xff] }
  0x22   : > { %v5173_v7 = vld [vmem:[%s5854_s22 + $0x28] sm:$0xff]  ;;  %v923_v12 = vld [vmem:[%s9238_s1 + $0xd8] sm:$0xff]  ;;  %v922_v13 = vld [vmem:[%s9238_s1 + $0xd0] sm:$0xff] }
  0x23   : > { %v943_v14 = vld [vmem:[%s9238_s1 + $0x178] sm:$0xff]  ;;  %v5176_v43 = vld [vmem:[%s5854_s22 + $0x40] sm:$0xff]  ;;  %v5189_v44 = vld [vmem:[%s5854_s22 + $0xa8] sm:$0xff] }
  0x24   : > { %691 = vmatpush.bf16.msra.mxu0 %v5198_v15  ;;  %5633 = vmatpush.bf16.msra.mxu2 %v5198_v15  ;;  %vm8093_vm5 = vmor %vm4291_vm3, %vm4292_vm4 }
  0x25   : > { %5634 = vmatpush.bf16.msra.mxu3 %v5198_v15 }
  0x26   : > { %1010 = vperm.xlu2 %5676, %v907_v16  }
  0x27   : > { %1005 = vperm.xlu1 %5675, %v906_v17   ;;  %1000 = vperm.xlu0 %5674, %v905_v18   ;;  %v946_v18 = vld [vmem:[%s9238_s1 + $0x190] sm:$0xff] }
  0x28   : > { %692 = vmatpush.bf16.msra.mxu0 %v5197_v19  ;;  %5635 = vmatpush.bf16.msra.mxu2 %v5197_v19 }
  0x29   : > { %5636 = vmatpush.bf16.msra.mxu3 %v5197_v19  ;;  %v945_v19 = vld [vmem:[%s9238_s1 + $0x188] sm:$0xff] }
  0x2c   : > { %693 = vmatpush.bf16.msra.mxu0 %v5196_v20  ;;  %5637 = vmatpush.bf16.msra.mxu2 %v5196_v20 }
  0x2d   : > { %5638 = vmatpush.bf16.msra.mxu3 %v5196_v20  ;;  %v944_v20 = vld [vmem:[%s9238_s1 + $0x180] sm:$0xff] }
  0x2e   : > { %1095 = vperm.xlu2 %5676, %v924_v21   ;;  %v5174_v21 = vld [vmem:[%s5854_s22 + $0x30] sm:$0xff] }
  0x2f   : > { %1020 = vperm.xlu1 %5675, %v909_v22   ;;  %1015 = vperm.xlu0 %5674, %v908_v23   ;;  %v5187_v22 = vld [vmem:[%s5854_s22 + $0x98] sm:$0xff] }
  0x30   : > { %694 = vmatmul.bf16.vlgmr.msra.gmra.mxu0 %v5168_v24  ;;  %759 = vmatmul.bf16.vlgmr.msra.gmra.mxu2 %v5181_v25 }
  0x31   : > { %829 = vmatmul.bf16.vlgmr.msra.gmra.mxu3 %v5195_v34  ;;  %v950_v34 = vld [vmem:[%s9238_s1 + $0x1b0] sm:$0xff] }
  0x36   : > { %1110 = vperm.xlu2 %5676, %v927_v26   ;;  %v949_v26 = vld [vmem:[%s9238_s1 + $0x1a8] sm:$0xff] }
  0x37   : > { %1105 = vperm.xlu1 %5675, %v926_v27   ;;  %1100 = vperm.xlu0 %5674, %v925_v28   ;;  %v948_v27 = vld [vmem:[%s9238_s1 + $0x1a0] sm:$0xff]  ;;  %v947_v28 = vld [vmem:[%s9238_s1 + $0x198] sm:$0xff] }
  0x3e   : > { %1115 = vperm.xlu2 %5676, %v928_v29  }
  0x3f   : > { %1030 = vperm.xlu1 %5675, %v911_v30   ;;  %1025 = vperm.xlu0 %5674, %v910_v31  }
  0x40   : > { %699 = vmatmul.bf16.gmra.mxu0 %v5169_v32  ;;  %764 = vmatmul.bf16.gmra.mxu2 %v5182_v33  ;;  %v952_v32 = vld [vmem:[%s9238_s1 + $0x1c0] sm:$0xff]  ;;  %v951_v33 = vld [vmem:[%s9238_s1 + $0x1b8] sm:$0xff] }
  0x41   : > { %834 = vmatmul.bf16.gmra.mxu3 %v608_v45 }
  0x46   : > { %1130 = vperm.xlu2 %5676, %v931_v35   ;;  %v5175_v35 = vld [vmem:[%s5854_s22 + $0x38] sm:$0xff] }
  0x47   : > { %1125 = vperm.xlu1 %5675, %v930_v36   ;;  %1120 = vperm.xlu0 %5674, %v929_v37   ;;  %v5188_v36 = vld [vmem:[%s5854_s22 + $0xa0] sm:$0xff] }
  0x4e   : > { %1035 = vperm.xlu2 %5676, %v912_v38  }
  0x4f   : > { %1140 = vperm.xlu1 %5675, %v933_v39   ;;  %1135 = vperm.xlu0 %5674, %v932_v40  }
  0x50   : > { %704 = vmatmul.bf16.gmra.mxu0 %v5170_v41  ;;  %769 = vmatmul.bf16.gmra.mxu2 %v5183_v42 }
  0x56   : > { %1150 = vperm.xlu2 %5676, %v935_v46   ;;  %v6054_v46 = vld [vmem:[%s9240_s3] ss:$0 sm:$0xff] }
  0x57   : > { %1145 = vperm.xlu1 %5675, %v934_v47   ;;  %1040 = vperm.xlu0 %5674, %v913_v48  }
  0x5e   : > { %1155 = vperm.xlu2 %5676, %v936_v49  }
  0x5f   : > { %1050 = vperm.xlu1 %5675, %v915_v50   ;;  %1045 = vperm.xlu0 %5674, %v914_v51  }
  0x60   : > { %709 = vmatmul.bf16.gmra.mxu0 %v5171_v52  ;;  %774 = vmatmul.bf16.gmra.mxu2 %v5184_v53 }
  0x66   : > { %1060 = vperm.xlu2 %5676, %v917_v54  }
  0x67   : > { %1055 = vperm.xlu1 %5675, %v916_v55   ;;  %1160 = vperm.xlu0 %5674, %v937_v56  }
  0x68   : > { %v5938_v57 = vpop.permute.xlu2 %975 }
  0x6e   : > { %1065 = vperm.xlu2 %5676, %v918_v58  }
  0x6f   : > { %1170 = vperm.xlu1 %5675, %v939_v59   ;;  %1165 = vperm.xlu0 %5674, %v938_v60  }
  0x70   : > { %714 = vmatmul.bf16.gmra.mxu0 %v5172_v61  ;;  %779 = vmatmul.bf16.gmra.mxu2 %v5185_v62  ;;  %v5951_v63 = vpop.permute.xlu2 %980 }
  0x76   : > { %1180 = vperm.xlu2 %5676, %v941_v0  }
  0x77   : > { %1175 = vperm.xlu1 %5675, %v940_v1   ;;  %1070 = vperm.xlu0 %5674, %v919_v2   ;;  %v5177_v1 = vld [vmem:[%s5854_s22 + $0x48] sm:$0xff]  ;;  %v5190_v2 = vld [vmem:[%s5854_s22 + $0xb0] sm:$0xff] }
  0x78   : > { %v5962_v3 = vpop.permute.xlu2 %995 }
  0x7e   : > { %1185 = vperm.xlu2 %5676, %v942_v4  }
  0x7f   : > { %1080 = vperm.xlu1 %5675, %v921_v5   ;;  %1075 = vperm.xlu0 %5674, %v920_v6   ;;  %v6076_v5 = vld [vmem:[%s9241_s4] sm:$0xff] }
  0x80   : > { %719 = vmatmul.bf16.gmra.mxu0 %v5173_v7  ;;  %784 = vmatmul.bf16.gmra.mxu2 %v5186_v8  ;;  %v5975_v9 = vpop.permute.xlu2 %1010 }
  0x81   : > { %v5977_v10 = vpop.permute.xlu1 %965  ;;  %v5979_v11 = vpop.permute.xlu0 %955 }
  0x86   : > { %1090 = vperm.xlu2 %5676, %v923_v12  }
  0x87   : > { %1085 = vperm.xlu1 %5675, %v922_v13   ;;  %1190 = vperm.xlu0 %5674, %v943_v14   ;;  %v6085_v13 = vperm.slane %v6076_v5, 1 }
  0x88   : > { %v5990_v15 = vpop.permute.xlu2 %1095 }
  0x89   : > { %v5992_v16 = vpop.permute.xlu1 %970  ;;  %v961_v17 = vpop.permute.xlu0 %960 }
  0x8e   : > { %1205 = vperm.xlu2 %5676, %v946_v18  }
  0x8f   : > { %1200 = vperm.xlu1 %5675, %v945_v19   ;;  %1195 = vperm.xlu0 %5674, %v944_v20  }
  0x90   : > { %724 = vmatmul.bf16.gmra.mxu0 %v5174_v21  ;;  %789 = vmatmul.bf16.gmra.mxu2 %v5187_v22  ;;  %v6005_v23 = vpop.permute.xlu2 %1110 }
  0x91   : > { %v6007_v24 = vpop.permute.xlu1 %990  ;;  %v6009_v25 = vpop.permute.xlu0 %985 }
  0x96   : > { %1220 = vperm.xlu2 %5676, %v949_v26   ;;  %v6094_v26 = vperm.slane %v6076_v5, 2 }
  0x97   : > { %1215 = vperm.xlu1 %5675, %v948_v27   ;;  %1210 = vperm.xlu0 %5674, %v947_v28  }
  0x98   : > { %v6020_v29 = vpop.permute.xlu2 %1115 }
  0x99   : > { %v6022_v30 = vpop.permute.xlu1 %1005  ;;  %v6024_v31 = vpop.permute.xlu0 %1000 }
  0x9e   : > { %1235 = vperm.xlu2 %5676, %v952_v32  }
  0x9f   : > { %1230 = vperm.xlu1 %5675, %v951_v33   ;;  %1225 = vperm.xlu0 %5674, %v950_v34  }
  0xa0   : > { %729 = vmatmul.bf16.gmra.mxu0 %v5175_v35  ;;  %794 = vmatmul.bf16.gmra.mxu2 %v5188_v36  ;;  %v6037_v37 = vpop.permute.xlu2 %1130 }
  0xa1   : > { %v6039_v38 = vpop.permute.xlu1 %1020  ;;  %v6041_v39 = vpop.permute.xlu0 %1015 }
  0xa2   : > { %9414 = vst [vmem:[#allocation3_spill] sm:$0xff] %v6039_v38 }
  0xa8   : > { %v6043_v40 = vpop.permute.xlu2 %1035 }
  0xa9   : > { %9415 = vst [vmem:[#allocation4_spill] sm:$0xff] %v6043_v40  ;;  %v6045_v41 = vpop.permute.xlu1 %1105  ;;  %v6047_v42 = vpop.permute.xlu0 %1100 }
  0xad   : > { %v695_v45 = vpop.f32.mrf.mxu0 }
  0xae   : > { %v696_v50 = vadd.f32 %v6054_v46, %v695_v45 }
  0xb0   : > { %734 = vmatmul.bf16.gmra.mxu0 %v5176_v43  ;;  %799 = vmatmul.bf16.gmra.mxu2 %v5189_v44  ;;  %v6056_v47 = vpop.permute.xlu2 %1150  ;;  %v839_v53 = vmax.f32 %v696_v50, 0.0  ;;  %v6103_v43 = vperm.slane %v6076_v5, 0 }
  0xb1   : > { %9416 = vst [vmem:[#allocation5_spill] sm:$0xff] %v6056_v47  ;;  %v6058_v48 = vpop.permute.xlu1 %1030  ;;  %v6060_v49 = vpop.permute.xlu0 %1025 }
  0xb2   : > { %9417 = vst [vmem:[#allocation6_spill] sm:$0xff] %v6058_v48  ;;  %v1238_v60 = vmul.f32 %v5979_v11, %v839_v53 }
  0xb3   : > { %9418 = vst [vmem:[#allocation7_spill] sm:$0xff] %v6060_v49  ;;  %v760_v51 = vpop.f32.mrf.mxu2 }
  0xb4   : > { %v830_v33 = vpop.f32.mrf.mxu3  ;;  %v6098_v34 = vadd.f32 %v6054_v46, %v760_v51 }
  0xb5   : > { %v697_v52 = vpop.f32.mrf.mxu0 }
  0xb6   : > { %v698_v54 = vadd.f32 %v6054_v46, %v697_v52 }
  0xb8   : > { %v840_v55 = vmax.f32 %v698_v54, 0.0  ;;  %v6064_v56 = vpop.permute.xlu2 %1155 }
  0xb9   : > { %9419 = vst [vmem:[#allocation8_spill] sm:$0xff] %v6064_v56  ;;  %v6066_v58 = vpop.permute.xlu1 %1125  ;;  %v6068_v59 = vpop.permute.xlu0 %1120 }
  0xba   : > { %v1239_v61 = vmul.f32 %v961_v17, %v840_v55 }
  0xbb   : > { %v762_v62 = vpop.f32.mrf.mxu2 }
  0xbc   : > { %v5215_v0 = vpack.c.bf16 %v1239_v61, %v1238_v60  ;;  %v6117_v61 = vadd.f32 %v6054_v46, %v762_v62  ;;  %v5211_v62 = vld [vmem:[%s9243_s6 + $0x38] sm:$0xff] }
  0xbd   : > { %v700_v4 = vpop.f32.mrf.mxu0  ;;  %3672 = vmatpush.bf16.msra.mxu1 %v5211_v62  ;;  %5639 = vmatpush.bf16.msrb.mxu3 %v5211_v62 }
  0xbe   : > { %5216 = vst [vmem:[#allocation2] sm:$0xff] %v5215_v0   ;;  %v5354_v11 = vunpack.c.l.bf16 %v5215_v0  ;;  %v5355_v12 = vunpack.c.h.bf16 %v5215_v0  ;;  %v701_v14 = vadd.f32 %v6054_v46, %v700_v4  ;;  %v6123_v4 = vperm.slane %v6076_v5, 4 }
  0xc0   : > { %739 = vmatmul.bf16.gmra.mxu0 %v5177_v1  ;;  %804 = vmatmul.bf16.gmra.mxu2 %v5190_v2  ;;  %v6078_v6 = vpop.permute.xlu2 %1060  ;;  %v1559_v20 = vmul.f32 %v5354_v11, %v6085_v13  ;;  %v6091_v21 = vmul.f32 %v5355_v12, %v6085_v13  ;;  %v841_v27 = vmax.f32 %v701_v14, 0.0  ;;  %v6112_v51 = vmul.f32 %v5355_v12, %v6094_v26  ;;  %v5210_v14 = vld [vmem:[%s9243_s6 + $0x30] sm:$0xff] }
  0xc1   : > { %9420 = vst [vmem:[#allocation9_spill] sm:$0xff] %v6078_v6  ;;  %v6080_v7 = vpop.permute.xlu1 %1140  ;;  %v6082_v8 = vpop.permute.xlu0 %1135  ;;  %v6120_v2 = vperm.slane %v6076_v5, 3  ;;  %3673 = vmatpush.bf16.msra.mxu1 %v5210_v14  ;;  %5640 = vmatpush.bf16.msrb.mxu3 %v5210_v14 }
  0xc2   : > { %v1658_v53 = vrot.slane %v1559_v20, 1  ;;  %v9247_v54 = vrot.slane %v6091_v21, 1  ;;  %v1240_v55 = vmul.f32 %v5977_v10, %v841_v27  ;;  %v1508_v27 = vmul.f32 %v5354_v11, %v6103_v43 }
  0xc3   : > { %v765_v17 = vpop.f32.mrf.mxu2 }
  0xc4   : > { %v766_v18 = vadd.f32 %v6054_v46, %v765_v17 }
  0xc5   : > { %v702_v19 = vpop.f32.mrf.mxu0  ;;  %v1851_v22 = vld [vmem:[#allocation2] sm:$0xe] }
  0xc6   : > { %v703_v28 = vadd.f32 %v6054_v46, %v702_v19  ;;  %v1852_v32 = vunpack.c.l.bf16 %v1851_v22  ;;  %v867_v45 = vmax.f32 %v766_v18, 0.0  ;;  %v5178_v18 = vld [vmem:[%s5854_s22 + $0x50] sm:$0xff]  ;;  %v6133_v19 = vperm.slane %v6076_v5, 5 }
  0xc8   : > { %v842_v35 = vmax.f32 %v703_v28, 0.0  ;;  %v6100_v36 = vpop.permute.xlu2 %1065  ;;  %v1854_v44 = vmul.f32 %v6094_v26, %v1852_v32  ;;  %v1266_v20 = vmul.f32 %v5990_v15, %v867_v45  ;;  %v1660_v28 = vsel %vm1657_vm0, %v1658_v53, %v9247_v54  ;;  %v1410_v15 = vld [vmem:[%s9241_s4 + $0x8] sm:$0xff] }
  0xc9   : > { %9421 = vst [vmem:[#allocation10_spill] sm:$0xff] %v6100_v36  ;;  %v6106_v50 = vpop.permute.xlu1 %1145  ;;  %v6108_v52 = vpop.permute.xlu0 %1040  ;;  %v9248_v32 = vrot.slane %v6112_v51, 2 }
  0xca   : > { %9422 = vst [vmem:[#allocation11_spill] sm:$0xff] %v6106_v50  ;;  %v1241_v60 = vmul.f32 %v5992_v16, %v842_v35  ;;  %v1953_v1 = vrot.slane %v1854_v44, 2  ;;  %v5191_v16 = vld [vmem:[%s5854_s22 + $0xb8] sm:$0xff] }
  0xcb   : > { %9423 = vst [vmem:[#allocation12_spill] sm:$0xff] %v6108_v52  ;;  %v767_v0 = vpop.f32.mrf.mxu2 }
  0xcc   : > { %v5220_v17 = vpack.c.bf16 %v1241_v60, %v1240_v55  ;;  %v768_v10 = vadd.f32 %v6054_v46, %v767_v0  ;;  %v6143_v55 = vadd.f32 %v6054_v46, %v830_v33  ;;  %v832_v60 = vpop.f32.mrf.mxu3  ;;  %v1509_v0 = vmul.f32 %v5355_v12, %v6103_v43 }
  0xcd   : > { %v705_v22 = vpop.f32.mrf.mxu0  ;;  %v6206_v40 = vadd.f32 %v6054_v46, %v832_v60 }
  0xce   : > { %5548 = vst [vmem:[#allocation2 + $0x8] sm:$0xff] %v5220_v17   ;;  %v868_v35 = vmax.f32 %v768_v10, 0.0  ;;  %v706_v44 = vadd.f32 %v6054_v46, %v705_v22  ;;  %v5358_v11 = vunpack.c.l.bf16 %v5220_v17  ;;  %v5359_v53 = vunpack.c.h.bf16 %v5220_v17 }
  0xcf   : > { %9424 = vst [vmem:[#allocation13_spill] sm:$0xff] %v6143_v55  ;;  %v1955_v10 = vsel %vm1952_vm1, %v1953_v1, %v9248_v32  ;;  %v1803_v17 = vadd.f32 %v1660_v28, %v1508_v27 }
  0xd0   : > { %v1267_v33 = vmul.f32 %v6047_v42, %v868_v35  ;;  %v843_v22 = vmax.f32 %v706_v44, 0.0  ;;  %744 = vmatmul.bf16.gmra.mxu0 %v5178_v18  ;;  %809 = vmatmul.bf16.gmra.mxu2 %v5191_v16  ;;  %v6154_v62 = vpop.permute.xlu2 %1180  ;;  %v1561_v45 = vmul.f32 %v5358_v11, %v6085_v13  ;;  %v6165_v1 = vmul.f32 %v5358_v11, %v6094_v26 }
  0xd1   : > { %9425 = vst [vmem:[#allocation14_spill] sm:$0xff] %v6154_v62  ;;  %v6160_v54 = vpop.permute.xlu1 %1050  ;;  %v6162_v12 = vpop.permute.xlu0 %1045  ;;  %v6168_v42 = vperm.slane %v6076_v5, 6  ;;  %v6171_v18 = vperm.slane %v6076_v5, 7  ;;  %v6173_v16 = vperm.slane %v1410_v15, 0  ;;  %v2098_v28 = vadd.f32 %v1955_v10, %v1803_v17  ;;  %v5209_v17 = vld [vmem:[%s9243_s6 + $0x28] sm:$0xff] }
  0xd2   : > { %9426 = vst [vmem:[#allocation15_spill] sm:$0xff] %v6160_v54  ;;  %v5285_v35 = vpack.c.bf16 %v1267_v33, %v1266_v20  ;;  %v1661_v27 = vrot.slane %v1561_v45, 1  ;;  %v2153_v36 = vmul.f32 %v5359_v53, %v6120_v2  ;;  %v6178_v6 = vmul.f32 %v5359_v53, %v6123_v4  ;;  %3674 = vmatpush.bf16.msra.mxu1 %v5209_v17 }
  0xd3   : > { %9427 = vst [vmem:[#allocation16_spill] sm:$0xff] %v6162_v12  ;;  %v770_v32 = vpop.f32.mrf.mxu2  ;;  %v1510_v62 = vmul.f32 %v5358_v11, %v6103_v43  ;;  %v6182_v5 = vmul.f32 %v5359_v53, %v6085_v13  ;;  %v1242_v15 = vmul.f32 %v5938_v57, %v843_v22  ;;  %v1956_v33 = vrot.slane %v6165_v1, 2  ;;  %5641 = vmatpush.bf16.msrb.mxu3 %v5209_v17 }
  0xd4   : > { %v771_v20 = vadd.f32 %v6054_v46, %v770_v32  ;;  %v6188_v14 = vmul.f32 %v5359_v53, %v6103_v43  ;;  %v6190_v45 = vunpack.c.l.bf16 %v5285_v35  ;;  %v9429_v11 = vrot.slane %v6091_v21, 1  ;;  %v835_v48 = vpop.f32.mrf.mxu3 }
  0xd5   : > { %v707_v10 = vpop.f32.mrf.mxu0  ;;  %v2543_v54 = vld [vmem:[#allocation2 + $0xc] sm:$0xe]  ;;  %v6200_v32 = vmul.f32 %v5359_v53, %v6094_v26  ;;  %v6202_v22 = vunpack.c.h.bf16 %v5285_v35  ;;  %v6208_v21 = vadd.f32 %v2153_v36, %v2098_v28  ;;  %v9432_v35 = vrot.slane %v6112_v51, 2 }
  0xd6   : > { %9428 = vst [vmem:[#allocation17_spill] sm:$0xff] %v6190_v45  ;;  %v1662_v44 = vsel %vm1657_vm0, %v9429_v11, %v1661_v27  ;;  %v869_v1 = vmax.f32 %v771_v20, 0.0  ;;  %v708_v12 = vadd.f32 %v6054_v46, %v707_v10  ;;  %v2544_v57 = vunpack.c.l.bf16 %v2543_v54  ;;  %v5208_v54 = vld [vmem:[%s9243_s6 + $0x20] sm:$0xff] }
  0xd7   : > { %9430 = vst [vmem:[#allocation18_spill] sm:$0xff] %v6202_v22  ;;  %v1804_v52 = vadd.f32 %v1662_v44, %v1509_v0  ;;  %v1957_v20 = vsel %vm1952_vm1, %v9432_v35, %v1956_v33  ;;  %v9433_v0 = vrot.slane %v6182_v5, 1  ;;  %v6242_v17 = vmul.f32 %v6202_v22, %v6085_v13  ;;  %3675 = vmatpush.bf16.msra.mxu1 %v5208_v54  ;;  %v5192_v11 = vld [vmem:[%s5854_s22 + $0xc0] sm:$0xff] }
  0xd8   : > { %v844_v56 = vmax.f32 %v708_v12, 0.0  ;;  %v6211_v53 = vpop.permute.xlu2 %1185  ;;  %v1268_v44 = vmul.f32 %v6045_v41, %v869_v1  ;;  %v6230_v12 = vmul.f32 %v6190_v45, %v6103_v43  ;;  %v6234_v10 = vmul.f32 %v6133_v19, %v2544_v57  ;;  %5642 = vmatpush.bf16.msrb.mxu3 %v5208_v54 }
  0xd9   : > { %9431 = vst [vmem:[#allocation19_spill] sm:$0xff] %v6211_v53  ;;  %v1664_v60 = vsel %vm1657_vm0, %v1661_v27, %v9433_v0  ;;  %v6221_v36 = vpop.permute.xlu1 %1055  ;;  %v6223_v28 = vpop.permute.xlu0 %1160  ;;  %v2099_v51 = vadd.f32 %v1957_v20, %v1804_v52  ;;  %v6238_v41 = vmul.f32 %v6190_v45, %v6085_v13  ;;  %v5179_v0 = vld [vmem:[%s5854_s22 + $0x58] sm:$0xff] }
  0xda   : > { %9434 = vst [vmem:[#allocation20_spill] sm:$0xff] %v6221_v36  ;;  %v1243_v27 = vmul.f32 %v5951_v63, %v844_v56  ;;  %v1805_v35 = vadd.f32 %v1664_v60, %v1510_v62  ;;  %v6247_v63 = vmul.f32 %v6190_v45, %v6094_v26  ;;  %v6251_v56 = vmul.f32 %v6202_v22, %v6094_v26  ;;  %v5207_v62 = vld [vmem:[%s9243_s6 + $0x18] sm:$0xff] }
  0xdb   : > { %9435 = vst [vmem:[#allocation21_spill] sm:$0xff] %v6223_v28  ;;  %v772_v1 = vpop.f32.mrf.mxu2  ;;  %v9438_v60 = vrot.slane %v6200_v32, 2  ;;  %3676 = vmatpush.bf16.msra.mxu1 %v5207_v62  ;;  %v2644_v28 = vrot.slane %v6234_v10, 2 }
  0xdc   : > { %9436 = vst [vmem:[#allocation22_spill] sm:$0xff] %v6238_v41  ;;  %v5225_v57 = vpack.c.bf16 %v1243_v27, %v1242_v15  ;;  %v773_v20 = vadd.f32 %v6054_v46, %v772_v1  ;;  %v6266_v15 = vmul.f32 %v6202_v22, %v6103_v43  ;;  %5643 = vmatpush.bf16.msrb.mxu3 %v5207_v62  ;;  %v9440_v22 = vrot.slane %v6238_v41, 1  ;;  %v837_v49 = vpop.f32.mrf.mxu3 }
  0xdd   : > { %9437 = vst [vmem:[#allocation23_spill] sm:$0xff] %v6247_v63  ;;  %v710_v53 = vpop.f32.mrf.mxu0  ;;  %v1959_v54 = vsel %vm1952_vm1, %v1956_v33, %v9438_v60  ;;  %v9439_v60 = vrot.slane %v6242_v17, 1  ;;  %v5206_v49 = vld [vmem:[%s9243_s6 + $0x10] sm:$0xff] }
  0xde   : > { %v870_v48 = vmax.f32 %v773_v20, 0.0  ;;  %v711_v52 = vadd.f32 %v6054_v46, %v710_v53  ;;  %v6271_v45 = vunpack.c.l.bf16 %v5225_v57  ;;  %v6273_v36 = vunpack.c.h.bf16 %v5225_v57 }
  0xdf   : > { %v2100_v33 = vadd.f32 %v1959_v54, %v1805_v35  ;;  %v1716_v27 = vsel %vm1657_vm0, %v9440_v22, %v9439_v60  ;;  %v9445_v60 = vmax.f32 %v6117_v61, 0.0  ;;  %3677 = vmatpush.bf16.msra.mxu1 %v5206_v49 }
  0xe0   : > { %v1269_v20 = vmul.f32 %v6005_v23, %v870_v48  ;;  %v845_v1 = vmax.f32 %v711_v52, 0.0  ;;  %749 = vmatmul.bf16.gmra.mxu0 %v5179_v0  ;;  %814 = vmatmul.bf16.gmra.mxu2 %v5192_v11  ;;  %v1091_v53 = vpop.permute.xlu2 %1090  ;;  %v2154_v57 = vmul.f32 %v6271_v45, %v6120_v2  ;;  %v2253_v10 = vmul.f32 %v6271_v45, %v6123_v4 }
  0xe1   : > { %v6286_v35 = vpop.permute.xlu1 %1170  ;;  %v6288_v62 = vpop.permute.xlu0 %1165  ;;  %v6295_v23 = vmul.f32 %v6273_v36, %v6123_v4  ;;  %v2547_v22 = vmul.f32 %v6271_v45, %v6133_v19  ;;  %v6301_v11 = vmul.f32 %v6273_v36, %v6133_v19  ;;  %v9443_v48 = vrot.slane %v6251_v56, 2  ;;  %5644 = vmatpush.bf16.msrb.mxu3 %v5206_v49 }
  0xe2   : > { %9441 = vst [vmem:[#allocation24_spill] sm:$0xff] %v6286_v35  ;;  %v9444_v52 = vrot.slane %v6247_v63, 2  ;;  %v5290_v54 = vpack.c.bf16 %v1269_v20, %v1268_v44  ;;  %v6312_v41 = vmul.f32 %v1091_v53, %v9445_v60  ;;  %v2202_v35 = vadd.f32 %v2154_v57, %v2099_v51  ;;  %v5205_v57 = vld [vmem:[%s9243_s6 + $0x8] sm:$0xff] }
  0xe3   : > { %9442 = vst [vmem:[#allocation25_spill] sm:$0xff] %v6288_v62  ;;  %v2351_v62 = vrot.slane %v2253_v10, 1  ;;  %v775_v47 = vpop.f32.mrf.mxu2  ;;  %v9259_v38 = vrot.slane %v6295_v23, 1  ;;  %v2645_v50 = vrot.slane %v2547_v22, 2  ;;  %v9257_v55 = vrot.slane %v6301_v11, 2  ;;  %3678 = vmatpush.bf16.msra.mxu1 %v5205_v57 }
  0xe4   : > { %v6308_v0 = vsel %vm1952_vm1, %v9444_v52, %v9443_v48  ;;  %v6318_v63 = vmul.f32 %v6271_v45, %v6085_v13  ;;  %v6320_v48 = vunpack.c.l.bf16 %v5290_v54  ;;  %v1244_v61 = vmul.f32 %v6009_v25, %v845_v1 }
  0xe5   : > { %v776_v44 = vadd.f32 %v6054_v46, %v775_v47  ;;  %v9447_v51 = vrot.slane %v6178_v6, 1  ;;  %v712_v53 = vpop.f32.mrf.mxu0  ;;  %v2354_v10 = vsel %vm1657_vm0, %v2351_v62, %v9259_v38  ;;  %v2646_v22 = vsel %vm1952_vm1, %v2644_v28, %v2645_v50  ;;  %5645 = vmatpush.bf16.msrb.mxu3 %v5205_v57 }
  0xe6   : > { %9446 = vst [vmem:[#allocation26_spill] sm:$0xff] %v6320_v48  ;;  %v2648_v25 = vsel %vm1952_vm1, %v2645_v50, %v9257_v55  ;;  %v713_v6 = vadd.f32 %v6054_v46, %v712_v53  ;;  %v2496_v1 = vadd.f32 %v2354_v10, %v2202_v35  ;;  %v9256_v52 = vrot.slane %v6318_v63, 1  ;;  %v5204_v10 = vld [vmem:[%s9243_s6] sm:$0xff] }
  0xe7   : > { %v2352_v20 = vsel %vm1657_vm0, %v9447_v51, %v2351_v62  ;;  %v871_v47 = vmax.f32 %v776_v44, 0.0  ;;  %v6340_v60 = vunpack.c.h.bf16 %v5290_v54  ;;  %v2155_v28 = vmul.f32 %v6273_v36, %v6120_v2  ;;  %3679 = vmatpush.bf16.msra.mxu1 %v5204_v10 }
  0xe8   : > { %v2495_v49 = vadd.f32 %v2352_v20, %v6208_v21  ;;  %v6344_v21 = vmul.f32 %v6271_v45, %v6094_v26  ;;  %v846_v62 = vmax.f32 %v713_v6, 0.0  ;;  %v6349_v44 = vpop.permute.xlu2 %1205  ;;  %v2790_v35 = vadd.f32 %v2648_v25, %v2496_v1 }
  0xe9   : > { %9448 = vst [vmem:[#allocation27_spill] sm:$0xff] %v6340_v60  ;;  %v1270_v50 = vmul.f32 %v6020_v29, %v871_v47  ;;  %v9451_v54 = vrot.slane %v6182_v5, 1  ;;  %v6356_v53 = vpop.permute.xlu1 %1175  ;;  %v6358_v57 = vpop.permute.xlu0 %1070  ;;  %v6369_v5 = vmul.f32 %v6320_v48, %v6085_v13  ;;  %v1831_v47 = vadd.f32 %v1716_v27, %v6230_v12  ;;  %5646 = vmatpush.bf16.msrb.mxu3 %v5204_v10 }
  0xea   : > { %v2789_v51 = vadd.f32 %v2646_v22, %v2495_v49  ;;  %9449 = vst [vmem:[#allocation28_spill] sm:$0xff] %v6344_v21  ;;  %v9258_v49 = vrot.slane %v6344_v21, 2  ;;  %v6365_v22 = vadd.f32 %v2155_v28, %v2100_v33  ;;  %v1245_v25 = vmul.f32 %v6007_v24, %v846_v62 }
  0xeb   : > { %9450 = vst [vmem:[#allocation29_spill] sm:$0xff] %v6349_v44  ;;  %v1666_v20 = vsel %vm1657_vm0, %v9451_v54, %v9256_v52  ;;  %v6375_v6 = vmul.f32 %v6320_v48, %v6094_v26  ;;  %v777_v1 = vpop.f32.mrf.mxu2  ;;  %v9456_v33 = vrot.slane %v6200_v32, 2  ;;  %v9260_v24 = vrot.slane %v6369_v5, 1  ;;  %v5193_v52 = vld [vmem:[%s5854_s22 + $0xc8] sm:$0xff] }
  0xec   : > { %9452 = vst [vmem:[#allocation30_spill] sm:$0xff] %v6356_v53  ;;  %v1806_v29 = vadd.f32 %v1666_v20, %v6188_v14  ;;  %v2181_v14 = vmul.f32 %v6340_v60, %v6120_v2  ;;  %v6387_v12 = vmul.f32 %v6340_v60, %v6123_v4  ;;  %v6391_v27 = vmul.f32 %v6340_v60, %v6133_v19  ;;  %v5180_v20 = vld [vmem:[%s5854_s22 + $0x60] sm:$0xff] }
  0xed   : > { %9453 = vst [vmem:[#allocation31_spill] sm:$0xff] %v6358_v57  ;;  %v1961_v28 = vsel %vm1952_vm1, %v9456_v33, %v9258_v49  ;;  %v5230_v62 = vpack.c.bf16 %v1245_v25, %v1244_v61  ;;  %v778_v54 = vadd.f32 %v6054_v46, %v777_v1  ;;  %v715_v33 = vpop.f32.mrf.mxu0  ;;  %v9459_v10 = vrot.slane %v6242_v17, 1 }
  0xee   : > { %9454 = vst [vmem:[#allocation32_spill] sm:$0xff] %v6369_v5  ;;  %v2101_v55 = vadd.f32 %v1961_v28, %v1806_v29  ;;  %v2126_v38 = vadd.f32 %v6308_v0, %v1831_v47  ;;  %v716_v28 = vadd.f32 %v6054_v46, %v715_v33  ;;  %v9461_v17 = vrot.slane %v6375_v6, 2 }
  0xef   : > { %9455 = vst [vmem:[#allocation33_spill] sm:$0xff] %v6375_v6  ;;  %v1718_v49 = vsel %vm1657_vm0, %v9459_v10, %v9260_v24  ;;  %v6405_v25 = vunpack.c.l.bf16 %v5230_v62  ;;  %v6407_v1 = vunpack.c.h.bf16 %v5230_v62  ;;  %v872_v29 = vmax.f32 %v778_v54, 0.0 }
  0xf0   : > { %9457 = vst [vmem:[#allocation34_spill] sm:$0xff] %v6387_v12  ;;  %v1832_v32 = vadd.f32 %v1718_v49, %v6266_v15  ;;  %v9462_v10 = vrot.slane %v6251_v56, 2  ;;  %v6416_v47 = vadd.f32 %v2181_v14, %v2126_v38  ;;  %v6420_v24 = vmul.f32 %v6271_v45, %v6103_v43  ;;  %754 = vmatmul.bf16.gmra.mxu0 %v5180_v20  ;;  %v6423_v54 = vpop.permute.xlu2 %1220 }
  0xf1   : > { %9458 = vst [vmem:[#allocation35_spill] sm:$0xff] %v6391_v27  ;;  %v847_v61 = vmax.f32 %v716_v28, 0.0  ;;  %819 = vmatmul.bf16.gmra.mxu2 %v5193_v52  ;;  %v2844_v15 = vmul.f32 %v6405_v25, %v6168_v42  ;;  %v2845_v56 = vmul.f32 %v6407_v1, %v6168_v42  ;;  %v6429_v49 = vpop.permute.xlu1 %1080  ;;  %v6431_v38 = vpop.permute.xlu0 %1075  ;;  %v2943_v45 = vmul.f32 %v6405_v25, %v6171_v18 }
  0xf2   : > { %5550 = vst [vmem:[#allocation2 + $0x18] sm:$0xff] %v5230_v62   ;;  %v2013_v0 = vsel %vm1952_vm1, %v9462_v10, %v9461_v17  ;;  %v1271_v62 = vmul.f32 %v6068_v59, %v872_v29  ;;  %v6437_v59 = vmul.f32 %v6407_v1, %v6171_v18  ;;  %v6441_v52 = vmul.f32 %v6407_v1, %v6173_v16 }
  0xf3   : > { %9460 = vst [vmem:[#allocation36_spill] sm:$0xff] %v6407_v1  ;;  %v2156_v14 = vmul.f32 %v6405_v25, %v6120_v2  ;;  %v1246_v33 = vmul.f32 %v5962_v3, %v847_v61  ;;  %v2892_v29 = vadd.f32 %v2844_v15, %v2789_v51  ;;  %v6446_v28 = vadd.f32 %v2845_v56, %v2790_v35  ;;  %v780_v17 = vpop.f32.mrf.mxu2 }
  0xf4   : > { %9463 = vst [vmem:[#allocation37_spill] sm:$0xff] %v6423_v54  ;;  %v5295_v20 = vpack.c.bf16 %v1271_v62, %v1270_v50  ;;  %v3041_v10 = vrot.slane %v2943_v45, 1  ;;  %v9261_v44 = vrot.slane %v6437_v59, 1  ;;  %v781_v53 = vadd.f32 %v6054_v46, %v780_v17 }
  0xf5   : > { %9464 = vst [vmem:[#allocation38_spill] sm:$0xff] %v6429_v49  ;;  %v2204_v49 = vadd.f32 %v2156_v14, %v2101_v55  ;;  %v2255_v50 = vmul.f32 %v6405_v25, %v6123_v4  ;;  %v717_v3 = vpop.f32.mrf.mxu0  ;;  %v6462_v61 = vmul.f32 %v6407_v1, %v6123_v4  ;;  %v2549_v55 = vmul.f32 %v6405_v25, %v6133_v19 }
  0xf6   : > { %9465 = vst [vmem:[#allocation39_spill] sm:$0xff] %v6431_v38  ;;  %v6450_v38 = vunpack.c.l.bf16 %v5295_v20  ;;  %v6452_v57 = vunpack.c.h.bf16 %v5295_v20  ;;  %v3043_v51 = vsel %vm1657_vm0, %v3041_v10, %v9261_v44  ;;  %v6468_v62 = vmul.f32 %v6407_v1, %v6133_v19 }
  0xf7   : > { %v873_v15 = vmax.f32 %v781_v53, 0.0  ;;  %v718_v56 = vadd.f32 %v6054_v46, %v717_v3  ;;  %v3186_v45 = vadd.f32 %v3043_v51, %v2892_v29  ;;  %v2355_v20 = vrot.slane %v2255_v50, 1 }
  0xf8   : > { %9466 = vst [vmem:[#allocation40_spill] sm:$0xff] %v6450_v38  ;;  %v9272_v17 = vrot.slane %v6462_v61, 1  ;;  %v2649_v10 = vrot.slane %v2549_v55, 2  ;;  %v9271_v44 = vrot.slane %v6468_v62, 2  ;;  %v1236_v5 = vpop.permute.xlu2 %1235  ;;  %v2127_v48 = vadd.f32 %v2013_v0, %v1832_v32  ;;  %v6493_v55 = vld [vmem:[%s9242_s5] ss:$0 sm:$0xff] }
  0xf9   : > { %9467 = vst [vmem:[#allocation41_spill] sm:$0xff] %v6452_v57  ;;  %v3234_v35 = vld [vmem:[#allocation2 + $0x18] sm:$0xe]  ;;  %v1272_v54 = vmul.f32 %v6066_v58, %v873_v15  ;;  %v848_v6 = vmax.f32 %v718_v56, 0.0  ;;  %v1086_v1 = vpop.permute.xlu1 %1085  ;;  %v6475_v21 = vpop.permute.xlu0 %1190  ;;  %v9469_v53 = vrot.slane %v6295_v23, 1  ;;  %v9470_v3 = vrot.slane %v6301_v11, 2 }
  0xfa   : > { %v3235_v14 = vunpack.c.l.bf16 %v3234_v35  ;;  %9468 = vst [vmem:[#allocation42_spill] sm:$0xff] %v6475_v21  ;;  %v2358_v50 = vsel %vm1657_vm0, %v2355_v20, %v9272_v17  ;;  %v9471_v32 = vmax.f32 %v6098_v34, 0.0  ;;  %v2652_v11 = vsel %vm1952_vm1, %v2649_v10, %v9271_v44 }
  0xfb   : > { %v2356_v29 = vsel %vm1657_vm0, %v9469_v53, %v2355_v20  ;;  %v2650_v58 = vsel %vm1952_vm1, %v9470_v3, %v2649_v10  ;;  %v1247_v5 = vmul.f32 %v6024_v31, %v848_v6  ;;  %v782_v23 = vpop.f32.mrf.mxu2  ;;  %v2498_v15 = vadd.f32 %v2358_v50, %v2204_v49 }
  0xfc   : > { %v3237_v60 = vmul.f32 %v6173_v16, %v3235_v14  ;;  %v1264_v0 = vmul.f32 %v1086_v1, %v9471_v32  ;;  %v2497_v35 = vadd.f32 %v2356_v29, %v6365_v22  ;;  %v2182_v31 = vmul.f32 %v6450_v38, %v6120_v2  ;;  %v5194_v22 = vld [vmem:[%s5854_s22 + $0xd0] sm:$0xff] }
  0xfd   : > { %v5235_v6 = vpack.c.bf16 %v1247_v5, %v1246_v33  ;;  %v9472_v1 = vrot.slane %v6441_v52, 2  ;;  %v720_v14 = vpop.f32.mrf.mxu0  ;;  %v2792_v53 = vadd.f32 %v2652_v11, %v2498_v15  ;;  %v9477_v44 = vrot.slane %v6437_v59, 1 }
  0xfe   : > { %v3335_v51 = vrot.slane %v3237_v60, 2  ;;  %v5280_v34 = vpack.c.bf16 %v6312_v41, %v1264_v0  ;;  %v783_v60 = vadd.f32 %v6054_v46, %v782_v23  ;;  %v2791_v49 = vadd.f32 %v2650_v58, %v2497_v35 }
  0xff   : > { %v2230_v29 = vadd.f32 %v2182_v31, %v2127_v48  ;;  %v6506_v50 = vunpack.c.l.bf16 %v5235_v6  ;;  %v6508_v10 = vunpack.c.h.bf16 %v5235_v6  ;;  %v721_v5 = vadd.f32 %v6054_v46, %v720_v14 }
 0x100   : > { %v3337_v56 = vsel %vm1952_vm1, %v3335_v51, %v9472_v1  ;;  %v6510_v3 = vunpack.c.l.bf16 %v5280_v34  ;;  %v6512_v33 = vunpack.c.h.bf16 %v5280_v34  ;;  %v874_v41 = vmax.f32 %v783_v60, 0.0 }
 0x101   : > { %v3480_v20 = vadd.f32 %v3337_v56, %v3186_v45  ;;  %v2281_v45 = vmul.f32 %v6450_v38, %v6123_v4  ;;  %824 = vmatmul.bf16.gmra.mxu2 %v5194_v22  ;;  %v2945_v48 = vmul.f32 %v6506_v50, %v6171_v18  ;;  %v3239_v58 = vmul.f32 %v6506_v50, %v6173_v16  ;;  %v6529_v15 = vpop.permute.xlu1 %1200  ;;  %v6531_v11 = vpop.permute.xlu0 %1195 }
 0x102   : > { %9473 = vst [vmem:[#allocation43_spill] sm:$0xff] %v6510_v3  ;;  %v2846_v0 = vmul.f32 %v6506_v50, %v6168_v42  ;;  %v2847_v51 = vmul.f32 %v6508_v10, %v6168_v42  ;;  %v1273_v35 = vmul.f32 %v6037_v37, %v874_v41  ;;  %v849_v23 = vmax.f32 %v721_v5, 0.0 }
 0x103   : > { %9474 = vst [vmem:[#allocation44_spill] sm:$0xff] %v6512_v33  ;;  %v6516_v32 = vadd.f32 %v6493_v55, %v3480_v20  ;;  %v6535_v31 = vmul.f32 %v6508_v10, %v6171_v18  ;;  %v6539_v6 = vmul.f32 %v6508_v10, %v6173_v16  ;;  %v3044_v34 = vrot.slane %v2945_v48, 1  ;;  %v785_v14 = vpop.f32.mrf.mxu2 }
 0x104   : > { %9475 = vst [vmem:[#allocation45_spill] sm:$0xff] %v6529_v15  ;;  %v3338_v60 = vrot.slane %v3239_v58, 2  ;;  %v2894_v22 = vadd.f32 %v2846_v0, %v2791_v49  ;;  %v6541_v1 = vadd.f32 %v2847_v51, %v2792_v53  ;;  %v5300_v56 = vpack.c.bf16 %v1273_v35, %v1272_v54  ;;  %v9504_v15 = vld [vmem:[#allocation27_spill] sm:$0xff] }
 0x105   : > { %9476 = vst [vmem:[#allocation46_spill] sm:$0xff] %v6531_v11  ;;  %v1248_v37 = vmul.f32 %v6022_v30, %v849_v23  ;;  %v9277_v20 = vrot.slane %v6535_v31, 1  ;;  %v9274_v41 = vrot.slane %v6539_v6, 2  ;;  %v786_v5 = vadd.f32 %v6054_v46, %v785_v14  ;;  %v722_v58 = vpop.f32.mrf.mxu0 }
 0x106   : > { %v3045_v17 = vsel %vm1657_vm0, %v9477_v44, %v3044_v34  ;;  %v9478_v48 = vrot.slane %v6441_v52, 2  ;;  %v6555_v54 = vmul.f32 %v6452_v57, %v6123_v4  ;;  %v6557_v30 = vunpack.c.l.bf16 %v5300_v56 }
 0x107   : > { %v6559_v53 = vunpack.c.h.bf16 %v5300_v56  ;;  %v3187_v0 = vadd.f32 %v3045_v17, %v6446_v28  ;;  %v3047_v59 = vsel %vm1657_vm0, %v3044_v34, %v9277_v20  ;;  %v875_v44 = vmax.f32 %v786_v5, 0.0 }
 0x108   : > { %v3339_v49 = vsel %vm1952_vm1, %v9478_v48, %v3338_v60  ;;  %v723_v52 = vadd.f32 %v6054_v46, %v722_v58  ;;  %v3188_v51 = vadd.f32 %v3047_v59, %v2894_v22  ;;  %v3341_v35 = vsel %vm1952_vm1, %v3338_v60, %v9274_v41 }
 0x109   : > { %v3481_v23 = vadd.f32 %v3339_v49, %v3187_v0  ;;  %v2407_v14 = vrot.slane %v2281_v45, 1  ;;  %v9276_v56 = vrot.slane %v6555_v54, 1  ;;  %v2575_v48 = vmul.f32 %v6450_v38, %v6133_v19  ;;  %v6577_v22 = vpop.permute.xlu1 %1215  ;;  %v6579_v5 = vpop.permute.xlu0 %1210 }
 0x10a   : > { %v1274_v28 = vmul.f32 %v6082_v8, %v875_v44  ;;  %v850_v17 = vmax.f32 %v723_v52, 0.0  ;;  %v3482_v33 = vadd.f32 %v3341_v35, %v3188_v51  ;;  %v6575_v34 = vmul.f32 %v6452_v57, %v6133_v19  ;;  %9479 = vst [vmem:[#allocation47_spill] sm:$0xff] %v6577_v22 }
 0x10b   : > { %9480 = vst [vmem:[#allocation48_spill] sm:$0xff] %v6579_v5  ;;  %v3533_v60 = vadd.f32 %v6493_v55, %v3481_v23  ;;  %v9481_v45 = vrot.slane %v6387_v12, 1  ;;  %v2410_v8 = vsel %vm1657_vm0, %v2407_v14, %v9276_v56  ;;  %v2701_v58 = vrot.slane %v2575_v48, 2  ;;  %v787_v51 = vpop.f32.mrf.mxu2 }
 0x10c   : > { %v1249_v0 = vmul.f32 %v5975_v9, %v850_v17  ;;  %v6590_v59 = vadd.f32 %v6493_v55, %v3482_v33  ;;  %v2524_v52 = vadd.f32 %v2410_v8, %v2230_v29  ;;  %v9482_v23 = vrot.slane %v6391_v27, 2 }
 0x10d   : > { %v2408_v49 = vsel %vm1657_vm0, %v9481_v45, %v2407_v14  ;;  %v3580_v35 = vpack.c.bf16 %v3533_v60, %v6516_v32  ;;  %v9275_v41 = vrot.slane %v6575_v34, 2  ;;  %v2872_v14 = vmul.f32 %v6557_v30, %v6168_v42  ;;  %v725_v29 = vpop.f32.mrf.mxu0 }
 0x10e   : > { %v2523_v44 = vadd.f32 %v2408_v49, %v6416_v47  ;;  %v2702_v45 = vsel %vm1952_vm1, %v9482_v23, %v2701_v58  ;;  %v5240_v48 = vpack.c.bf16 %v1249_v0, %v1248_v37  ;;  %v788_v9 = vadd.f32 %v6054_v46, %v787_v51 }
 0x10f   : > { %v2873_v47 = vmul.f32 %v6559_v53, %v6168_v42  ;;  %3680 = vmatmul.bf16.vlgmr.msra.gmra.mxu1 %v3580_v35  ;;  %v2704_v32 = vsel %vm1952_vm1, %v2701_v58, %v9275_v41  ;;  %v6608_v17 = vmul.f32 %v6557_v30, %v6171_v18  ;;  %v2972_v60 = vmul.f32 %v6559_v53, %v6171_v18 }
 0x110   : > { %v2817_v33 = vadd.f32 %v2702_v45, %v2523_v44  ;;  %v6614_v37 = vmul.f32 %v6557_v30, %v6173_v16  ;;  %v6616_v49 = vunpack.c.l.bf16 %v5240_v48  ;;  %v6618_v8 = vunpack.c.h.bf16 %v5240_v48 }
 0x111   : > { %9483 = vst [vmem:[#allocation49_spill] sm:$0xff] %v6608_v17  ;;  %v876_v0 = vmax.f32 %v788_v9, 0.0  ;;  %v726_v44 = vadd.f32 %v6054_v46, %v725_v29  ;;  %v2818_v51 = vadd.f32 %v2704_v32, %v2524_v52  ;;  %v9281_v35 = vrot.slane %v6608_v17, 1  ;;  %v1231_v48 = vpop.permute.xlu1 %1230  ;;  %v1226_v9 = vpop.permute.xlu0 %1225 }
 0x112   : > { %9484 = vst [vmem:[#allocation50_spill] sm:$0xff] %v6614_v37  ;;  %v2920_v58 = vadd.f32 %v2872_v14, %v2817_v33  ;;  %v3098_v23 = vrot.slane %v2972_v60, 1  ;;  %v6625_v56 = vmul.f32 %v6616_v49, %v6171_v18  ;;  %v6629_v20 = vmul.f32 %v6616_v49, %v6173_v16 }
 0x113   : > { %v1275_v45 = vmul.f32 %v6080_v7, %v876_v0  ;;  %v851_v41 = vmax.f32 %v726_v44, 0.0  ;;  %v2921_v27 = vadd.f32 %v2873_v47, %v2818_v51  ;;  %v3266_v14 = vmul.f32 %v6559_v53, %v6173_v16  ;;  %v9486_v0 = vld [vmem:[#allocation13_spill] sm:$0xff]  ;;  %v790_v3 = vpop.f32.mrf.mxu2 }
 0x114   : > { %v3099_v52 = vsel %vm1657_vm0, %v9281_v35, %v3098_v23  ;;  %v9283_v7 = vrot.slane %v6614_v37, 2  ;;  %v9485_v32 = vmax.f32 %v6206_v40, 0.0  ;;  %v9487_v44 = vmax.f32 %v9486_v0, 0.0  ;;  %v9490_v0 = vld [vmem:[#allocation11_spill] sm:$0xff] }
 0x115   : > { %v5305_v33 = vpack.c.bf16 %v1275_v45, %v1274_v28  ;;  %v1250_v29 = vmul.f32 %v6041_v39, %v851_v41  ;;  %v9291_v47 = vrot.slane %v6625_v56, 1  ;;  %v9284_v51 = vrot.slane %v6629_v20, 2  ;;  %v727_v41 = vpop.f32.mrf.mxu0 }
 0x116   : > { %v1293_v60 = vmul.f32 %v1231_v48, %v9485_v32  ;;  %v1292_v12 = vmul.f32 %v1226_v9, %v9487_v44  ;;  %v3214_v35 = vadd.f32 %v3099_v52, %v2920_v58  ;;  %v3392_v17 = vrot.slane %v3266_v14, 2 }
 0x117   : > { %v6644_v22 = vunpack.c.l.bf16 %v5305_v33  ;;  %v6646_v5 = vunpack.c.h.bf16 %v5305_v33  ;;  %v791_v39 = vadd.f32 %v6054_v46, %v790_v3  ;;  %v9488_v40 = vrot.slane %v6535_v31, 1 }
 0x118   : > { %v5350_v28 = vpack.c.bf16 %v1293_v60, %v1292_v12  ;;  %v9489_v48 = vrot.slane %v6539_v6, 2  ;;  %v3393_v9 = vsel %vm1952_vm1, %v9283_v7, %v3392_v17  ;;  %v1513_v12 = vmul.f32 %v6273_v36, %v6103_v43 }
 0x119   : > { %v3049_v45 = vsel %vm1657_vm0, %v9488_v40, %v9291_v47  ;;  %v877_v3 = vmax.f32 %v791_v39, 0.0  ;;  %v728_v52 = vadd.f32 %v6054_v46, %v727_v41  ;;  %v6668_v14 = vmul.f32 %v6644_v22, %v6171_v18 }
 0x11a   : > { %v3343_v58 = vsel %vm1952_vm1, %v9489_v48, %v9284_v51  ;;  %5574 = vst [vmem:[#allocation2 + $0xd8] sm:$0xff] %v5350_v28   ;;  %v3189_v31 = vadd.f32 %v3049_v45, %v6541_v1  ;;  %v6672_v6 = vmul.f32 %v6644_v22, %v6173_v16  ;;  %v3508_v33 = vadd.f32 %v3393_v9, %v3214_v35  ;;  %v9491_v48 = vld [vmem:[#allocation3_spill] sm:$0xff] }
 0x11b   : > { %v1564_v32 = vmul.f32 %v6273_v36, %v6085_v13  ;;  %v6678_v60 = vmul.f32 %v6405_v25, %v6085_v13  ;;  %v1276_v44 = vmul.f32 %v9490_v0, %v877_v3  ;;  %v852_v28 = vmax.f32 %v728_v52, 0.0  ;;  %v792_v3 = vpop.f32.mrf.mxu2 }
 0x11c   : > { %v3483_v1 = vadd.f32 %v3343_v58, %v3189_v31  ;;  %v9288_v39 = vrot.slane %v6668_v14, 1  ;;  %v9285_v41 = vrot.slane %v6672_v6, 2  ;;  %v3560_v40 = vadd.f32 %v6493_v55, %v3508_v33 }
 0x11d   : > { %v1667_v45 = vrot.slane %v1564_v32, 1  ;;  %v9287_v35 = vrot.slane %v6678_v60, 1  ;;  %v1251_v9 = vmul.f32 %v9491_v48, %v852_v28  ;;  %v1859_v58 = vmul.f32 %v6273_v36, %v6094_v26 }
 0x11e   : > { %v3535_v7 = vadd.f32 %v6493_v55, %v3483_v1  ;;  %v3101_v51 = vsel %vm1657_vm0, %v3098_v23, %v9288_v39  ;;  %v3395_v31 = vsel %vm1952_vm1, %v3392_v17, %v9285_v41  ;;  %v9492_v33 = vrot.slane %v6318_v63, 1 }
 0x11f   : > { %v3215_v52 = vadd.f32 %v3101_v51, %v2921_v27  ;;  %v1670_v0 = vsel %vm1657_vm0, %v1667_v45, %v9287_v35  ;;  %v5245_v28 = vpack.c.bf16 %v1251_v9, %v1250_v29  ;;  %v793_v23 = vadd.f32 %v6054_v46, %v792_v3  ;;  %v730_v27 = vpop.f32.mrf.mxu0  ;;  %v9495_v3 = vld [vmem:[#allocation36_spill] sm:$0xff] }
 0x120   : > { %v1668_v32 = vsel %vm1657_vm0, %v9492_v33, %v1667_v45  ;;  %v3581_v1 = vpack.c.bf16 %v3535_v7, %v6590_v59  ;;  %v1808_v48 = vadd.f32 %v1670_v0, %v1513_v12  ;;  %v6706_v17 = vmul.f32 %v6405_v25, %v6094_v26  ;;  %v9493_v7 = vld [vmem:[#allocation28_spill] sm:$0xff] }
 0x121   : > { %v1807_v36 = vadd.f32 %v1668_v32, %v6420_v24  ;;  %v3509_v51 = vadd.f32 %v3395_v31, %v3215_v52  ;;  %v1962_v63 = vrot.slane %v1859_v58, 2  ;;  %v6708_v33 = vunpack.c.l.bf16 %v5245_v28  ;;  %v9496_v58 = vld [vmem:[#allocation5_spill] sm:$0xff] }
 0x122   : > { %v6710_v41 = vunpack.c.h.bf16 %v5245_v28  ;;  %v878_v45 = vmax.f32 %v793_v23, 0.0  ;;  %v731_v29 = vadd.f32 %v6054_v46, %v730_v27  ;;  %3685 = vmatmul.bf16.gmra.mxu1 %v3581_v1  ;;  %v9494_v24 = vrot.slane %v9493_v7, 2  ;;  %v9497_v7 = vld [vmem:[#allocation7_spill] sm:$0xff] }
 0x123   : > { %v3561_v59 = vadd.f32 %v6493_v55, %v3509_v51  ;;  %v9286_v12 = vrot.slane %v6706_v17, 2  ;;  %v2157_v52 = vmul.f32 %v9495_v3, %v6120_v2  ;;  %v2158_v28 = vmul.f32 %v6506_v50, %v6120_v2 }
 0x124   : > { %v1963_v9 = vsel %vm1952_vm1, %v9494_v24, %v1962_v63  ;;  %v1277_v31 = vmul.f32 %v9496_v58, %v878_v45  ;;  %v853_v32 = vmax.f32 %v731_v29, 0.0  ;;  %v2257_v1 = vmul.f32 %v6506_v50, %v6123_v4  ;;  %v795_v24 = vpop.f32.mrf.mxu2 }
 0x125   : > { %v2102_v0 = vadd.f32 %v1963_v9, %v1807_v36  ;;  %v3594_v46 = vpack.c.bf16 %v3561_v59, %v3560_v40  ;;  %v1965_v23 = vsel %vm1952_vm1, %v1962_v63, %v9286_v12  ;;  %v6730_v27 = vmul.f32 %v6508_v10, %v6123_v4 }
 0x126   : > { %v5310_v51 = vpack.c.bf16 %v1277_v31, %v1276_v44  ;;  %v1252_v45 = vmul.f32 %v9497_v7, %v853_v32  ;;  %v2103_v29 = vadd.f32 %v1965_v23, %v1808_v48  ;;  %v2359_v9 = vrot.slane %v2257_v1, 1  ;;  %v6747_v44 = vld [vmem:[%s9240_s3] ss:$0 sm:$0xff] }
 0x127   : > { %v2205_v36 = vadd.f32 %v2157_v52, %v2102_v0  ;;  %3750 = vmatmul.bf16.vlgmr.msrb.gmra.mxu3 %v3594_v46  ;;  %v9290_v40 = vrot.slane %v6730_v27, 1  ;;  %v2551_v63 = vmul.f32 %v6506_v50, %v6133_v19  ;;  %v6738_v59 = vmul.f32 %v6508_v10, %v6133_v19  ;;  %v732_v31 = vpop.f32.mrf.mxu0 }
 0x128   : > { %v6740_v58 = vunpack.c.l.bf16 %v5310_v51  ;;  %v6742_v12 = vunpack.c.h.bf16 %v5310_v51  ;;  %v796_v48 = vadd.f32 %v6747_v44, %v795_v24  ;;  %v2206_v52 = vadd.f32 %v2158_v28, %v2103_v29 }
 0x129   : > { %v9499_v32 = vrot.slane %v6462_v61, 1  ;;  %v2362_v46 = vsel %vm1657_vm0, %v2359_v9, %v9290_v40  ;;  %v2653_v23 = vrot.slane %v2551_v63, 2  ;;  %v9289_v1 = vrot.slane %v6738_v59, 2  ;;  %v9501_v63 = vld [vmem:[#allocation8_spill] sm:$0xff] }
 0x12a   : > { %9498 = vst [vmem:[#allocation13_spill] sm:$0xff] %v6742_v12  ;;  %v879_v51 = vmax.f32 %v796_v48, 0.0  ;;  %v733_v7 = vadd.f32 %v6747_v44, %v732_v31  ;;  %v2500_v39 = vadd.f32 %v2362_v46, %v2206_v52  ;;  %v9500_v24 = vrot.slane %v6468_v62, 2 }
 0x12b   : > { %v2360_v0 = vsel %vm1657_vm0, %v9499_v32, %v2359_v9  ;;  %v2656_v61 = vsel %vm1952_vm1, %v2653_v23, %v9289_v1  ;;  %v2848_v29 = vmul.f32 %v6616_v49, %v6168_v42  ;;  %v2849_v9 = vmul.f32 %v6618_v8, %v6168_v42 }
 0x12c   : > { %v2499_v35 = vadd.f32 %v2360_v0, %v2205_v36  ;;  %v2654_v28 = vsel %vm1952_vm1, %v9500_v24, %v2653_v23  ;;  %v1278_v48 = vmul.f32 %v9501_v63, %v879_v51  ;;  %v854_v32 = vmax.f32 %v733_v7, 0.0  ;;  %v9502_v23 = vld [vmem:[#allocation6_spill] sm:$0xff] }
 0x12d   : > { %v2794_v36 = vadd.f32 %v2656_v61, %v2500_v39  ;;  %v2948_v62 = vmul.f32 %v6618_v8, %v6171_v18  ;;  %v6773_v52 = vmul.f32 %v6708_v33, %v6171_v18  ;;  %v3242_v0 = vmul.f32 %v6618_v8, %v6173_v16  ;;  %v9503_v39 = vld [vmem:[#allocation26_spill] sm:$0xff] }
 0x12e   : > { %v2793_v31 = vadd.f32 %v2654_v28, %v2499_v35  ;;  %v6779_v46 = vmul.f32 %v6708_v33, %v6173_v16  ;;  %v1253_v24 = vmul.f32 %v9502_v23, %v854_v32  ;;  %v1538_v35 = vmul.f32 %v9503_v39, %v6103_v43  ;;  %v797_v28 = vpop.f32.mrf.mxu2 }
 0x12f   : > { %v2897_v7 = vadd.f32 %v2849_v9, %v2794_v36  ;;  %v3050_v61 = vrot.slane %v2948_v62, 1  ;;  %v9293_v63 = vrot.slane %v6773_v52, 1  ;;  %v3344_v1 = vrot.slane %v3242_v0, 2  ;;  %v735_v9 = vpop.f32.mrf.mxu0 }
 0x130   : > { %v2896_v51 = vadd.f32 %v2848_v29, %v2793_v31  ;;  %v9294_v40 = vrot.slane %v6779_v46, 2  ;;  %v5250_v47 = vpack.c.bf16 %v1253_v24, %v1252_v45  ;;  %v798_v37 = vadd.f32 %v6747_v44, %v797_v28 }
 0x131   : > { %v1539_v11 = vmul.f32 %v9504_v15, %v6103_v43  ;;  %v1590_v29 = vmul.f32 %v9504_v15, %v6085_v13  ;;  %v9505_v32 = vrot.slane %v6625_v56, 1  ;;  %v3053_v36 = vsel %vm1657_vm0, %v3050_v61, %v9293_v63  ;;  %v9508_v63 = vld [vmem:[#allocation21_spill] sm:$0xff] }
 0x132   : > { %v9506_v62 = vrot.slane %v6629_v20, 2  ;;  %v3347_v0 = vsel %vm1952_vm1, %v3344_v1, %v9294_v40  ;;  %v6803_v23 = vunpack.c.l.bf16 %v5250_v47  ;;  %v6805_v24 = vunpack.c.h.bf16 %v5250_v47 }
 0x133   : > { %v3051_v31 = vsel %vm1657_vm0, %v9505_v32, %v3050_v61  ;;  %v880_v28 = vmax.f32 %v798_v37, 0.0  ;;  %v736_v56 = vadd.f32 %v6747_v44, %v735_v9  ;;  %v3191_v39 = vadd.f32 %v3053_v36, %v2897_v7  ;;  %v9509_v9 = vld [vmem:[#allocation32_spill] sm:$0xff] }
 0x134   : > { %v3345_v45 = vsel %vm1952_vm1, %v9506_v62, %v3344_v1  ;;  %9507 = vst [vmem:[#allocation11_spill] sm:$0xff] %v6805_v24  ;;  %v3190_v32 = vadd.f32 %v3051_v31, %v2896_v51  ;;  %v6810_v61 = vmul.f32 %v6450_v38, %v6085_v13  ;;  %v1719_v20 = vrot.slane %v1590_v29, 1  ;;  %v9511_v29 = vld [vmem:[#allocation4_spill] sm:$0xff] }
 0x135   : > { %v1279_v62 = vmul.f32 %v9508_v63, %v880_v28  ;;  %v855_v21 = vmax.f32 %v736_v56, 0.0  ;;  %v1885_v1 = vmul.f32 %v9504_v15, %v6094_v26  ;;  %v6817_v47 = vmul.f32 %v6450_v38, %v6094_v26 }
 0x136   : > { %v3484_v37 = vadd.f32 %v3345_v45, %v3190_v32  ;;  %v3485_v40 = vadd.f32 %v3347_v0, %v3191_v39  ;;  %v9510_v51 = vrot.slane %v9509_v9, 1  ;;  %v9299_v31 = vrot.slane %v6810_v61, 1  ;;  %v800_v56 = vpop.f32.mrf.mxu2 }
 0x137   : > { %v5315_v36 = vpack.c.bf16 %v1279_v62, %v1278_v48  ;;  %v1254_v24 = vmul.f32 %v9511_v29, %v855_v21  ;;  %v2014_v28 = vrot.slane %v1885_v1, 2  ;;  %v9298_v45 = vrot.slane %v6817_v47, 2  ;;  %v9514_v1 = vld [vmem:[#allocation33_spill] sm:$0xff] }
 0x138   : > { %v1720_v7 = vsel %vm1657_vm0, %v9510_v51, %v1719_v20  ;;  %v3536_v15 = vadd.f32 %v6493_v55, %v3484_v37  ;;  %v3537_v12 = vadd.f32 %v6493_v55, %v3485_v40  ;;  %v1722_v39 = vsel %vm1657_vm0, %v1719_v20, %v9299_v31 }
 0x139   : > { %v1833_v63 = vadd.f32 %v1720_v7, %v1538_v35  ;;  %v6830_v0 = vunpack.c.l.bf16 %v5315_v36  ;;  %v6832_v32 = vunpack.c.h.bf16 %v5315_v36  ;;  %v801_v48 = vadd.f32 %v6747_v44, %v800_v56  ;;  %v737_v35 = vpop.f32.mrf.mxu0  ;;  %v9516_v56 = vld [vmem:[#allocation25_spill] sm:$0xff] }
 0x13a   : > { %v1834_v21 = vadd.f32 %v1722_v39, %v1539_v11  ;;  %v3582_v62 = vpack.c.bf16 %v3537_v12, %v3536_v15  ;;  %v9515_v9 = vrot.slane %v9514_v1, 2  ;;  %v2017_v40 = vsel %vm1952_vm1, %v2014_v28, %v9298_v45 }
 0x13b   : > { %9512 = vst [vmem:[#allocation3_spill] sm:$0xff] %v6830_v0  ;;  %v2183_v20 = vmul.f32 %v6452_v57, %v6120_v2  ;;  %v881_v51 = vmax.f32 %v801_v48, 0.0  ;;  %v738_v7 = vadd.f32 %v6747_v44, %v737_v35  ;;  %v2184_v15 = vmul.f32 %v6557_v30, %v6120_v2 }
 0x13c   : > { %9513 = vst [vmem:[#allocation28_spill] sm:$0xff] %v6832_v32  ;;  %v2015_v37 = vsel %vm1952_vm1, %v9515_v9, %v2014_v28  ;;  %v2129_v29 = vadd.f32 %v2017_v40, %v1834_v21  ;;  %3690 = vmatmul.bf16.gmra.mxu1 %v3582_v62  ;;  %v2283_v11 = vmul.f32 %v6557_v30, %v6123_v4 }
 0x13d   : > { %v2128_v36 = vadd.f32 %v2015_v37, %v1833_v63  ;;  %v6850_v12 = vmul.f32 %v6559_v53, %v6123_v4  ;;  %v2577_v28 = vmul.f32 %v6557_v30, %v6133_v19  ;;  %v1280_v39 = vmul.f32 %v9516_v56, %v881_v51  ;;  %v9518_v37 = vld [vmem:[#allocation12_spill] sm:$0xff] }
 0x13e   : > { %v856_v48 = vmax.f32 %v738_v7, 0.0  ;;  %v6857_v63 = vmul.f32 %v6559_v53, %v6133_v19  ;;  %v2232_v21 = vadd.f32 %v2184_v15, %v2129_v29  ;;  %v2411_v62 = vrot.slane %v2283_v11, 1 }
 0x13f   : > { %v2231_v35 = vadd.f32 %v2183_v20, %v2128_v36  ;;  %v9301_v1 = vrot.slane %v6850_v12, 1  ;;  %v2705_v9 = vrot.slane %v2577_v28, 2  ;;  %v2874_v31 = vmul.f32 %v6644_v22, %v6168_v42  ;;  %v802_v20 = vpop.f32.mrf.mxu2 }
 0x140   : > { %9517 = vst [vmem:[#allocation36_spill] sm:$0xff] %v6857_v63  ;;  %v1255_v40 = vmul.f32 %v9518_v37, %v856_v48  ;;  %v2875_v51 = vmul.f32 %v6646_v5, %v6168_v42  ;;  %v9519_v7 = vrot.slane %v6555_v54, 1  ;;  %v9520_v15 = vrot.slane %v6575_v34, 2 }
 0x141   : > { %v2414_v29 = vsel %vm1657_vm0, %v2411_v62, %v9301_v1  ;;  %v2974_v28 = vmul.f32 %v6646_v5, %v6171_v18  ;;  %v803_v48 = vadd.f32 %v6747_v44, %v802_v20  ;;  %v9521_v54 = vrot.slane %v6857_v63, 2 }
 0x142   : > { %v2412_v36 = vsel %vm1657_vm0, %v9519_v7, %v2411_v62  ;;  %v2706_v11 = vsel %vm1952_vm1, %v9520_v15, %v2705_v9  ;;  %v5255_v56 = vpack.c.bf16 %v1255_v40, %v1254_v24  ;;  %v2526_v45 = vadd.f32 %v2414_v29, %v2232_v21  ;;  %v740_v15 = vpop.f32.mrf.mxu0 }
 0x143   : > { %v2525_v37 = vadd.f32 %v2412_v36, %v2231_v35  ;;  %v2708_v7 = vsel %vm1952_vm1, %v2705_v9, %v9521_v54  ;;  %v6883_v32 = vmul.f32 %v6740_v58, %v6171_v18  ;;  %v3102_v62 = vrot.slane %v2974_v28, 1  ;;  %v9524_v28 = vld [vmem:[#allocation24_spill] sm:$0xff] }
 0x144   : > { %v3268_v34 = vmul.f32 %v6646_v5, %v6173_v16  ;;  %v6887_v1 = vunpack.c.l.bf16 %v5255_v56  ;;  %v6889_v24 = vunpack.c.h.bf16 %v5255_v56  ;;  %v882_v40 = vmax.f32 %v803_v48, 0.0 }
 0x145   : > { %v2819_v35 = vadd.f32 %v2706_v11, %v2525_v37  ;;  %v2820_v21 = vadd.f32 %v2708_v7, %v2526_v45  ;;  %v9523_v20 = vrot.slane %v6668_v14, 1  ;;  %v9310_v36 = vrot.slane %v6883_v32, 1 }
 0x146   : > { %9522 = vst [vmem:[#allocation5_spill] sm:$0xff] %v6889_v24  ;;  %v6897_v29 = vmul.f32 %v6740_v58, %v6173_v16  ;;  %v1281_v54 = vmul.f32 %v9524_v28, %v882_v40  ;;  %v3396_v0 = vrot.slane %v3268_v34, 2  ;;  %v741_v56 = vadd.f32 %v6747_v44, %v740_v15 }
 0x147   : > { %v3103_v9 = vsel %vm1657_vm0, %v9523_v20, %v3102_v62  ;;  %v2922_v63 = vadd.f32 %v2874_v31, %v2819_v35  ;;  %v2923_v24 = vadd.f32 %v2875_v51, %v2820_v21  ;;  %v3105_v45 = vsel %vm1657_vm0, %v3102_v62, %v9310_v36  ;;  %v805_v15 = vpop.f32.mrf.mxu2 }
 0x148   : > { %v9305_v14 = vrot.slane %v6897_v29, 2  ;;  %v1514_v11 = vmul.f32 %v6405_v25, %v6103_v43  ;;  %v5320_v48 = vpack.c.bf16 %v1281_v54, %v1280_v39  ;;  %v9525_v7 = vrot.slane %v6672_v6, 2 }
 0x149   : > { %v3216_v37 = vadd.f32 %v3103_v9, %v2922_v63  ;;  %v857_v31 = vmax.f32 %v741_v56, 0.0  ;;  %v3217_v34 = vadd.f32 %v3105_v45, %v2923_v24  ;;  %v1515_v62 = vmul.f32 %v9495_v3, %v6103_v43  ;;  %v9528_v63 = vld [vmem:[#allocation16_spill] sm:$0xff] }
 0x14a   : > { %v3397_v40 = vsel %vm1952_vm1, %v9525_v7, %v3396_v0  ;;  %v3399_v51 = vsel %vm1952_vm1, %v3396_v0, %v9305_v14  ;;  %v1566_v35 = vmul.f32 %v9495_v3, %v6085_v13  ;;  %v6917_v25 = vunpack.c.l.bf16 %v5320_v48  ;;  %v742_v9 = vpop.f32.mrf.mxu0 }
 0x14b   : > { %v6919_v39 = vunpack.c.h.bf16 %v5320_v48  ;;  %v3510_v6 = vadd.f32 %v3397_v40, %v3216_v37  ;;  %v1256_v21 = vmul.f32 %v9528_v63, %v857_v31  ;;  %v3511_v20 = vadd.f32 %v3399_v51, %v3217_v34 }
 0x14c   : > { %9526 = vst [vmem:[#allocation7_spill] sm:$0xff] %v6917_v25  ;;  %v806_v24 = vadd.f32 %v6747_v44, %v805_v15  ;;  %v6925_v0 = vmul.f32 %v6506_v50, %v6085_v13  ;;  %v1671_v28 = vrot.slane %v1566_v35, 1  ;;  %v743_v56 = vadd.f32 %v6747_v44, %v742_v9 }
 0x14d   : > { %9527 = vst [vmem:[#allocation8_spill] sm:$0xff] %v6919_v39  ;;  %v3562_v54 = vadd.f32 %v6493_v55, %v3510_v6  ;;  %v1861_v45 = vmul.f32 %v9495_v3, %v6094_v26  ;;  %v6933_v48 = vmul.f32 %v6506_v50, %v6094_v26  ;;  %v3563_v37 = vadd.f32 %v6493_v55, %v3511_v20  ;;  %v9530_v3 = vld [vmem:[#allocation30_spill] sm:$0xff] }
 0x14e   : > { %v883_v7 = vmax.f32 %v806_v24, 0.0  ;;  %v9529_v40 = vrot.slane %v6678_v60, 1  ;;  %v9309_v34 = vrot.slane %v6925_v0, 1  ;;  %v858_v51 = vmax.f32 %v743_v56, 0.0  ;;  %v9531_v24 = vld [vmem:[#allocation15_spill] sm:$0xff] }
 0x14f   : > { %v1966_v35 = vrot.slane %v1861_v45, 2  ;;  %v9306_v6 = vrot.slane %v6933_v48, 2  ;;  %v3595_v63 = vpack.c.bf16 %v3563_v37, %v3562_v54  ;;  %v2159_v60 = vmul.f32 %v6508_v10, %v6120_v2 }
 0x150   : > { %v1672_v31 = vsel %vm1657_vm0, %v9529_v40, %v1671_v28  ;;  %v6942_v9 = vmul.f32 %v9530_v3, %v883_v7  ;;  %v1674_v20 = vsel %vm1657_vm0, %v1671_v28, %v9309_v34  ;;  %v1257_v40 = vmul.f32 %v9531_v24, %v858_v51 }
 0x151   : > { %v1809_v15 = vadd.f32 %v1672_v31, %v1514_v11  ;;  %v1810_v14 = vadd.f32 %v1674_v20, %v1515_v62  ;;  %v9532_v56 = vrot.slane %v6706_v17, 2  ;;  %v1969_v54 = vsel %vm1952_vm1, %v1966_v35, %v9306_v6  ;;  %3755 = vmatmul.bf16.gmra.mxu3 %v3595_v63 }
 0x152   : > { %v2160_v37 = vmul.f32 %v6616_v49, %v6120_v2  ;;  %v2259_v28 = vmul.f32 %v6616_v49, %v6123_v4  ;;  %v6962_v7 = vmul.f32 %v6618_v8, %v6123_v4  ;;  %v5260_v62 = vpack.c.bf16 %v1257_v40, %v1256_v21 }
 0x153   : > { %v1967_v11 = vsel %vm1952_vm1, %v9532_v56, %v1966_v35  ;;  %v2105_v17 = vadd.f32 %v1969_v54, %v1810_v14  ;;  %v2553_v31 = vmul.f32 %v6616_v49, %v6133_v19  ;;  %v6968_v51 = vmul.f32 %v6618_v8, %v6133_v19 }
 0x154   : > { %v2104_v45 = vadd.f32 %v1967_v11, %v1809_v15  ;;  %v2363_v35 = vrot.slane %v2259_v28, 1  ;;  %v9308_v63 = vrot.slane %v6962_v7, 1  ;;  %v2850_v3 = vmul.f32 %v6708_v33, %v6168_v42 }
 0x155   : > { %v6973_v20 = vunpack.c.l.bf16 %v5260_v62  ;;  %v6975_v24 = vunpack.c.h.bf16 %v5260_v62  ;;  %v2208_v21 = vadd.f32 %v2160_v37, %v2105_v17  ;;  %v2657_v14 = vrot.slane %v2553_v31, 2 }
 0x156   : > { %v2207_v15 = vadd.f32 %v2159_v60, %v2104_v45  ;;  %v9535_v40 = vrot.slane %v6730_v27, 1  ;;  %v2366_v60 = vsel %vm1657_vm0, %v2363_v35, %v9308_v63  ;;  %v9307_v11 = vrot.slane %v6968_v51, 2  ;;  %v807_v45 = vpop.f32.mrf.mxu2 }
 0x157   : > { %9533 = vst [vmem:[#allocation6_spill] sm:$0xff] %v6973_v20  ;;  %v2851_v54 = vmul.f32 %v6710_v41, %v6168_v42  ;;  %v2502_v6 = vadd.f32 %v2366_v60, %v2208_v21  ;;  %v9536_v62 = vrot.slane %v6738_v59, 2  ;;  %v2950_v27 = vmul.f32 %v6710_v41, %v6171_v18 }
 0x158   : > { %9534 = vst [vmem:[#allocation21_spill] sm:$0xff] %v6975_v24  ;;  %v2364_v56 = vsel %vm1657_vm0, %v9535_v40, %v2363_v35  ;;  %v2660_v17 = vsel %vm1952_vm1, %v2657_v14, %v9307_v11  ;;  %v6996_v31 = vmul.f32 %v6803_v23, %v6171_v18  ;;  %v3244_v35 = vmul.f32 %v6710_v41, %v6173_v16 }
 0x159   : > { %v2501_v28 = vadd.f32 %v2364_v56, %v2207_v15  ;;  %v2658_v37 = vsel %vm1952_vm1, %v9536_v62, %v2657_v14  ;;  %v7002_v15 = vmul.f32 %v6803_v23, %v6173_v16  ;;  %v2796_v21 = vadd.f32 %v2660_v17, %v2502_v6 }
 0x15a   : > { %v3054_v40 = vrot.slane %v2950_v27, 1  ;;  %v808_v56 = vadd.f32 %v6747_v44, %v807_v45  ;;  %v9314_v60 = vrot.slane %v6996_v31, 1  ;;  %v3348_v62 = vrot.slane %v3244_v35, 2  ;;  %v9539_v27 = vld [vmem:[#allocation14_spill] sm:$0xff] }
 0x15b   : > { %v2795_v59 = vadd.f32 %v2658_v37, %v2501_v28  ;;  %v9313_v14 = vrot.slane %v7002_v15, 2  ;;  %v1540_v11 = vmul.f32 %v6450_v38, %v6103_v43  ;;  %v2899_v34 = vadd.f32 %v2851_v54, %v2796_v21 }
 0x15c   : > { %v9537_v36 = vrot.slane %v6773_v52, 1  ;;  %v884_v39 = vmax.f32 %v808_v56, 0.0  ;;  %v3057_v6 = vsel %vm1657_vm0, %v3054_v40, %v9314_v60  ;;  %v9538_v45 = vrot.slane %v6779_v46, 2 }
 0x15d   : > { %v2898_v63 = vadd.f32 %v2850_v3, %v2795_v59  ;;  %v3351_v37 = vsel %vm1952_vm1, %v3348_v62, %v9313_v14  ;;  %v1541_v3 = vmul.f32 %v6452_v57, %v6103_v43  ;;  %v3193_v52 = vadd.f32 %v3057_v6, %v2899_v34 }
 0x15e   : > { %v3055_v24 = vsel %vm1657_vm0, %v9537_v36, %v3054_v40  ;;  %v3349_v28 = vsel %vm1952_vm1, %v9538_v45, %v3348_v62  ;;  %v1283_v36 = vmul.f32 %v9539_v27, %v884_v39  ;;  %v1592_v17 = vmul.f32 %v6452_v57, %v6085_v13  ;;  %v745_v40 = vpop.f32.mrf.mxu0 }
 0x15f   : > { %v3192_v54 = vadd.f32 %v3055_v24, %v2898_v63  ;;  %v7028_v35 = vmul.f32 %v6557_v30, %v6085_v13  ;;  %v1887_v46 = vmul.f32 %v6452_v57, %v6094_v26  ;;  %v7034_v59 = vmul.f32 %v6557_v30, %v6094_v26 }
 0x160   : > { %v2185_v63 = vmul.f32 %v6559_v53, %v6120_v2  ;;  %v3487_v24 = vadd.f32 %v3351_v37, %v3193_v52  ;;  %v5325_v39 = vpack.c.bf16 %v1283_v36, %v6942_v9  ;;  %v1723_v21 = vrot.slane %v1592_v17, 1 }
 0x161   : > { %v3486_v34 = vadd.f32 %v3349_v28, %v3192_v54  ;;  %v9316_v56 = vrot.slane %v7028_v35, 1  ;;  %v2018_v62 = vrot.slane %v1887_v46, 2  ;;  %v9315_v6 = vrot.slane %v7034_v59, 2 }
 0x162   : > { %v2186_v45 = vmul.f32 %v6644_v22, %v6120_v2  ;;  %v3539_v14 = vadd.f32 %v6493_v55, %v3487_v24  ;;  %v7045_v60 = vunpack.c.l.bf16 %v5325_v39  ;;  %v7047_v28 = vunpack.c.h.bf16 %v5325_v39 }
 0x163   : > { %v3538_v27 = vadd.f32 %v6493_v55, %v3486_v34  ;;  %v9542_v9 = vrot.slane %v6810_v61, 1  ;;  %v1726_v54 = vsel %vm1657_vm0, %v1723_v21, %v9316_v56  ;;  %v9543_v52 = vrot.slane %v6817_v47, 2 }
 0x164   : > { %9540 = vst [vmem:[#allocation32_spill] sm:$0xff] %v7045_v60  ;;  %v2021_v17 = vsel %vm1952_vm1, %v2018_v62, %v9315_v6  ;;  %v1836_v24 = vadd.f32 %v1726_v54, %v1541_v3  ;;  %v2285_v61 = vmul.f32 %v6644_v22, %v6123_v4  ;;  %v7065_v39 = vmul.f32 %v6646_v5, %v6123_v4 }
 0x165   : > { %9541 = vst [vmem:[#allocation4_spill] sm:$0xff] %v7047_v28  ;;  %v1724_v37 = vsel %vm1657_vm0, %v9542_v9, %v1723_v21  ;;  %v2019_v36 = vsel %vm1952_vm1, %v9543_v52, %v2018_v62  ;;  %v3583_v46 = vpack.c.bf16 %v3539_v14, %v3538_v27  ;;  %v2579_v21 = vmul.f32 %v6644_v22, %v6133_v19  ;;  %v9545_v27 = vld [vmem:[#allocation13_spill] sm:$0xff] }
 0x166   : > { %v1835_v34 = vadd.f32 %v1724_v37, %v1540_v11  ;;  %v7071_v47 = vmul.f32 %v6646_v5, %v6133_v19  ;;  %v2876_v62 = vmul.f32 %v6740_v58, %v6168_v42  ;;  %v2131_v14 = vadd.f32 %v2021_v17, %v1836_v24  ;;  %v747_v60 = vpop.f32.mrf.mxu0 }
 0x167   : > { %3695 = vmatmul.bf16.gmra.mxu1 %v3583_v46  ;;  %v2415_v3 = vrot.slane %v2285_v61, 1  ;;  %v2877_v9 = vmul.f32 %v9545_v27, %v6168_v42  ;;  %v9324_v37 = vrot.slane %v7065_v39, 1  ;;  %v2709_v54 = vrot.slane %v2579_v21, 2  ;;  %v9548_v61 = vld [vmem:[#allocation36_spill] sm:$0xff] }
 0x168   : > { %9544 = vst [vmem:[#allocation33_spill] sm:$0xff] %v7071_v47  ;;  %v2130_v11 = vadd.f32 %v2019_v36, %v1835_v34  ;;  %v2976_v6 = vmul.f32 %v9545_v27, %v6171_v18  ;;  %v2234_v57 = vadd.f32 %v2186_v45, %v2131_v14  ;;  %v9546_v38 = vrot.slane %v6850_v12, 1  ;;  %v9547_v36 = vld [vmem:[#allocation3_spill] sm:$0xff]  ;;  %v810_v34 = vpop.f32.mrf.mxu2 }
 0x169   : > { %v7086_v17 = vmul.f32 %v9547_v36, %v6171_v18  ;;  %v2418_v24 = vsel %vm1657_vm0, %v2415_v3, %v9324_v37  ;;  %v9549_v21 = vrot.slane %v9548_v61, 2  ;;  %v3270_v28 = vmul.f32 %v9545_v27, %v6173_v16 }
 0x16a   : > { %v2233_v56 = vadd.f32 %v2185_v63, %v2130_v11  ;;  %v2416_v46 = vsel %vm1657_vm0, %v9546_v38, %v2415_v3  ;;  %v9550_v63 = vrot.slane %v7071_v47, 2  ;;  %v3106_v12 = vrot.slane %v2976_v6, 1 }
 0x16b   : > { %v2710_v52 = vsel %vm1952_vm1, %v9549_v21, %v2709_v54  ;;  %v2528_v38 = vadd.f32 %v2418_v24, %v2234_v57  ;;  %v9336_v14 = vrot.slane %v7086_v17, 1  ;;  %v9551_v20 = vrot.slane %v6883_v32, 1 }
 0x16c   : > { %v2712_v45 = vsel %vm1952_vm1, %v2709_v54, %v9550_v63  ;;  %v2527_v11 = vadd.f32 %v2416_v46, %v2233_v56  ;;  %v7105_v61 = vmul.f32 %v9547_v36, %v6173_v16  ;;  %v746_v21 = vadd.f32 %v6747_v44, %v745_v40 }
 0x16d   : > { %v3107_v3 = vsel %vm1657_vm0, %v9551_v20, %v3106_v12  ;;  %v811_v6 = vadd.f32 %v6747_v44, %v810_v34  ;;  %v2822_v57 = vadd.f32 %v2712_v45, %v2528_v38  ;;  %v3109_v54 = vsel %vm1657_vm0, %v3106_v12, %v9336_v14  ;;  %v9554_v12 = vld [vmem:[#allocation19_spill] sm:$0xff] }
 0x16e   : > { %v2821_v56 = vadd.f32 %v2710_v52, %v2527_v11  ;;  %v3400_v46 = vrot.slane %v3270_v28, 2  ;;  %v9335_v24 = vrot.slane %v7105_v61, 2  ;;  %v859_v32 = vmax.f32 %v746_v21, 0.0  ;;  %v9553_v28 = vld [vmem:[#allocation20_spill] sm:$0xff] }
 0x16f   : > { %v885_v63 = vmax.f32 %v811_v6, 0.0  ;;  %v748_v20 = vadd.f32 %v6747_v44, %v747_v60  ;;  %v2925_v47 = vadd.f32 %v2877_v9, %v2822_v57  ;;  %v9552_v25 = vrot.slane %v6897_v29, 2  ;;  %v9555_v9 = vld [vmem:[#allocation9_spill] sm:$0xff] }
 0x170   : > { %v2924_v37 = vadd.f32 %v2876_v62, %v2821_v56  ;;  %v1516_v52 = vmul.f32 %v6506_v50, %v6103_v43  ;;  %v3403_v34 = vsel %vm1952_vm1, %v3400_v46, %v9335_v24  ;;  %v1258_v45 = vmul.f32 %v9553_v28, %v859_v32 }
 0x171   : > { %v3401_v40 = vsel %vm1952_vm1, %v9552_v25, %v3400_v46  ;;  %v7124_v11 = vmul.f32 %v9554_v12, %v885_v63  ;;  %v860_v38 = vmax.f32 %v748_v20, 0.0  ;;  %v3219_v62 = vadd.f32 %v3109_v54, %v2925_v47 }
 0x172   : > { %v3218_v60 = vadd.f32 %v3107_v3, %v2924_v37  ;;  %v1517_v29 = vmul.f32 %v6508_v10, %v6103_v43  ;;  %v1568_v25 = vmul.f32 %v6508_v10, %v6085_v13  ;;  %v7133_v21 = vmul.f32 %v6616_v49, %v6085_v13 }
 0x173   : > { %v1259_v50 = vmul.f32 %v9555_v9, %v860_v38  ;;  %v1863_v6 = vmul.f32 %v6508_v10, %v6094_v26  ;;  %v7139_v56 = vmul.f32 %v6616_v49, %v6094_v26  ;;  %v3513_v37 = vadd.f32 %v3403_v34, %v3219_v62 }
 0x174   : > { %v3512_v47 = vadd.f32 %v3401_v40, %v3218_v60  ;;  %v1675_v3 = vrot.slane %v1568_v25, 1  ;;  %v2161_v57 = vmul.f32 %v6618_v8, %v6120_v2  ;;  %v9329_v46 = vrot.slane %v7133_v21, 1 }
 0x175   : > { %v5265_v54 = vpack.c.bf16 %v1259_v50, %v1258_v45  ;;  %v1970_v32 = vrot.slane %v1863_v6, 2  ;;  %v9327_v63 = vrot.slane %v7139_v56, 2  ;;  %v3565_v10 = vadd.f32 %v6493_v55, %v3513_v37 }
 0x176   : > { %v3564_v20 = vadd.f32 %v6493_v55, %v3512_v47  ;;  %v9556_v28 = vrot.slane %v6925_v0, 1  ;;  %v2162_v40 = vmul.f32 %v6708_v33, %v6120_v2  ;;  %v1678_v45 = vsel %vm1657_vm0, %v1675_v3, %v9329_v46 }
 0x177   : > { %v7152_v34 = vunpack.c.l.bf16 %v5265_v54  ;;  %v7154_v38 = vunpack.c.h.bf16 %v5265_v54  ;;  %v1812_v25 = vadd.f32 %v1678_v45, %v1517_v29  ;;  %v9558_v55 = vrot.slane %v6933_v48, 2 }
 0x178   : > { %v1676_v12 = vsel %vm1657_vm0, %v9556_v28, %v1675_v3  ;;  %v3596_v62 = vpack.c.bf16 %v3565_v10, %v3564_v20  ;;  %v1973_v9 = vsel %vm1952_vm1, %v1970_v32, %v9327_v63  ;;  %v2261_v6 = vmul.f32 %v6708_v33, %v6123_v4  ;;  %v9559_v3 = vld [vmem:[#allocation11_spill] sm:$0xff] }
 0x179   : > { %9557 = vst [vmem:[#allocation25_spill] sm:$0xff] %v7154_v38  ;;  %v1811_v60 = vadd.f32 %v1676_v12, %v1516_v52  ;;  %v1971_v0 = vsel %vm1952_vm1, %v9558_v55, %v1970_v32  ;;  %v7169_v47 = vmul.f32 %v6710_v41, %v6123_v4  ;;  %v2555_v52 = vmul.f32 %v6708_v33, %v6133_v19 }
 0x17a   : > { %3760 = vmatmul.bf16.gmra.mxu3 %v3596_v62  ;;  %v2107_v29 = vadd.f32 %v1973_v9, %v1812_v25  ;;  %v7175_v48 = vmul.f32 %v6710_v41, %v6133_v19  ;;  %v2852_v37 = vmul.f32 %v6803_v23, %v6168_v42  ;;  %v2853_v54 = vmul.f32 %v9559_v3, %v6168_v42  ;;  %v812_v25 = vpop.f32.mrf.mxu2 }
 0x17b   : > { %v2106_v50 = vadd.f32 %v1971_v0, %v1811_v60  ;;  %v2367_v20 = vrot.slane %v2261_v6, 1  ;;  %v9328_v10 = vrot.slane %v7169_v47, 1  ;;  %v2661_v28 = vrot.slane %v2555_v52, 2 }
 0x17c   : > { %v2210_v12 = vadd.f32 %v2162_v40, %v2107_v29  ;;  %v9334_v45 = vrot.slane %v7175_v48, 2  ;;  %v2952_v60 = vmul.f32 %v9559_v3, %v6171_v18  ;;  %v7187_v62 = vmul.f32 %v6887_v1, %v6171_v18 }
 0x17d   : > { %v2209_v32 = vadd.f32 %v2161_v57, %v2106_v50  ;;  %v9560_v55 = vrot.slane %v6962_v7, 1  ;;  %v2370_v57 = vsel %vm1657_vm0, %v2367_v20, %v9328_v10  ;;  %v9561_v40 = vrot.slane %v6968_v51, 2 }
 0x17e   : > { %v3246_v50 = vmul.f32 %v9559_v3, %v6173_v16  ;;  %v2504_v52 = vadd.f32 %v2370_v57, %v2210_v12  ;;  %v2664_v29 = vsel %vm1952_vm1, %v2661_v28, %v9334_v45  ;;  %v3058_v7 = vrot.slane %v2952_v60, 1 }
 0x17f   : > { %v2368_v0 = vsel %vm1657_vm0, %v9560_v55, %v2367_v20  ;;  %v2662_v9 = vsel %vm1952_vm1, %v9561_v40, %v2661_v28  ;;  %v9333_v55 = vrot.slane %v7187_v62, 1  ;;  %v7206_v63 = vmul.f32 %v6887_v1, %v6173_v16 }
 0x180   : > { %v2503_v6 = vadd.f32 %v2368_v0, %v2209_v32  ;;  %v3352_v20 = vrot.slane %v3246_v50, 2  ;;  %v813_v51 = vadd.f32 %v6747_v44, %v812_v25  ;;  %v2798_v10 = vadd.f32 %v2664_v29, %v2504_v52 }
 0x181   : > { %v9562_v46 = vrot.slane %v6996_v31, 1  ;;  %v1542_v12 = vmul.f32 %v6557_v30, %v6103_v43  ;;  %v3061_v28 = vsel %vm1657_vm0, %v3058_v7, %v9333_v55  ;;  %v9563_v60 = vrot.slane %v7002_v15, 2 }
 0x182   : > { %v2797_v40 = vadd.f32 %v2662_v9, %v2503_v6  ;;  %v9330_v57 = vrot.slane %v7206_v63, 2  ;;  %v886_v25 = vmax.f32 %v813_v51, 0.0  ;;  %v2901_v50 = vadd.f32 %v2853_v54, %v2798_v10  ;;  %v9564_v6 = vld [vmem:[#allocation42_spill] sm:$0xff] }
 0x183   : > { %v3059_v32 = vsel %vm1657_vm0, %v9562_v46, %v3058_v7  ;;  %v3353_v0 = vsel %vm1952_vm1, %v9563_v60, %v3352_v20  ;;  %v1543_v31 = vmul.f32 %v6559_v53, %v6103_v43  ;;  %v1594_v46 = vmul.f32 %v6559_v53, %v6085_v13 }
 0x184   : > { %v2900_v9 = vadd.f32 %v2852_v37, %v2797_v40  ;;  %v3355_v30 = vsel %vm1952_vm1, %v3352_v20, %v9330_v57  ;;  %v1285_v52 = vmul.f32 %v9564_v6, %v886_v25  ;;  %v7231_v15 = vmul.f32 %v6644_v22, %v6085_v13 }
 0x185   : > { %v1889_v37 = vmul.f32 %v6559_v53, %v6094_v26  ;;  %v3195_v10 = vadd.f32 %v3061_v28, %v2901_v50  ;;  %v1727_v29 = vrot.slane %v1594_v46, 1  ;;  %v7237_v7 = vmul.f32 %v6644_v22, %v6094_v26  ;;  %v750_v28 = vpop.f32.mrf.mxu0 }
 0x186   : > { %v3194_v54 = vadd.f32 %v3059_v32, %v2900_v9  ;;  %v5330_v51 = vpack.c.bf16 %v1285_v52, %v7124_v11  ;;  %v9332_v20 = vrot.slane %v7231_v15, 1  ;;  %v2187_v60 = vmul.f32 %v6646_v5, %v6120_v2 }
 0x187   : > { %v2022_v40 = vrot.slane %v1889_v37, 2  ;;  %v3489_v6 = vadd.f32 %v3355_v30, %v3195_v10  ;;  %v9565_v57 = vrot.slane %v7028_v35, 1  ;;  %v9331_v32 = vrot.slane %v7237_v7, 2 }
 0x188   : > { %v3488_v25 = vadd.f32 %v3353_v0, %v3194_v54  ;;  %v7247_v9 = vunpack.c.l.bf16 %v5330_v51  ;;  %v7249_v50 = vunpack.c.h.bf16 %v5330_v51  ;;  %v1730_v11 = vsel %vm1657_vm0, %v1727_v29, %v9332_v20  ;;  %v7257_v0 = vld [vmem:[%s9242_s5] ss:$0 sm:$0xff]  ;;  %v815_v20 = vpop.f32.mrf.mxu2 }
 0x189   : > { %v1728_v53 = vsel %vm1657_vm0, %v9565_v57, %v1727_v29  ;;  %v3541_v57 = vadd.f32 %v7257_v0, %v3489_v6  ;;  %v1838_v30 = vadd.f32 %v1730_v11, %v1543_v31  ;;  %v9567_v52 = vrot.slane %v7034_v59, 2 }
 0x18a   : > { %9566 = vst [vmem:[#allocation12_spill] sm:$0xff] %v7249_v50  ;;  %v1837_v46 = vadd.f32 %v1728_v53, %v1542_v12  ;;  %v3540_v35 = vadd.f32 %v7257_v0, %v3488_v25  ;;  %v2025_v54 = vsel %vm1952_vm1, %v2022_v40, %v9331_v32  ;;  %v2188_v12 = vmul.f32 %v6740_v58, %v6120_v2 }
 0x18b   : > { %v2023_v37 = vsel %vm1952_vm1, %v9567_v52, %v2022_v40  ;;  %v2287_v29 = vmul.f32 %v6740_v58, %v6123_v4  ;;  %v2133_v25 = vadd.f32 %v2025_v54, %v1838_v30  ;;  %v7273_v31 = vmul.f32 %v9545_v27, %v6123_v4  ;;  %v9568_v30 = vld [vmem:[#allocation28_spill] sm:$0xff] }
 0x18c   : > { %v2132_v10 = vadd.f32 %v2023_v37, %v1837_v46  ;;  %v3584_v51 = vpack.c.bf16 %v3541_v57, %v3540_v35  ;;  %v2581_v59 = vmul.f32 %v6740_v58, %v6133_v19  ;;  %v7279_v40 = vmul.f32 %v9545_v27, %v6133_v19 }
 0x18d   : > { %v2419_v53 = vrot.slane %v2287_v29, 1  ;;  %v2878_v11 = vmul.f32 %v9547_v36, %v6168_v42  ;;  %v2236_v46 = vadd.f32 %v2188_v12, %v2133_v25  ;;  %v9338_v35 = vrot.slane %v7273_v31, 1  ;;  %v9570_v29 = vld [vmem:[#allocation7_spill] sm:$0xff]  ;;  %v9571_v25 = vld [vmem:[#allocation33_spill] sm:$0xff] }
 0x18e   : > { %v2235_v6 = vadd.f32 %v2187_v60, %v2132_v10  ;;  %3700 = vmatmul.bf16.gmra.mxu1 %v3584_v51  ;;  %v2713_v57 = vrot.slane %v2581_v59, 2  ;;  %v2879_v52 = vmul.f32 %v9568_v30, %v6168_v42  ;;  %v9569_v37 = vrot.slane %v7065_v39, 1 }
 0x18f   : > { %v9339_v54 = vrot.slane %v7279_v40, 2  ;;  %v2978_v10 = vmul.f32 %v9568_v30, %v6171_v18  ;;  %v7294_v32 = vmul.f32 %v9570_v29, %v6171_v18  ;;  %v2422_v12 = vsel %vm1657_vm0, %v2419_v53, %v9338_v35 }
 0x190   : > { %v2420_v60 = vsel %vm1657_vm0, %v9569_v37, %v2419_v53  ;;  %v9572_v59 = vrot.slane %v9571_v25, 2  ;;  %v3272_v37 = vmul.f32 %v9568_v30, %v6173_v16  ;;  %v2530_v55 = vadd.f32 %v2422_v12, %v2236_v46  ;;  %v752_v25 = vpop.f32.mrf.mxu0 }
 0x191   : > { %v2529_v51 = vadd.f32 %v2420_v60, %v2235_v6  ;;  %v2716_v45 = vsel %vm1952_vm1, %v2713_v57, %v9339_v54  ;;  %v3110_v24 = vrot.slane %v2978_v10, 1  ;;  %v9343_v14 = vrot.slane %v7294_v32, 1 }
 0x192   : > { %v2714_v39 = vsel %vm1952_vm1, %v9572_v59, %v2713_v57  ;;  %v7310_v6 = vmul.f32 %v9570_v29, %v6173_v16  ;;  %v3404_v53 = vrot.slane %v3272_v37, 2  ;;  %v751_v60 = vadd.f32 %v6747_v44, %v750_v28 }
 0x193   : > { %v2823_v50 = vadd.f32 %v2714_v39, %v2529_v51  ;;  %v2824_v59 = vadd.f32 %v2716_v45, %v2530_v55  ;;  %v9573_v35 = vrot.slane %v7086_v17, 1  ;;  %v3113_v57 = vsel %vm1657_vm0, %v3110_v24, %v9343_v14 }
 0x194   : > { %v816_v10 = vadd.f32 %v6747_v44, %v815_v20  ;;  %v9574_v51 = vrot.slane %v7105_v61, 2  ;;  %v9340_v37 = vrot.slane %v7310_v6, 2  ;;  %v861_v28 = vmax.f32 %v751_v60, 0.0  ;;  %v9575_v20 = vld [vmem:[#allocation10_spill] sm:$0xff] }
 0x195   : > { %v3111_v46 = vsel %vm1657_vm0, %v9573_v35, %v3110_v24  ;;  %v2926_v12 = vadd.f32 %v2878_v11, %v2823_v50  ;;  %v2927_v54 = vadd.f32 %v2879_v52, %v2824_v59  ;;  %v753_v17 = vadd.f32 %v6747_v44, %v752_v25 }
 0x196   : > { %v3405_v39 = vsel %vm1952_vm1, %v9574_v51, %v3404_v53  ;;  %v887_v45 = vmax.f32 %v816_v10, 0.0  ;;  %v1518_v55 = vmul.f32 %v6616_v49, %v6103_v43  ;;  %v3407_v24 = vsel %vm1952_vm1, %v3404_v53, %v9340_v37  ;;  %v9576_v51 = vld [vmem:[#allocation46_spill] sm:$0xff] }
 0x197   : > { %v3220_v35 = vadd.f32 %v3111_v46, %v2926_v12  ;;  %v1260_v50 = vmul.f32 %v9575_v20, %v861_v28  ;;  %v1519_v61 = vmul.f32 %v6618_v8, %v6103_v43  ;;  %v3221_v11 = vadd.f32 %v3113_v57, %v2927_v54  ;;  %v9577_v57 = vld [vmem:[#allocation31_spill] sm:$0xff] }
 0x198   : > { %v7334_v60 = vmul.f32 %v9576_v51, %v887_v45  ;;  %v862_v52 = vmax.f32 %v753_v17, 0.0  ;;  %v1570_v25 = vmul.f32 %v6618_v8, %v6085_v13  ;;  %v7340_v49 = vmul.f32 %v6708_v33, %v6085_v13 }
 0x199   : > { %v3514_v59 = vadd.f32 %v3405_v39, %v3220_v35  ;;  %v1865_v53 = vmul.f32 %v6618_v8, %v6094_v26  ;;  %v7346_v46 = vmul.f32 %v6708_v33, %v6094_v26  ;;  %v3515_v54 = vadd.f32 %v3407_v24, %v3221_v11 }
 0x19a   : > { %v1261_v10 = vmul.f32 %v9577_v57, %v862_v52  ;;  %v1679_v12 = vrot.slane %v1570_v25, 1  ;;  %v2163_v28 = vmul.f32 %v6710_v41, %v6120_v2  ;;  %v9342_v45 = vrot.slane %v7340_v49, 1 }
 0x19b   : > { %v3566_v39 = vadd.f32 %v7257_v0, %v3514_v59  ;;  %v1974_v17 = vrot.slane %v1865_v53, 2  ;;  %v9341_v35 = vrot.slane %v7346_v46, 2  ;;  %v3567_v8 = vadd.f32 %v7257_v0, %v3515_v54 }
 0x19c   : > { %v5270_v20 = vpack.c.bf16 %v1261_v10, %v1260_v50  ;;  %v9578_v51 = vrot.slane %v7133_v21, 1  ;;  %v2164_v11 = vmul.f32 %v6803_v23, %v6120_v2  ;;  %v1682_v52 = vsel %vm1657_vm0, %v1679_v12, %v9342_v45 }
 0x19d   : > { %v9579_v59 = vrot.slane %v7139_v56, 2  ;;  %v1977_v50 = vsel %vm1952_vm1, %v1974_v17, %v9341_v35  ;;  %v3597_v54 = vpack.c.bf16 %v3567_v8, %v3566_v39  ;;  %v1814_v10 = vadd.f32 %v1682_v52, %v1519_v61  ;;  %v817_v35 = vpop.f32.mrf.mxu2 }
 0x19e   : > { %v1680_v24 = vsel %vm1657_vm0, %v9578_v51, %v1679_v12  ;;  %v7369_v21 = vunpack.c.l.bf16 %v5270_v20  ;;  %v7371_v57 = vunpack.c.h.bf16 %v5270_v20  ;;  %v2263_v37 = vmul.f32 %v6803_v23, %v6123_v4 }
 0x19f   : > { %v1813_v25 = vadd.f32 %v1680_v24, %v1518_v55  ;;  %v1975_v53 = vsel %vm1952_vm1, %v9579_v59, %v1974_v17  ;;  %v7377_v55 = vmul.f32 %v9559_v3, %v6123_v4  ;;  %v2557_v56 = vmul.f32 %v6803_v23, %v6133_v19  ;;  %3765 = vmatmul.bf16.gmra.mxu3 %v3597_v54  ;;  %v9582_v17 = vld [vmem:[#allocation5_spill] sm:$0xff]  ;;  %v9583_v54 = vld [vmem:[#allocation6_spill] sm:$0xff] }
 0x1a0   : > { %9580 = vst [vmem:[#allocation24_spill] sm:$0xff] %v7369_v21  ;;  %v2109_v12 = vadd.f32 %v1977_v50, %v1814_v10  ;;  %v7383_v39 = vmul.f32 %v9559_v3, %v6133_v19  ;;  %v2854_v61 = vmul.f32 %v6887_v1, %v6168_v42  ;;  %v2855_v8 = vmul.f32 %v9582_v17, %v6168_v42 }
 0x1a1   : > { %9581 = vst [vmem:[#allocation16_spill] sm:$0xff] %v7371_v57  ;;  %v2108_v51 = vadd.f32 %v1975_v53, %v1813_v25  ;;  %v2371_v24 = vrot.slane %v2263_v37, 1  ;;  %v9346_v52 = vrot.slane %v7377_v55, 1  ;;  %v2665_v25 = vrot.slane %v2557_v56, 2 }
 0x1a2   : > { %v2212_v59 = vadd.f32 %v2164_v11, %v2109_v12  ;;  %v9354_v53 = vrot.slane %v7383_v39, 2  ;;  %v2954_v50 = vmul.f32 %v9582_v17, %v6171_v18  ;;  %v7395_v10 = vmul.f32 %v9583_v54, %v6171_v18 }
 0x1a3   : > { %v2211_v20 = vadd.f32 %v2163_v28, %v2108_v51  ;;  %v9584_v45 = vrot.slane %v7169_v47, 1  ;;  %v2374_v37 = vsel %vm1657_vm0, %v2371_v24, %v9346_v52  ;;  %v9585_v28 = vrot.slane %v7175_v48, 2 }
 0x1a4   : > { %v3248_v51 = vmul.f32 %v9582_v17, %v6173_v16  ;;  %v2506_v12 = vadd.f32 %v2374_v37, %v2212_v59  ;;  %v2668_v57 = vsel %vm1952_vm1, %v2665_v25, %v9354_v53  ;;  %v3062_v47 = vrot.slane %v2954_v50, 1 }
 0x1a5   : > { %v2372_v14 = vsel %vm1657_vm0, %v9584_v45, %v2371_v24  ;;  %v2666_v11 = vsel %vm1952_vm1, %v9585_v28, %v2665_v25  ;;  %v9353_v45 = vrot.slane %v7395_v10, 1  ;;  %v7414_v21 = vmul.f32 %v9583_v54, %v6173_v16 }
 0x1a6   : > { %v2505_v56 = vadd.f32 %v2372_v14, %v2211_v20  ;;  %v3356_v24 = vrot.slane %v3248_v51, 2  ;;  %v818_v48 = vadd.f32 %v6747_v44, %v817_v35  ;;  %v2800_v52 = vadd.f32 %v2668_v57, %v2506_v12 }
 0x1a7   : > { %v9586_v38 = vrot.slane %v7187_v62, 1  ;;  %v1544_v20 = vmul.f32 %v6644_v22, %v6103_v43  ;;  %v3065_v25 = vsel %vm1657_vm0, %v3062_v47, %v9353_v45  ;;  %v9587_v59 = vrot.slane %v7206_v63, 2 }
 0x1a8   : > { %v2799_v28 = vadd.f32 %v2666_v11, %v2505_v56  ;;  %v9352_v37 = vrot.slane %v7414_v21, 2  ;;  %v888_v44 = vmax.f32 %v818_v48, 0.0  ;;  %v2903_v57 = vadd.f32 %v2855_v8, %v2800_v52  ;;  %v9588_v11 = vld [vmem:[#allocation45_spill] sm:$0xff] }
 0x1a9   : > { %v3063_v14 = vsel %vm1657_vm0, %v9586_v38, %v3062_v47  ;;  %v3357_v50 = vsel %vm1952_vm1, %v9587_v59, %v3356_v24  ;;  %v1545_v62 = vmul.f32 %v6646_v5, %v6103_v43  ;;  %v1596_v38 = vmul.f32 %v6646_v5, %v6085_v13  ;;  %v755_v59 = vpop.f32.mrf.mxu0 }
 0x1aa   : > { %v2902_v35 = vadd.f32 %v2854_v61, %v2799_v28  ;;  %v3359_v22 = vsel %vm1952_vm1, %v3356_v24, %v9352_v37  ;;  %v1287_v51 = vmul.f32 %v9588_v11, %v888_v44  ;;  %v7439_v63 = vmul.f32 %v6740_v58, %v6085_v13 }
 0x1ab   : > { %v1891_v61 = vmul.f32 %v6646_v5, %v6094_v26  ;;  %v3197_v52 = vadd.f32 %v3065_v25, %v2903_v57  ;;  %v1731_v56 = vrot.slane %v1596_v38, 1  ;;  %v7445_v12 = vmul.f32 %v6740_v58, %v6094_v26 }
 0x1ac   : > { %v3196_v8 = vadd.f32 %v3063_v14, %v2902_v35  ;;  %v7448_v47 = vpack.c.bf16 %v1287_v51, %v7334_v60  ;;  %v9349_v24 = vrot.slane %v7439_v63, 1  ;;  %v2189_v28 = vmul.f32 %v9545_v27, %v6120_v2 }
 0x1ad   : > { %v2026_v48 = vrot.slane %v1891_v61, 2  ;;  %v3491_v11 = vadd.f32 %v3359_v22, %v3197_v52  ;;  %v9590_v5 = vrot.slane %v7231_v15, 1  ;;  %v9348_v25 = vrot.slane %v7445_v12, 2 }
 0x1ae   : > { %9589 = vst [vmem:[#allocation30_spill] sm:$0xff] %v7448_v47  ;;  %v3490_v44 = vadd.f32 %v3357_v50, %v3196_v8  ;;  %v1734_v60 = vsel %vm1657_vm0, %v1731_v56, %v9349_v24  ;;  %v9591_v57 = vrot.slane %v7237_v7, 2  ;;  %v2190_v50 = vmul.f32 %v9547_v36, %v6120_v2 }
 0x1af   : > { %v1732_v14 = vsel %vm1657_vm0, %v9590_v5, %v1731_v56  ;;  %5571 = vst [vmem:[#allocation2 + $0xc0] sm:$0xff] %v7448_v47   ;;  %v3543_v22 = vadd.f32 %v7257_v0, %v3491_v11  ;;  %v1840_v51 = vadd.f32 %v1734_v60, %v1545_v62  ;;  %v2029_v61 = vsel %vm1952_vm1, %v2026_v48, %v9348_v25 }
 0x1b0   : > { %v1839_v35 = vadd.f32 %v1732_v14, %v1544_v20  ;;  %v2027_v38 = vsel %vm1952_vm1, %v9591_v57, %v2026_v48  ;;  %v3542_v15 = vadd.f32 %v7257_v0, %v3490_v44  ;;  %v2289_v20 = vmul.f32 %v9547_v36, %v6123_v4 }
 0x1b1   : > { %v7475_v7 = vmul.f32 %v9568_v30, %v6123_v4  ;;  %v2583_v52 = vmul.f32 %v9547_v36, %v6133_v19  ;;  %v2135_v44 = vadd.f32 %v2029_v61, %v1840_v51  ;;  %v7481_v62 = vmul.f32 %v9568_v30, %v6133_v19 }
 0x1b2   : > { %v2134_v8 = vadd.f32 %v2027_v38, %v1839_v35  ;;  %v3585_v56 = vpack.c.bf16 %v3543_v22, %v3542_v15  ;;  %v2880_v48 = vmul.f32 %v9570_v29, %v6168_v42  ;;  %v2423_v5 = vrot.slane %v2289_v20, 1  ;;  %v9593_v38 = vld [vmem:[#allocation8_spill] sm:$0xff] }
 0x1b3   : > { %9592 = vst [vmem:[#allocation15_spill] sm:$0xff] %v7481_v62  ;;  %v9351_v14 = vrot.slane %v7475_v7, 1  ;;  %v2717_v60 = vrot.slane %v2583_v52, 2  ;;  %v2238_v35 = vadd.f32 %v2190_v50, %v2135_v44  ;;  %v9350_v57 = vrot.slane %v7481_v62, 2  ;;  %v9596_v20 = vld [vmem:[#allocation32_spill] sm:$0xff] }
 0x1b4   : > { %v2237_v11 = vadd.f32 %v2189_v28, %v2134_v8  ;;  %3705 = vmatmul.bf16.gmra.mxu1 %v3585_v56  ;;  %v2881_v15 = vmul.f32 %v9593_v38, %v6168_v42  ;;  %v2980_v22 = vmul.f32 %v9593_v38, %v6171_v18  ;;  %v9594_v51 = vrot.slane %v7273_v31, 1  ;;  %v820_v56 = vpop.f32.mrf.mxu2 }
 0x1b5   : > { %v2426_v28 = vsel %vm1657_vm0, %v2423_v5, %v9351_v14  ;;  %v9595_v8 = vrot.slane %v7279_v40, 2  ;;  %v7502_v52 = vmul.f32 %v9596_v20, %v6171_v18  ;;  %v2720_v31 = vsel %vm1952_vm1, %v2717_v60, %v9350_v57 }
 0x1b6   : > { %v2424_v61 = vsel %vm1657_vm0, %v9594_v51, %v2423_v5  ;;  %v2532_v25 = vadd.f32 %v2426_v28, %v2238_v35  ;;  %v3114_v51 = vrot.slane %v2980_v22, 1  ;;  %v3274_v5 = vmul.f32 %v9593_v38, %v6173_v16  ;;  %v757_v35 = vpop.f32.mrf.mxu0 }
 0x1b7   : > { %v2718_v50 = vsel %vm1952_vm1, %v9595_v8, %v2717_v60  ;;  %v2531_v44 = vadd.f32 %v2424_v61, %v2237_v11  ;;  %v3116_v24 = vrot.slane %v7502_v52, 1  ;;  %v7512_v40 = vmul.f32 %v9596_v20, %v6173_v16  ;;  %v7517_v8 = vld [vmem:[%s9240_s3] ss:$0 sm:$0xff] }
 0x1b8   : > { %v756_v11 = vadd.f32 %v7517_v8, %v755_v59  ;;  %v2826_v60 = vadd.f32 %v2720_v31, %v2532_v25  ;;  %v9597_v22 = vrot.slane %v7294_v32, 1  ;;  %v821_v57 = vadd.f32 %v7517_v8, %v820_v56 }
 0x1b9   : > { %v2825_v61 = vadd.f32 %v2718_v50, %v2531_v44  ;;  %v3117_v14 = vsel %vm1657_vm0, %v3114_v51, %v3116_v24  ;;  %v3408_v37 = vrot.slane %v3274_v5, 2  ;;  %v9362_v45 = vrot.slane %v7512_v40, 2  ;;  %v9599_v44 = vld [vmem:[#allocation39_spill] sm:$0xff] }
 0x1ba   : > { %v3115_v28 = vsel %vm1657_vm0, %v9597_v22, %v3114_v51  ;;  %v863_v53 = vmax.f32 %v756_v11, 0.0  ;;  %v2929_v62 = vadd.f32 %v2881_v15, %v2826_v60  ;;  %v889_v59 = vmax.f32 %v821_v57, 0.0 }
 0x1bb   : > { %v2928_v47 = vadd.f32 %v2880_v48, %v2825_v61  ;;  %v758_v50 = vadd.f32 %v7517_v8, %v757_v35  ;;  %v9598_v25 = vrot.slane %v7310_v6, 2  ;;  %v3411_v56 = vsel %vm1952_vm1, %v3408_v37, %v9362_v45  ;;  %v9600_v48 = vld [vmem:[#allocation29_spill] sm:$0xff] }
 0x1bc   : > { %v1262_v31 = vmul.f32 %v9599_v44, %v863_v53  ;;  %v1520_v51 = vmul.f32 %v6708_v33, %v6103_v43  ;;  %v3223_v11 = vadd.f32 %v3117_v14, %v2929_v62  ;;  %v7539_v15 = vmul.f32 %v9600_v48, %v889_v59  ;;  %v9601_v62 = vld [vmem:[#allocation38_spill] sm:$0xff] }
 0x1bd   : > { %v3409_v32 = vsel %vm1952_vm1, %v9598_v25, %v3408_v37  ;;  %v3222_v5 = vadd.f32 %v3115_v28, %v2928_v47  ;;  %v864_v57 = vmax.f32 %v758_v50, 0.0  ;;  %v1521_v6 = vmul.f32 %v6710_v41, %v6103_v43 }
 0x1be   : > { %v1572_v35 = vmul.f32 %v6710_v41, %v6085_v13  ;;  %v7547_v37 = vmul.f32 %v6803_v23, %v6085_v13  ;;  %v1867_v53 = vmul.f32 %v6710_v41, %v6094_v26  ;;  %v3517_v47 = vadd.f32 %v3411_v56, %v3223_v11 }
 0x1bf   : > { %v3516_v33 = vadd.f32 %v3409_v32, %v3222_v5  ;;  %v1263_v14 = vmul.f32 %v9601_v62, %v864_v57  ;;  %v7554_v61 = vmul.f32 %v6803_v23, %v6094_v26  ;;  %v2165_v59 = vmul.f32 %v9559_v3, %v6120_v2 }
 0x1c0   : > { %v1683_v60 = vrot.slane %v1572_v35, 1  ;;  %v9361_v22 = vrot.slane %v7547_v37, 1  ;;  %v1978_v28 = vrot.slane %v1867_v53, 2  ;;  %v3569_v25 = vadd.f32 %v7257_v0, %v3517_v47 }
 0x1c1   : > { %v3568_v50 = vadd.f32 %v7257_v0, %v3516_v33  ;;  %v5275_v41 = vpack.c.bf16 %v1263_v14, %v1262_v31  ;;  %v9358_v32 = vrot.slane %v7554_v61, 2  ;;  %v9602_v56 = vrot.slane %v7340_v49, 1 }
 0x1c2   : > { %v1686_v5 = vsel %vm1657_vm0, %v1683_v60, %v9361_v22  ;;  %v9603_v11 = vrot.slane %v7346_v46, 2  ;;  %v2166_v57 = vmul.f32 %v6887_v1, %v6120_v2  ;;  %v2265_v62 = vmul.f32 %v6887_v1, %v6123_v4 }
 0x1c3   : > { %v1684_v44 = vsel %vm1657_vm0, %v9602_v56, %v1683_v60  ;;  %v3598_v35 = vpack.c.bf16 %v3569_v25, %v3568_v50  ;;  %v7573_v53 = vunpack.c.l.bf16 %v5275_v41  ;;  %v7575_v31 = vunpack.c.h.bf16 %v5275_v41  ;;  %v9605_v41 = vld [vmem:[#allocation21_spill] sm:$0xff] }
 0x1c4   : > { %v1979_v48 = vsel %vm1952_vm1, %v9603_v11, %v1978_v28  ;;  %v1815_v33 = vadd.f32 %v1684_v44, %v1520_v51  ;;  %v1816_v49 = vadd.f32 %v1686_v5, %v1521_v6  ;;  %v1981_v47 = vsel %vm1952_vm1, %v1978_v28, %v9358_v32 }
 0x1c5   : > { %9604 = vst [vmem:[#allocation14_spill] sm:$0xff] %v7575_v31  ;;  %v7584_v46 = vmul.f32 %v9582_v17, %v6123_v4  ;;  %3770 = vmatmul.bf16.gmra.mxu3 %v3598_v35  ;;  %v2559_v60 = vmul.f32 %v6887_v1, %v6133_v19  ;;  %v7590_v51 = vmul.f32 %v9582_v17, %v6133_v19  ;;  %v2375_v50 = vrot.slane %v2265_v62, 1 }
 0x1c6   : > { %v2110_v14 = vadd.f32 %v1979_v48, %v1815_v33  ;;  %v2856_v6 = vmul.f32 %v9583_v54, %v6168_v42  ;;  %v2111_v28 = vadd.f32 %v1981_v47, %v1816_v49  ;;  %v2857_v56 = vmul.f32 %v9605_v41, %v6168_v42 }
 0x1c7   : > { %v9359_v25 = vrot.slane %v7584_v46, 1  ;;  %v2669_v5 = vrot.slane %v2559_v60, 2  ;;  %v9360_v11 = vrot.slane %v7590_v51, 2  ;;  %v2956_v48 = vmul.f32 %v9605_v41, %v6171_v18 }
 0x1c8   : > { %v2213_v44 = vadd.f32 %v2165_v59, %v2110_v14  ;;  %v2214_v35 = vadd.f32 %v2166_v57, %v2111_v28  ;;  %v9606_v33 = vrot.slane %v7377_v55, 1  ;;  %v7608_v47 = vmul.f32 %v7152_v34, %v6171_v18  ;;  %v822_v59 = vpop.f32.mrf.mxu2 }
 0x1c9   : > { %v2378_v49 = vsel %vm1657_vm0, %v2375_v50, %v9359_v25  ;;  %v9607_v14 = vrot.slane %v7383_v39, 2  ;;  %v2672_v55 = vsel %vm1952_vm1, %v2669_v5, %v9360_v11  ;;  %v3066_v57 = vrot.slane %v2956_v48, 1 }
 0x1ca   : > { %v2376_v32 = vsel %vm1657_vm0, %v9606_v33, %v2375_v50  ;;  %v2508_v28 = vadd.f32 %v2378_v49, %v2214_v35  ;;  %v3068_v33 = vrot.slane %v7608_v47, 1  ;;  %v3250_v50 = vmul.f32 %v9605_v41, %v6173_v16 }
 0x1cb   : > { %v2507_v62 = vadd.f32 %v2376_v32, %v2213_v44  ;;  %v2670_v60 = vsel %vm1952_vm1, %v9607_v14, %v2669_v5  ;;  %v7621_v25 = vmul.f32 %v7152_v34, %v6173_v16  ;;  %v9608_v39 = vrot.slane %v7395_v10, 1 }
 0x1cc   : > { %v823_v14 = vadd.f32 %v7517_v8, %v822_v59  ;;  %v1546_v5 = vmul.f32 %v6740_v58, %v6103_v43  ;;  %v2802_v48 = vadd.f32 %v2672_v55, %v2508_v28  ;;  %v3069_v35 = vsel %vm1657_vm0, %v3066_v57, %v3068_v33  ;;  %v9610_v28 = vld [vmem:[#allocation48_spill] sm:$0xff] }
 0x1cd   : > { %v2801_v32 = vadd.f32 %v2670_v60, %v2507_v62  ;;  %v3067_v44 = vsel %vm1657_vm0, %v9608_v39, %v3066_v57  ;;  %v3360_v49 = vrot.slane %v3250_v50, 2  ;;  %v9363_v11 = vrot.slane %v7621_v25, 2 }
 0x1ce   : > { %v890_v45 = vmax.f32 %v823_v14, 0.0  ;;  %v1547_v10 = vmul.f32 %v9545_v27, %v6103_v43  ;;  %v1598_v62 = vmul.f32 %v9545_v27, %v6085_v13  ;;  %v2905_v59 = vadd.f32 %v2857_v56, %v2802_v48 }
 0x1cf   : > { %v2904_v22 = vadd.f32 %v2856_v6, %v2801_v32  ;;  %v9609_v60 = vrot.slane %v7414_v21, 2  ;;  %v3363_v55 = vsel %vm1952_vm1, %v3360_v49, %v9363_v11  ;;  %v7645_v57 = vmul.f32 %v9547_v36, %v6085_v13 }
 0x1d0   : > { %v1289_v50 = vmul.f32 %v9610_v28, %v890_v45  ;;  %v1735_v32 = vrot.slane %v1598_v62, 1  ;;  %v1893_v39 = vmul.f32 %v9545_v27, %v6094_v26  ;;  %v3199_v56 = vadd.f32 %v3069_v35, %v2905_v59 }
 0x1d1   : > { %v3361_v58 = vsel %vm1952_vm1, %v9609_v60, %v3360_v49  ;;  %v3198_v6 = vadd.f32 %v3067_v44, %v2904_v22  ;;  %v9365_v21 = vrot.slane %v7645_v57, 1  ;;  %v7653_v14 = vmul.f32 %v9547_v36, %v6094_v26 }
 0x1d2   : > { %v2191_v48 = vmul.f32 %v9568_v30, %v6120_v2  ;;  %v5340_v60 = vpack.c.bf16 %v1289_v50, %v7539_v15  ;;  %v9611_v22 = vrot.slane %v7439_v63, 1  ;;  %v2030_v44 = vrot.slane %v1893_v39, 2 }
 0x1d3   : > { %v3492_v49 = vadd.f32 %v3361_v58, %v3198_v6  ;;  %v3493_v62 = vadd.f32 %v3363_v55, %v3199_v56  ;;  %v1738_v27 = vsel %vm1657_vm0, %v1735_v32, %v9365_v21  ;;  %v9364_v59 = vrot.slane %v7653_v14, 2 }
 0x1d4   : > { %v1736_v45 = vsel %vm1657_vm0, %v9611_v22, %v1735_v32  ;;  %5572 = vst [vmem:[#allocation2 + $0xc8] sm:$0xff] %v5340_v60   ;;  %v1842_v11 = vadd.f32 %v1738_v27, %v1547_v10  ;;  %v9612_v58 = vrot.slane %v7445_v12, 2  ;;  %v2192_v63 = vmul.f32 %v9570_v29, %v6120_v2 }
 0x1d5   : > { %v1841_v35 = vadd.f32 %v1736_v45, %v1546_v5  ;;  %v3544_v28 = vadd.f32 %v7257_v0, %v3492_v49  ;;  %v3545_v55 = vadd.f32 %v7257_v0, %v3493_v62  ;;  %v2033_v6 = vsel %vm1952_vm1, %v2030_v44, %v9364_v59 }
 0x1d6   : > { %v2031_v15 = vsel %vm1952_vm1, %v9612_v58, %v2030_v44  ;;  %v2291_v50 = vmul.f32 %v9570_v29, %v6123_v4  ;;  %v2137_v32 = vadd.f32 %v2033_v6, %v1842_v11  ;;  %v7679_v10 = vmul.f32 %v9593_v38, %v6123_v4  ;;  %v9614_v58 = vld [vmem:[#allocation4_spill] sm:$0xff] }
 0x1d7   : > { %v2136_v5 = vadd.f32 %v2031_v15, %v1841_v35  ;;  %v2585_v12 = vmul.f32 %v9570_v29, %v6133_v19  ;;  %v7685_v39 = vmul.f32 %v9593_v38, %v6133_v19  ;;  %v3586_v56 = vpack.c.bf16 %v3545_v55, %v3544_v28 }
 0x1d8   : > { %v2427_v60 = vrot.slane %v2291_v50, 1  ;;  %v2882_v22 = vmul.f32 %v9596_v20, %v6168_v42  ;;  %v2240_v45 = vadd.f32 %v2192_v63, %v2137_v32  ;;  %v2429_v11 = vrot.slane %v7679_v10, 1  ;;  %v825_v63 = vpop.f32.mrf.mxu2 }
 0x1d9   : > { %v2239_v49 = vadd.f32 %v2191_v48, %v2136_v5  ;;  %v2721_v44 = vrot.slane %v2585_v12, 2  ;;  %v9372_v62 = vrot.slane %v7685_v39, 2  ;;  %3710 = vmatmul.bf16.gmra.mxu1 %v3586_v56  ;;  %v9613_v27 = vrot.slane %v7475_v7, 1  ;;  %v9615_v5 = vld [vmem:[#allocation15_spill] sm:$0xff] }
 0x1da   : > { %v2883_v15 = vmul.f32 %v9614_v58, %v6168_v42  ;;  %v2982_v48 = vmul.f32 %v9614_v58, %v6171_v18  ;;  %v7700_v28 = vmul.f32 %v7247_v9, %v6171_v18  ;;  %v2430_v55 = vsel %vm1657_vm0, %v2427_v60, %v2429_v11 }
 0x1db   : > { %v2428_v35 = vsel %vm1657_vm0, %v9613_v27, %v2427_v60  ;;  %v9616_v7 = vrot.slane %v9615_v5, 2  ;;  %v2724_v32 = vsel %vm1952_vm1, %v2721_v44, %v9372_v62  ;;  %v2534_v12 = vadd.f32 %v2430_v55, %v2240_v45 }
 0x1dc   : > { %v2533_v6 = vadd.f32 %v2428_v35, %v2239_v49  ;;  %v3118_v56 = vrot.slane %v2982_v48, 1  ;;  %v9371_v27 = vrot.slane %v7700_v28, 1  ;;  %v3276_v59 = vmul.f32 %v9614_v58, %v6173_v16 }
 0x1dd   : > { %v2722_v50 = vsel %vm1952_vm1, %v9616_v7, %v2721_v44  ;;  %v7716_v60 = vmul.f32 %v7247_v9, %v6173_v16  ;;  %v826_v49 = vadd.f32 %v7517_v8, %v825_v63  ;;  %v1522_v35 = vmul.f32 %v6803_v23, %v6103_v43 }
 0x1de   : > { %v2827_v21 = vadd.f32 %v2722_v50, %v2533_v6  ;;  %v2828_v5 = vadd.f32 %v2724_v32, %v2534_v12  ;;  %v3119_v45 = vsel %vm1657_vm0, %v3116_v24, %v3118_v56  ;;  %v3121_v44 = vsel %vm1657_vm0, %v3118_v56, %v9371_v27 }
 0x1df   : > { %v3412_v48 = vrot.slane %v3276_v59, 2  ;;  %v9366_v6 = vrot.slane %v7716_v60, 2  ;;  %v891_v7 = vmax.f32 %v826_v49, 0.0  ;;  %v1523_v63 = vmul.f32 %v9559_v3, %v6103_v43 }
 0x1e0   : > { %v2930_v55 = vadd.f32 %v2882_v22, %v2827_v21  ;;  %v2931_v50 = vadd.f32 %v2883_v15, %v2828_v5  ;;  %v9617_v23 = vrot.slane %v7512_v40, 2  ;;  %v1574_v24 = vmul.f32 %v9559_v3, %v6085_v13  ;;  %v9618_v22 = vld [vmem:[#allocation47_spill] sm:$0xff] }
 0x1e1   : > { %v7737_v52 = vmul.f32 %v6887_v1, %v6085_v13  ;;  %v3415_v21 = vsel %vm1952_vm1, %v3412_v48, %v9366_v6  ;;  %v7743_v12 = vmul.f32 %v9618_v22, %v891_v7  ;;  %v1869_v40 = vmul.f32 %v9559_v3, %v6094_v26 }
 0x1e2   : > { %v3413_v32 = vsel %vm1952_vm1, %v9617_v23, %v3412_v48  ;;  %v3224_v59 = vadd.f32 %v3119_v45, %v2930_v55  ;;  %v3225_v15 = vadd.f32 %v3121_v44, %v2931_v50  ;;  %v1687_v56 = vrot.slane %v1574_v24, 1 }
 0x1e3   : > { %v9370_v49 = vrot.slane %v7737_v52, 1  ;;  %v7750_v5 = vmul.f32 %v6887_v1, %v6094_v26  ;;  %v1982_v45 = vrot.slane %v1869_v40, 2  ;;  %v2167_v55 = vmul.f32 %v9582_v17, %v6120_v2 }
 0x1e4   : > { %v3518_v23 = vadd.f32 %v3413_v32, %v3224_v59  ;;  %v2168_v48 = vmul.f32 %v9583_v54, %v6120_v2  ;;  %v3519_v7 = vadd.f32 %v3415_v21, %v3225_v15  ;;  %v9619_v22 = vrot.slane %v7547_v37, 1 }
 0x1e5   : > { %v1690_v44 = vsel %vm1657_vm0, %v1687_v56, %v9370_v49  ;;  %v9367_v50 = vrot.slane %v7750_v5, 2  ;;  %v9620_v40 = vrot.slane %v7554_v61, 2  ;;  %v2267_v15 = vmul.f32 %v9583_v54, %v6123_v4 }
 0x1e6   : > { %v1688_v3 = vsel %vm1657_vm0, %v9619_v22, %v1687_v56  ;;  %v3570_v32 = vadd.f32 %v7257_v0, %v3518_v23  ;;  %v1818_v59 = vadd.f32 %v1690_v44, %v1523_v63  ;;  %v3571_v21 = vadd.f32 %v7257_v0, %v3519_v7 }
 0x1e7   : > { %v1817_v24 = vadd.f32 %v1688_v3, %v1522_v35  ;;  %v1983_v6 = vsel %vm1952_vm1, %v9620_v40, %v1982_v45  ;;  %v1985_v37 = vsel %vm1952_vm1, %v1982_v45, %v9367_v50  ;;  %v7775_v56 = vmul.f32 %v9605_v41, %v6123_v4 }
 0x1e8   : > { %v2113_v35 = vadd.f32 %v1985_v37, %v1818_v59  ;;  %v2561_v61 = vmul.f32 %v9583_v54, %v6133_v19  ;;  %v7781_v63 = vmul.f32 %v9605_v41, %v6133_v19  ;;  %v3599_v7 = vpack.c.bf16 %v3571_v21, %v3570_v32  ;;  %v9622_v21 = vld [vmem:[#allocation25_spill] sm:$0xff] }
 0x1e9   : > { %v2112_v23 = vadd.f32 %v1983_v6, %v1817_v24  ;;  %v2379_v22 = vrot.slane %v2267_v15, 1  ;;  %v9368_v45 = vrot.slane %v7775_v56, 1  ;;  %v2858_v3 = vmul.f32 %v7152_v34, %v6168_v42 }
 0x1ea   : > { %v2216_v40 = vadd.f32 %v2168_v48, %v2113_v35  ;;  %v2673_v50 = vrot.slane %v2561_v61, 2  ;;  %v9369_v6 = vrot.slane %v7781_v63, 2  ;;  %3775 = vmatmul.bf16.gmra.mxu3 %v3599_v7  ;;  %v9621_v24 = vrot.slane %v7584_v46, 1  ;;  %v9624_v7 = vld [vmem:[#allocation24_spill] sm:$0xff] }
 0x1eb   : > { %v2215_v44 = vadd.f32 %v2167_v55, %v2112_v23  ;;  %v2382_v32 = vsel %vm1657_vm0, %v2379_v22, %v9368_v45  ;;  %v2859_v37 = vmul.f32 %v9622_v21, %v6168_v42  ;;  %v2958_v15 = vmul.f32 %v9622_v21, %v6171_v18  ;;  %v827_v55 = vpop.f32.mrf.mxu2 }
 0x1ec   : > { %v2380_v59 = vsel %vm1657_vm0, %v9621_v24, %v2379_v22  ;;  %v2510_v23 = vadd.f32 %v2382_v32, %v2216_v40  ;;  %v9623_v35 = vrot.slane %v7590_v51, 2  ;;  %v2676_v46 = vsel %vm1952_vm1, %v2673_v50, %v9369_v6 }
 0x1ed   : > { %v2509_v48 = vadd.f32 %v2380_v59, %v2215_v44  ;;  %v7805_v22 = vmul.f32 %v9624_v7, %v6171_v18  ;;  %v3070_v24 = vrot.slane %v2958_v15, 1  ;;  %v3252_v45 = vmul.f32 %v9622_v21, %v6173_v16 }
 0x1ee   : > { %v2674_v61 = vsel %vm1952_vm1, %v9623_v35, %v2673_v50  ;;  %v7811_v44 = vmul.f32 %v9624_v7, %v6173_v16  ;;  %v2804_v51 = vadd.f32 %v2676_v46, %v2510_v23  ;;  %v828_v59 = vadd.f32 %v7517_v8, %v827_v55  ;;  %v9626_v55 = vld [vmem:[#allocation37_spill] sm:$0xff] }
 0x1ef   : > { %v2803_v40 = vadd.f32 %v2674_v61, %v2509_v48  ;;  %v1548_v32 = vmul.f32 %v9547_v36, %v6103_v43  ;;  %v3071_v50 = vsel %vm1657_vm0, %v3068_v33, %v3070_v24  ;;  %v9378_v15 = vrot.slane %v7805_v22, 1 }
 0x1f0   : > { %v3364_v35 = vrot.slane %v3252_v45, 2  ;;  %v9376_v6 = vrot.slane %v7811_v44, 2  ;;  %v2907_v27 = vadd.f32 %v2859_v37, %v2804_v51  ;;  %v892_v62 = vmax.f32 %v828_v59, 0.0 }
 0x1f1   : > { %v2906_v49 = vadd.f32 %v2858_v3, %v2803_v40  ;;  %v1549_v48 = vmul.f32 %v9568_v30, %v6103_v43  ;;  %v3073_v8 = vsel %vm1657_vm0, %v3070_v24, %v9378_v15  ;;  %v9625_v36 = vrot.slane %v7621_v25, 2  ;;  %v9627_v40 = vld [vmem:[#allocation30_spill] sm:$0xff] }
 0x1f2   : > { %v3367_v33 = vsel %vm1952_vm1, %v3364_v35, %v9376_v6  ;;  %v1600_v45 = vmul.f32 %v9568_v30, %v6085_v13  ;;  %v3201_v37 = vadd.f32 %v3073_v8, %v2907_v27  ;;  %v1291_v23 = vmul.f32 %v9626_v55, %v892_v62 }
 0x1f3   : > { %v3365_v47 = vsel %vm1952_vm1, %v9625_v36, %v3364_v35  ;;  %v3200_v3 = vadd.f32 %v3071_v50, %v2906_v49  ;;  %v7837_v61 = vmul.f32 %v9570_v29, %v6085_v13  ;;  %v1895_v25 = vmul.f32 %v9568_v30, %v6094_v26 }
 0x1f4   : > { %v1739_v46 = vrot.slane %v1600_v45, 1  ;;  %v7843_v24 = vmul.f32 %v9570_v29, %v6094_v26  ;;  %v7846_v51 = vunpack.c.l.bf16 %v9627_v40  ;;  %v3495_v49 = vadd.f32 %v3367_v33, %v3201_v37 }
 0x1f5   : > { %v3494_v59 = vadd.f32 %v3365_v47, %v3200_v3  ;;  %v7849_v27 = vpack.c.bf16 %v1291_v23, %v7743_v12  ;;  %v9374_v62 = vrot.slane %v7837_v61, 1  ;;  %v9629_v50 = vrot.slane %v7645_v57, 1 }
 0x1f6   : > { %v2034_v8 = vrot.slane %v1895_v25, 2  ;;  %v9373_v30 = vrot.slane %v7843_v24, 2  ;;  %v2193_v36 = vmul.f32 %v9593_v38, %v6120_v2  ;;  %v3547_v47 = vadd.f32 %v7257_v0, %v3495_v49 }
 0x1f7   : > { %9628 = vst [vmem:[#allocation13_spill] sm:$0xff] %v7849_v27  ;;  %v1740_v35 = vsel %vm1657_vm0, %v9629_v50, %v1739_v46  ;;  %v3546_v45 = vadd.f32 %v7257_v0, %v3494_v59  ;;  %v1742_v12 = vsel %vm1657_vm0, %v1739_v46, %v9374_v62  ;;  %v9630_v3 = vrot.slane %v7653_v14, 2 }
 0x1f8   : > { %5573 = vst [vmem:[#allocation2 + $0xd0] sm:$0xff] %v7849_v27   ;;  %v1843_v33 = vadd.f32 %v1740_v35, %v1548_v32  ;;  %v1844_v57 = vadd.f32 %v1742_v12, %v1549_v48  ;;  %v2037_v55 = vsel %vm1952_vm1, %v2034_v8, %v9373_v30  ;;  %v2194_v23 = vmul.f32 %v9596_v20, %v6120_v2 }
 0x1f9   : > { %v2035_v37 = vsel %vm1952_vm1, %v9630_v3, %v2034_v8  ;;  %v3587_v25 = vpack.c.bf16 %v3547_v47, %v3546_v45  ;;  %v2293_v49 = vmul.f32 %v9596_v20, %v6123_v4  ;;  %v7876_v32 = vmul.f32 %v9614_v58, %v6123_v4  ;;  %v9631_v47 = vld [vmem:[#allocation12_spill] sm:$0xff] }
 0x1fa   : > { %v2138_v59 = vadd.f32 %v2035_v37, %v1843_v33  ;;  %v2139_v48 = vadd.f32 %v2037_v55, %v1844_v57  ;;  %v2587_v14 = vmul.f32 %v9596_v20, %v6133_v19  ;;  %v7882_v46 = vmul.f32 %v9614_v58, %v6133_v19  ;;  %v7895_v55 = vld [vmem:[%s9244_s7] ss:$0 sm:$0xff] }
 0x1fb   : > { %v2884_v50 = vmul.f32 %v7247_v9, %v6168_v42  ;;  %3715 = vmatmul.bf16.gmra.mxu1 %v3587_v25  ;;  %v2431_v8 = vrot.slane %v2293_v49, 1  ;;  %v9375_v45 = vrot.slane %v7876_v32, 1  ;;  %v2885_v12 = vmul.f32 %v9631_v47, %v6168_v42  ;;  %v3681_v49 = vpop.f32.mrf.mxu1 }
 0x1fc   : > { %v2241_v35 = vadd.f32 %v2193_v36, %v2138_v59  ;;  %v2242_v33 = vadd.f32 %v2194_v23, %v2139_v48  ;;  %v2725_v57 = vrot.slane %v2587_v14, 2  ;;  %v9377_v3 = vrot.slane %v7882_v46, 2  ;;  %v3849_v48 = vld [vmem:[%s5854_s22 + $0xc] sm:$0xf] }
 0x1fd   : > { %v2984_v37 = vmul.f32 %v9631_v47, %v6171_v18  ;;  %v2432_v36 = vsel %vm1657_vm0, %v2429_v11, %v2431_v8  ;;  %v2434_v25 = vsel %vm1657_vm0, %v2431_v8, %v9375_v45  ;;  %v7905_v23 = vmul.f32 %v7846_v51, %v6171_v18  ;;  %v7919_v8 = vld [vmem:[%s9245_s8] ss:$0 sm:$0xff] }
 0x1fe   : > { %v3278_v59 = vmul.f32 %v9631_v47, %v6173_v16  ;;  %v2535_v14 = vadd.f32 %v2432_v36, %v2241_v35  ;;  %v2536_v30 = vadd.f32 %v2434_v25, %v2242_v33  ;;  %v9632_v62 = vrot.slane %v7685_v39, 2 }
 0x1ff   : > { %v2728_v11 = vsel %vm1952_vm1, %v2725_v57, %v9377_v3  ;;  %v3122_v45 = vrot.slane %v2984_v37, 1  ;;  %v9386_v6 = vrot.slane %v7905_v23, 1  ;;  %v7924_v35 = vmul.f32 %v7846_v51, %v6173_v16 }
 0x200   : > { %v2726_v10 = vsel %vm1952_vm1, %v9632_v62, %v2725_v57  ;;  %v3416_v33 = vrot.slane %v3278_v59, 2  ;;  %v2830_v36 = vadd.f32 %v2728_v11, %v2536_v30  ;;  %v3682_v62 = vadd.f32 %v7895_v55, %v3681_v49 }
 0x201   : > { %v2829_v39 = vadd.f32 %v2726_v10, %v2535_v14  ;;  %v3899_v25 = vunpack.c.l.bf16 %v3849_v48  ;;  %v9633_v57 = vrot.slane %v7700_v28, 1  ;;  %v3125_v37 = vsel %vm1657_vm0, %v3122_v45, %v9386_v6 }
 0x202   : > { %v9634_v15 = vrot.slane %v7716_v60, 2  ;;  %v9381_v31 = vrot.slane %v7924_v35, 2  ;;  %v2933_v14 = vadd.f32 %v2885_v12, %v2830_v36  ;;  %v3801_v30 = vmax.f32 %v3682_v62, 0.0 }
 0x203   : > { %v3123_v3 = vsel %vm1657_vm0, %v9633_v57, %v3122_v45  ;;  %v2932_v59 = vadd.f32 %v2884_v50, %v2829_v39  ;;  %v3951_v49 = vmul.f32 %v7919_v8, %v3899_v25  ;;  %v1524_v48 = vmul.f32 %v6887_v1, %v6103_v43 }
 0x204   : > { %v3417_v27 = vsel %vm1952_vm1, %v9634_v15, %v3416_v33  ;;  %v3419_v28 = vsel %vm1952_vm1, %v3416_v33, %v9381_v31  ;;  %v1525_v45 = vmul.f32 %v9582_v17, %v6103_v43  ;;  %v1576_v60 = vmul.f32 %v9582_v17, %v6085_v13 }
 0x205   : > { %v3226_v15 = vadd.f32 %v3123_v3, %v2932_v59  ;;  %v3227_v10 = vadd.f32 %v3125_v37, %v2933_v14  ;;  %v7947_v50 = vrot.slane %v3801_v30, 7  ;;  %v7951_v12 = vmul.f32 %v9583_v54, %v6085_v13 }
 0x206   : > { %v1691_v11 = vrot.slane %v1576_v60, 1  ;;  %v1871_v33 = vmul.f32 %v9582_v17, %v6094_v26  ;;  %v7957_v1 = vmul.f32 %v9583_v54, %v6094_v26  ;;  %v2169_v39 = vmul.f32 %v9605_v41, %v6120_v2 }
 0x207   : > { %v3520_v36 = vadd.f32 %v3417_v27, %v3226_v15  ;;  %v3521_v3 = vadd.f32 %v3419_v28, %v3227_v10  ;;  %v4193_v62 = vadd.f32 %v7947_v50, %v3951_v49  ;;  %v9385_v25 = vrot.slane %v7951_v12, 1 }
 0x208   : > { %v9635_v57 = vrot.slane %v7737_v52, 1  ;;  %v1986_v59 = vrot.slane %v1871_v33, 2  ;;  %v9384_v17 = vrot.slane %v7957_v1, 2  ;;  %v2170_v14 = vmul.f32 %v7152_v34, %v6120_v2 }
 0x209   : > { %v3572_v30 = vadd.f32 %v7257_v0, %v3520_v36  ;;  %v3573_v60 = vadd.f32 %v7257_v0, %v3521_v3  ;;  %v4242_v27 = vpack.c.bf16 %v4193_v62, %v4193_v62  ;;  %v1694_v49 = vsel %vm1657_vm0, %v1691_v11, %v9385_v25 }
 0x20a   : > { %v1692_v37 = vsel %vm1657_vm0, %v9635_v57, %v1691_v11  ;;  %v1820_v15 = vadd.f32 %v1694_v49, %v1525_v45  ;;  %v9636_v52 = vrot.slane %v7750_v5, 2  ;;  %v1989_v33 = vsel %vm1952_vm1, %v1986_v59, %v9384_v17 }
 0x20b   : > { %v1819_v28 = vadd.f32 %v1692_v37, %v1524_v48  ;;  %v3600_v57 = vpack.c.bf16 %v3573_v60, %v3572_v30  ;;  %v4295_v31 = vshrl.u32 %v4242_v27, 16  ;;  %v4298_v36 = vshll.u32 %v4242_v27, 16 }
 0x20c   : > { %v1987_v10 = vsel %vm1952_vm1, %v9636_v52, %v1986_v59  ;;  %v2269_v0 = vmul.f32 %v7152_v34, %v6123_v4  ;;  %v2115_v62 = vadd.f32 %v1989_v33, %v1820_v15  ;;  %v7984_v48 = vmul.f32 %v9622_v21, %v6123_v4 }
 0x20d   : > { %v2114_v3 = vadd.f32 %v1987_v10, %v1819_v28  ;;  %v2563_v5 = vmul.f32 %v7152_v34, %v6133_v19  ;;  %3780 = vmatmul.bf16.gmra.mxu3 %v3600_v57  ;;  %v4297_v45 = vrot.slane %v4295_v31, 4  ;;  %v4300_v11 = vrot.slane %v4298_v36, 5  ;;  %v9639_v36 = vld [vmem:[#allocation16_spill] sm:$0xff] }
 0x20e   : > { %v2383_v37 = vrot.slane %v2269_v0, 1  ;;  %v7990_v59 = vmul.f32 %v9622_v21, %v6133_v19  ;;  %v2218_v60 = vadd.f32 %v2170_v14, %v2115_v62  ;;  %v9383_v27 = vrot.slane %v7984_v48, 1 }
 0x20f   : > { %v2217_v30 = vadd.f32 %v2169_v39, %v2114_v3  ;;  %v2677_v49 = vrot.slane %v2563_v5, 2  ;;  %v4301_v28 = vor.u32 %v4300_v11, %v4297_v45  ;;  %v9637_v15 = vrot.slane %v7775_v56, 1  ;;  %v3683_v56 = vpop.f32.mrf.mxu1  ;;  %v8008_v3 = vld [vmem:[%s5854_s22 + $0x10] sm:$0xff]  }
 0x210   : > { %v9382_v10 = vrot.slane %v7990_v59, 2  ;;  %v2860_v31 = vmul.f32 %v9624_v7, %v6168_v42  ;;  %v2386_v33 = vsel %vm1657_vm0, %v2383_v37, %v9383_v27  ;;  %v9638_v39 = vrot.slane %v7781_v63, 2 }
 0x211   : > { %v2384_v52 = vsel %vm1657_vm0, %v9637_v15, %v2383_v37  ;;  %v2861_v0 = vmul.f32 %v9639_v36, %v6168_v42  ;;  %v8010_v62 = vrot.slane %v4301_v28, 4  ;;  %v2512_v5 = vadd.f32 %v2386_v33, %v2218_v60 }
 0x212   : > { %v2511_v57 = vadd.f32 %v2384_v52, %v2217_v30  ;;  %v2678_v14 = vsel %vm1952_vm1, %v9638_v39, %v2677_v49  ;;  %v2680_v45 = vsel %vm1952_vm1, %v2677_v49, %v9382_v10  ;;  %v2960_v11 = vmul.f32 %v9639_v36, %v6171_v18 }
 0x213   : > { %v8019_v63 = vmul.f32 %v7573_v53, %v6171_v18  ;;  %v3254_v30 = vmul.f32 %v9639_v36, %v6173_v16  ;;  %v8025_v28 = vmul.f32 %v7573_v53, %v6173_v16  ;;  %v2806_v60 = vadd.f32 %v2680_v45, %v2512_v5 }
 0x214   : > { %v2805_v37 = vadd.f32 %v2678_v14, %v2511_v57  ;;  %v3074_v15 = vrot.slane %v2960_v11, 1  ;;  %v3684_v52 = vadd.f32 %v7895_v55, %v3683_v56  ;;  %v5458_v49 = vunpack.c.l.bf16 %v8008_v3 }
 0x215   : > { %v9390_v57 = vrot.slane %v8019_v63, 1  ;;  %v3368_v39 = vrot.slane %v3254_v30, 2  ;;  %v9389_v14 = vrot.slane %v8025_v28, 2  ;;  %v2909_v10 = vadd.f32 %v2861_v0, %v2806_v60  ;;  %v8059_v60 = vld [vmem:[#allocation2 + $0xc8] sm:$0xff]  }
 0x216   : > { %v2908_v33 = vadd.f32 %v2860_v31, %v2805_v37  ;;  %v9640_v27 = vrot.slane %v7805_v22, 1  ;;  %v3802_v25 = vmax.f32 %v3684_v52, 0.0  ;;  %v3952_v6 = vmul.f32 %v7919_v8, %v5458_v49  ;;  %9642 = vst [vmem:[#allocation3_spill] sm:$0xff] %v8059_v60 }
 0x217   : > { %v3077_v56 = vsel %vm1657_vm0, %v3074_v15, %v9390_v57  ;;  %v9641_v31 = vrot.slane %v7811_v44, 2  ;;  %v3371_v0 = vsel %vm1952_vm1, %v3368_v39, %v9389_v14  ;;  %v1550_v37 = vmul.f32 %v9570_v29, %v6103_v43  ;;  %v8064_v29 = vld [vmem:[%s9242_s5] ss:$0 sm:$0xff] }
 0x218   : > { %v3075_v17 = vsel %vm1657_vm0, %v9640_v27, %v3074_v15  ;;  %v3203_v11 = vadd.f32 %v3077_v56, %v2909_v10  ;;  %v8044_v22 = vrot.slane %v3802_v25, 7  ;;  %v1551_v44 = vmul.f32 %v9593_v38, %v6103_v43 }
 0x219   : > { %v3202_v5 = vadd.f32 %v3075_v17, %v2908_v33  ;;  %v3369_v45 = vsel %vm1952_vm1, %v9641_v31, %v3368_v39  ;;  %v1602_v10 = vmul.f32 %v9593_v38, %v6085_v13  ;;  %v8057_v25 = vmul.f32 %v9596_v20, %v6085_v13 }
 0x21a   : > { %v3497_v17 = vadd.f32 %v3371_v0, %v3203_v11  ;;  %v4051_v30 = vsel %vm4048_vm2, %v7947_v50, %v8044_v22  ;;  %v1897_v50 = vmul.f32 %v9593_v38, %v6094_v26  ;;  %v8071_v49 = vmul.f32 %v9596_v20, %v6094_v26 }
 0x21b   : > { %v3496_v27 = vadd.f32 %v3369_v45, %v3202_v5  ;;  %v4194_v52 = vadd.f32 %v4051_v30, %v3952_v6  ;;  %v1743_v39 = vrot.slane %v1602_v10, 1  ;;  %v9388_v56 = vrot.slane %v8057_v25, 1 }
 0x21c   : > { %v3549_v33 = vadd.f32 %v8064_v29, %v3497_v17  ;;  %v8076_v5 = vunpack.c.h.bf16 %v9627_v40  ;;  %v2038_v45 = vrot.slane %v1897_v50, 2  ;;  %v9387_v6 = vrot.slane %v8071_v49, 2 }
 0x21d   : > { %v3548_v15 = vadd.f32 %v8064_v29, %v3496_v27  ;;  %v4243_v31 = vpack.c.bf16 %v4194_v52, %v4194_v52  ;;  %v8081_v0 = vunpack.c.l.bf16 %v8059_v60  ;;  %v9643_v11 = vrot.slane %v7837_v61, 1 }
 0x21e   : > { %v1746_v17 = vsel %vm1657_vm0, %v1743_v39, %v9388_v56  ;;  %v2195_v40 = vmul.f32 %v9614_v58, %v6120_v2  ;;  %v9646_v61 = vrot.slane %v7843_v24, 2  ;;  %v2886_v60 = vmul.f32 %v7846_v51, %v6168_v42 }
 0x21f   : > { %v3588_v38 = vpack.c.bf16 %v3549_v33, %v3548_v15  ;;  %v1744_v27 = vsel %vm1657_vm0, %v9643_v11, %v1743_v39  ;;  %v4304_v30 = vshll.u32 %v4243_v31, 16  ;;  %v4308_v10 = vshrl.u32 %v4243_v31, 16 }
 0x220   : > { %v1845_v52 = vadd.f32 %v1744_v27, %v1550_v37  ;;  %v1846_v50 = vadd.f32 %v1746_v17, %v1551_v44  ;;  %v2039_v33 = vsel %vm1952_vm1, %v9646_v61, %v2038_v45  ;;  %v2041_v39 = vsel %vm1952_vm1, %v2038_v45, %v9387_v6 }
 0x221   : > { %3720 = vmatmul.bf16.gmra.mxu1 %v3588_v38  ;;  %v2196_v31 = vmul.f32 %v7247_v9, %v6120_v2  ;;  %v2295_v37 = vmul.f32 %v7247_v9, %v6123_v4  ;;  %v4306_v44 = vrot.slane %v4304_v30, 5  ;;  %v4310_v24 = vrot.slane %v4308_v10, 4 }
 0x222   : > { %v2140_v38 = vadd.f32 %v2039_v33, %v1845_v52  ;;  %v2141_v11 = vadd.f32 %v2041_v39, %v1846_v50  ;;  %v8114_v27 = vmul.f32 %v9631_v47, %v6123_v4  ;;  %v2589_v17 = vmul.f32 %v7247_v9, %v6133_v19 }
 0x223   : > { %v2435_v45 = vrot.slane %v2295_v37, 1  ;;  %v8120_v61 = vmul.f32 %v9631_v47, %v6133_v19  ;;  %v4307_v6 = vsel %vm8093_vm5, %v8010_v62, %v4306_v44  ;;  %v4311_v30 = vor.u32 %v4310_v24, %v4306_v44 }
 0x224   : > { %v2243_v10 = vadd.f32 %v2195_v40, %v2140_v38  ;;  %v2244_v52 = vadd.f32 %v2196_v31, %v2141_v11  ;;  %4826 = vst [vmem:[%s8110_s23] sm:$0xf] %v4307_v6  ;;  %v9647_v50 = vrot.slane %v7876_v32, 1  ;;  %v9393_v39 = vrot.slane %v8114_v27, 1  ;;  %v3686_v40 = vpop.f32.mrf.mxu1 }
 0x225   : > { %v2729_v37 = vrot.slane %v2589_v17, 2  ;;  %v9392_v56 = vrot.slane %v8120_v61, 2  ;;  %v8131_v14 = vrot.slane %v4311_v30, 4  ;;  %v2887_v62 = vmul.f32 %v8076_v5, %v6168_v42 }
 0x226   : > { %v2436_v33 = vsel %vm1657_vm0, %v9647_v50, %v2435_v45  ;;  %v2438_v32 = vsel %vm1657_vm0, %v2435_v45, %v9393_v39  ;;  %v9648_v6 = vrot.slane %v7882_v46, 2  ;;  %v2986_v24 = vmul.f32 %v8076_v5, %v6171_v18 }
 0x227   : > { %v2537_v57 = vadd.f32 %v2436_v33, %v2243_v10  ;;  %v2732_v44 = vsel %vm1952_vm1, %v2729_v37, %v9392_v56  ;;  %v2538_v38 = vadd.f32 %v2438_v32, %v2244_v52  ;;  %v8150_v17 = vmul.f32 %v6171_v18, %v8081_v0 }
 0x228   : > { %v2730_v31 = vsel %vm1952_vm1, %v9648_v6, %v2729_v37  ;;  %v3280_v45 = vmul.f32 %v8076_v5, %v6173_v16  ;;  %v3126_v30 = vrot.slane %v2986_v24, 1  ;;  %v8156_v46 = vmul.f32 %v6173_v16, %v8081_v0 }
 0x229   : > { %v2831_v11 = vadd.f32 %v2730_v31, %v2537_v57  ;;  %v3687_v10 = vadd.f32 %v7895_v55, %v3686_v40  ;;  %v5459_v50 = vunpack.c.h.bf16 %v8008_v3  ;;  %v2832_v33 = vadd.f32 %v2732_v44, %v2538_v38 }
 0x22a   : > { %v9395_v57 = vrot.slane %v8150_v17, 1  ;;  %v3420_v52 = vrot.slane %v3280_v45, 2  ;;  %v9649_v32 = vrot.slane %v7905_v23, 1  ;;  %v9394_v31 = vrot.slane %v8156_v46, 2 }
 0x22b   : > { %v2934_v37 = vadd.f32 %v2886_v60, %v2831_v11  ;;  %v3803_v24 = vmax.f32 %v3687_v10, 0.0  ;;  %v3953_v56 = vmul.f32 %v7919_v8, %v5459_v50  ;;  %v2935_v39 = vadd.f32 %v2887_v62, %v2832_v33 }
 0x22c   : > { %v3127_v6 = vsel %vm1657_vm0, %v9649_v32, %v3126_v30  ;;  %v3129_v40 = vsel %vm1657_vm0, %v3126_v30, %v9395_v57  ;;  %v9650_v60 = vrot.slane %v7924_v35, 2  ;;  %v3423_v23 = vsel %vm1952_vm1, %v3420_v52, %v9394_v31 }
 0x22d   : > { %v3228_v3 = vadd.f32 %v3127_v6, %v2934_v37  ;;  %v8175_v38 = vrot.slane %v3803_v24, 7  ;;  %v1526_v11 = vmul.f32 %v9583_v54, %v6103_v43  ;;  %v1527_v62 = vmul.f32 %v9605_v41, %v6103_v43 }
 0x22e   : > { %v3421_v44 = vsel %vm1952_vm1, %v9650_v60, %v3420_v52  ;;  %v3229_v45 = vadd.f32 %v3129_v40, %v2935_v39  ;;  %v1578_v30 = vmul.f32 %v9605_v41, %v6085_v13  ;;  %v8185_v35 = vmul.f32 %v7152_v34, %v6085_v13 }
 0x22f   : > { %v3522_v10 = vadd.f32 %v3421_v44, %v3228_v3  ;;  %v4053_v50 = vsel %vm4048_vm2, %v8044_v22, %v8175_v38  ;;  %v1873_v33 = vmul.f32 %v9605_v41, %v6094_v26  ;;  %v8194_v54 = vmul.f32 %v7152_v34, %v6094_v26 }
 0x230   : > { %v2171_v39 = vmul.f32 %v9622_v21, %v6120_v2  ;;  %v3523_v37 = vadd.f32 %v3423_v23, %v3229_v45  ;;  %v4195_v32 = vadd.f32 %v4053_v50, %v3953_v56  ;;  %v1695_v6 = vrot.slane %v1578_v30, 1 }
 0x231   : > { %v3574_v52 = vadd.f32 %v8064_v29, %v3522_v10  ;;  %v1697_v24 = vrot.slane %v8185_v35, 1  ;;  %v1990_v40 = vrot.slane %v1873_v33, 2  ;;  %v9398_v22 = vrot.slane %v8194_v54, 2 }
 0x232   : > { %v2172_v41 = vmul.f32 %v9624_v7, %v6120_v2  ;;  %v3575_v3 = vadd.f32 %v8064_v29, %v3523_v37  ;;  %v4244_v60 = vpack.c.bf16 %v4195_v32, %v4195_v32  ;;  %v9651_v44 = vrot.slane %v7951_v12, 1 }
 0x233   : > { %v2271_v23 = vmul.f32 %v9624_v7, %v6123_v4  ;;  %v1698_v56 = vsel %vm1657_vm0, %v1695_v6, %v1697_v24  ;;  %v9652_v10 = vrot.slane %v7957_v1, 2  ;;  %v1993_v50 = vsel %vm1952_vm1, %v1990_v40, %v9398_v22 }
 0x234   : > { %v1696_v31 = vsel %vm1657_vm0, %v9651_v44, %v1695_v6  ;;  %v3601_v33 = vpack.c.bf16 %v3575_v3, %v3574_v52  ;;  %v4314_v12 = vshll.u32 %v4244_v60, 16  ;;  %v4318_v37 = vshrl.u32 %v4244_v60, 16 }
 0x235   : > { %v1821_v45 = vadd.f32 %v1696_v31, %v1526_v11  ;;  %v1991_v30 = vsel %vm1952_vm1, %v9652_v10, %v1990_v40  ;;  %v1822_v32 = vadd.f32 %v1698_v56, %v1527_v62  ;;  %v8220_v57 = vmul.f32 %v9639_v36, %v6123_v4 }
 0x236   : > { %v2387_v6 = vrot.slane %v2271_v23, 1  ;;  %v2565_v1 = vmul.f32 %v9624_v7, %v6133_v19  ;;  %3785 = vmatmul.bf16.gmra.mxu3 %v3601_v33  ;;  %v4316_v31 = vrot.slane %v4314_v12, 5  ;;  %v4320_v11 = vrot.slane %v4318_v37, 4 }
 0x237   : > { %v2116_v44 = vadd.f32 %v1991_v30, %v1821_v45  ;;  %v2117_v10 = vadd.f32 %v1993_v50, %v1822_v32  ;;  %v8226_v52 = vmul.f32 %v9639_v36, %v6133_v19  ;;  %v9653_v40 = vrot.slane %v7984_v48, 1  ;;  %v3688_v32 = vpop.f32.mrf.mxu1 }
 0x238   : > { %v9397_v60 = vrot.slane %v8220_v57, 1  ;;  %v2681_v23 = vrot.slane %v2565_v1, 2  ;;  %v4317_v56 = vsel %vm8093_vm5, %v8131_v14, %v4316_v31  ;;  %v4321_v45 = vor.u32 %v4320_v11, %v4316_v31 }
 0x239   : > { %v2219_v62 = vadd.f32 %v2171_v39, %v2116_v44  ;;  %v2388_v3 = vsel %vm1657_vm0, %v9653_v40, %v2387_v6  ;;  %v2220_v30 = vadd.f32 %v2172_v41, %v2117_v10  ;;  %v9396_v50 = vrot.slane %v8226_v52, 2  ;;  %4827 = vst [vmem:[%s8110_s23 + $0x4] sm:$0xf] %v4317_v56  ;;  %v8246_v44 = vld [vmem:[%s5854_s22 + $0x18] sm:$0xff]   ;;  %v9656_v10 = vld [vmem:[#allocation43_spill] sm:$0xff] }
 0x23a   : > { %v2390_v39 = vsel %vm1657_vm0, %v2387_v6, %v9397_v60  ;;  %v9654_v48 = vrot.slane %v7990_v59, 2  ;;  %v2862_v37 = vmul.f32 %v7573_v53, %v6168_v42  ;;  %v8248_v14 = vrot.slane %v4321_v45, 4  ;;  %v9655_v6 = vld [vmem:[#allocation14_spill] sm:$0xff] }
 0x23b   : > { %v2513_v33 = vadd.f32 %v2388_v3, %v2219_v62  ;;  %v2514_v41 = vadd.f32 %v2390_v39, %v2220_v30  ;;  %v2684_v1 = vsel %vm1952_vm1, %v2681_v23, %v9396_v50  ;;  %v2863_v31 = vmul.f32 %v9655_v6, %v6168_v42 }
 0x23c   : > { %v2682_v12 = vsel %vm1952_vm1, %v9654_v48, %v2681_v23  ;;  %v2962_v59 = vmul.f32 %v9655_v6, %v6171_v18  ;;  %v8259_v62 = vmul.f32 %v9656_v10, %v6171_v18  ;;  %v3256_v40 = vmul.f32 %v9655_v6, %v6173_v16 }
 0x23d   : > { %v2807_v11 = vadd.f32 %v2682_v12, %v2513_v33  ;;  %v2808_v3 = vadd.f32 %v2684_v1, %v2514_v41  ;;  %v8265_v56 = vmul.f32 %v9656_v10, %v6173_v16  ;;  %v3689_v23 = vadd.f32 %v7895_v55, %v3688_v32 }
 0x23e   : > { %v5462_v45 = vunpack.c.l.bf16 %v8246_v44  ;;  %v3078_v39 = vrot.slane %v2962_v59, 1  ;;  %v9400_v33 = vrot.slane %v8259_v62, 1  ;;  %v3372_v48 = vrot.slane %v3256_v40, 2 }
 0x23f   : > { %v2910_v30 = vadd.f32 %v2862_v37, %v2807_v11  ;;  %v2911_v12 = vadd.f32 %v2863_v31, %v2808_v3  ;;  %v9399_v50 = vrot.slane %v8265_v56, 2  ;;  %v3804_v60 = vmax.f32 %v3689_v23, 0.0 }
 0x240   : > { %v3954_v22 = vmul.f32 %v7919_v8, %v5462_v45  ;;  %v9657_v41 = vrot.slane %v8019_v63, 1  ;;  %v3081_v32 = vsel %vm1657_vm0, %v3078_v39, %v9400_v33  ;;  %v9658_v37 = vrot.slane %v8025_v28, 2 }
 0x241   : > { %v1552_v31 = vmul.f32 %v9596_v20, %v6103_v43  ;;  %v3205_v40 = vadd.f32 %v3081_v32, %v2911_v12  ;;  %v3375_v3 = vsel %vm1952_vm1, %v3372_v48, %v9399_v50  ;;  %v8286_v63 = vrot.slane %v3804_v60, 7 }
 0x242   : > { %v3079_v1 = vsel %vm1657_vm0, %v9657_v41, %v3078_v39  ;;  %v3373_v11 = vsel %vm1952_vm1, %v9658_v37, %v3372_v48  ;;  %v1553_v23 = vmul.f32 %v9614_v58, %v6103_v43  ;;  %v1604_v45 = vmul.f32 %v9614_v58, %v6085_v13 }
 0x243   : > { %v3204_v59 = vadd.f32 %v3079_v1, %v2910_v30  ;;  %v8294_v28 = vmul.f32 %v7247_v9, %v6085_v13  ;;  %v1899_v20 = vmul.f32 %v9614_v58, %v6094_v26  ;;  %v3499_v39 = vadd.f32 %v3375_v3, %v3205_v40 }
 0x244   : > { %v4055_v60 = vsel %vm4048_vm2, %v8175_v38, %v8286_v63  ;;  %v8303_v48 = vmul.f32 %v7247_v9, %v6094_v26  ;;  %v1747_v41 = vrot.slane %v1604_v45, 1  ;;  %v9659_v38 = vrot.slane %v8057_v25, 1 }
 0x245   : > { %v3498_v30 = vadd.f32 %v3373_v11, %v3204_v59  ;;  %v4196_v12 = vadd.f32 %v4055_v60, %v3954_v22  ;;  %v9410_v1 = vrot.slane %v8294_v28, 1  ;;  %v2042_v32 = vrot.slane %v1899_v20, 2 }
 0x246   : > { %v3551_v50 = vadd.f32 %v8064_v29, %v3499_v39  ;;  %v9403_v58 = vrot.slane %v8303_v48, 2  ;;  %v2197_v11 = vmul.f32 %v9631_v47, %v6120_v2  ;;  %v1748_v40 = vsel %vm1657_vm0, %v9659_v38, %v1747_v41 }
 0x247   : > { %v3550_v37 = vadd.f32 %v8064_v29, %v3498_v30  ;;  %v4245_v59 = vpack.c.bf16 %v4196_v12, %v4196_v12  ;;  %v1750_v22 = vsel %vm1657_vm0, %v1747_v41, %v9410_v1  ;;  %v9660_v3 = vrot.slane %v8071_v49, 2 }
 0x248   : > { %v1847_v30 = vadd.f32 %v1748_v40, %v1552_v31  ;;  %v1848_v39 = vadd.f32 %v1750_v22, %v1553_v23  ;;  %v2045_v60 = vsel %vm1952_vm1, %v2042_v32, %v9403_v58  ;;  %v2198_v25 = vmul.f32 %v7846_v51, %v6120_v2 }
 0x249   : > { %v2043_v45 = vsel %vm1952_vm1, %v9660_v3, %v2042_v32  ;;  %v3589_v20 = vpack.c.bf16 %v3551_v50, %v3550_v37  ;;  %v4324_v12 = vshll.u32 %v4245_v59, 16  ;;  %v4328_v33 = vshrl.u32 %v4245_v59, 16 }
 0x24a   : > { %v2297_v38 = vmul.f32 %v7846_v51, %v6123_v4  ;;  %v2142_v41 = vadd.f32 %v2043_v45, %v1847_v30  ;;  %v2143_v49 = vadd.f32 %v2045_v60, %v1848_v39  ;;  %v8329_v50 = vmul.f32 %v8076_v5, %v6123_v4 }
 0x24b   : > { %3725 = vmatmul.bf16.gmra.mxu1 %v3589_v20  ;;  %v2591_v31 = vmul.f32 %v7846_v51, %v6133_v19  ;;  %v4326_v23 = vrot.slane %v4324_v12, 5  ;;  %v4330_v32 = vrot.slane %v4328_v33, 4  ;;  %v8335_v59 = vmul.f32 %v8076_v5, %v6133_v19 }
 0x24c   : > { %v2439_v37 = vrot.slane %v2297_v38, 1  ;;  %v2245_v40 = vadd.f32 %v2197_v11, %v2142_v41  ;;  %v2246_v22 = vadd.f32 %v2198_v25, %v2143_v49  ;;  %v9402_v3 = vrot.slane %v8329_v50, 1  ;;  %v9663_v38 = vld [vmem:[#allocation13_spill] sm:$0xff] }
 0x24d   : > { %v2733_v45 = vrot.slane %v2591_v31, 2  ;;  %v4327_v20 = vsel %vm8093_vm5, %v8248_v14, %v4326_v23  ;;  %v4331_v30 = vor.u32 %v4330_v32, %v4326_v23  ;;  %v9661_v39 = vrot.slane %v8114_v27, 1  ;;  %v9664_v31 = vld [vmem:[#allocation3_spill] sm:$0xff]  ;;  %v3751_v32 = vpop.f32.mrf.mxu3 }
 0x24e   : > { %v9401_v33 = vrot.slane %v8335_v59, 2  ;;  %4828 = vst [vmem:[%s8110_s23 + $0x8] sm:$0xf] %v4327_v20  ;;  %v2442_v11 = vsel %vm1657_vm0, %v2439_v37, %v9402_v3  ;;  %v9662_v12 = vrot.slane %v8120_v61, 2  ;;  %v8353_v41 = vunpack.c.l.bf16 %v9663_v38 }
 0x24f   : > { %v2440_v51 = vsel %vm1657_vm0, %v9661_v39, %v2439_v37  ;;  %v8355_v14 = vrot.slane %v4331_v30, 4  ;;  %v2540_v27 = vadd.f32 %v2442_v11, %v2246_v22  ;;  %v2840_v23 = vunpack.c.h.bf16 %v9664_v31  ;;  %v3691_v22 = vpop.f32.mrf.mxu1 }
 0x250   : > { %v2539_v60 = vadd.f32 %v2440_v51, %v2245_v40  ;;  %v2734_v25 = vsel %vm1952_vm1, %v9662_v12, %v2733_v45  ;;  %v2736_v49 = vsel %vm1952_vm1, %v2733_v45, %v9401_v33  ;;  %v2888_v37 = vmul.f32 %v6168_v42, %v8081_v0 }
 0x251   : > { %v8365_v61 = vmul.f32 %v8353_v41, %v6171_v18  ;;  %v8369_v40 = vmul.f32 %v8353_v41, %v6173_v16  ;;  %v2834_v30 = vadd.f32 %v2736_v49, %v2540_v27  ;;  %v2889_v39 = vmul.f32 %v6168_v42, %v2840_v23 }
 0x252   : > { %v2833_v20 = vadd.f32 %v2734_v25, %v2539_v60  ;;  %v2988_v45 = vmul.f32 %v6171_v18, %v2840_v23  ;;  %v3282_v51 = vmul.f32 %v6173_v16, %v2840_v23  ;;  %v3752_v25 = vadd.f32 %v7895_v55, %v3751_v32 }
 0x253   : > { %v9409_v60 = vrot.slane %v8365_v61, 1  ;;  %v9408_v12 = vrot.slane %v8369_v40, 2  ;;  %v2937_v38 = vadd.f32 %v2889_v39, %v2834_v30  ;;  %v3692_v3 = vadd.f32 %v7895_v55, %v3691_v22 }
 0x254   : > { %v2936_v11 = vadd.f32 %v2888_v37, %v2833_v20  ;;  %v3130_v31 = vrot.slane %v2988_v45, 1  ;;  %v3424_v33 = vrot.slane %v3282_v51, 2  ;;  %v3829_v58 = vmax.f32 %v3752_v25, 0.0 }
 0x255   : > { %v5463_v27 = vunpack.c.h.bf16 %v8246_v44  ;;  %v1528_v49 = vmul.f32 %v7152_v34, %v6103_v43  ;;  %v1529_v23 = vmul.f32 %v9622_v21, %v6103_v43  ;;  %v9665_v20 = vrot.slane %v8150_v17, 1 }
 0x256   : > { %v3133_v32 = vsel %vm1657_vm0, %v3130_v31, %v9409_v60  ;;  %v9666_v30 = vrot.slane %v8156_v46, 2  ;;  %v3427_v44 = vsel %vm1952_vm1, %v3424_v33, %v9408_v12  ;;  %v8395_v45 = vrot.slane %v3829_v58, 7 }
 0x257   : > { %v3131_v37 = vsel %vm1657_vm0, %v9665_v20, %v3130_v31  ;;  %v3231_v39 = vadd.f32 %v3133_v32, %v2937_v38  ;;  %v3805_v51 = vmax.f32 %v3692_v3, 0.0  ;;  %v3955_v17 = vmul.f32 %v7919_v8, %v5463_v27 }
 0x258   : > { %v3425_v22 = vsel %vm1952_vm1, %v9666_v30, %v3424_v33  ;;  %v3230_v34 = vadd.f32 %v3131_v37, %v2936_v11  ;;  %9667 = vst [vmem:[#allocation36_spill] sm:$0xff] %v8395_v45  ;;  %v1580_v25 = vmul.f32 %v9622_v21, %v6085_v13  ;;  %v8402_v31 = vmul.f32 %v9624_v7, %v6085_v13 }
 0x259   : > { %v1875_v46 = vmul.f32 %v9622_v21, %v6094_v26  ;;  %v3525_v30 = vadd.f32 %v3427_v44, %v3231_v39  ;;  %v8406_v33 = vrot.slane %v3805_v51, 7  ;;  %v8410_v58 = vmul.f32 %v9624_v7, %v6094_v26 }
 0x25a   : > { %v3524_v20 = vadd.f32 %v3425_v22, %v3230_v34  ;;  %v1699_v3 = vrot.slane %v1580_v25, 1  ;;  %v9407_v11 = vrot.slane %v8402_v31, 1  ;;  %v2173_v27 = vmul.f32 %v9639_v36, %v6120_v2 }
 0x25b   : > { %v1994_v38 = vrot.slane %v1875_v46, 2  ;;  %v3577_v32 = vadd.f32 %v8064_v29, %v3525_v30  ;;  %v4057_v21 = vsel %vm4048_vm2, %v8286_v63, %v8406_v33  ;;  %v9404_v22 = vrot.slane %v8410_v58, 2 }
 0x25c   : > { %v3576_v37 = vadd.f32 %v8064_v29, %v3524_v20  ;;  %v4197_v44 = vadd.f32 %v4057_v21, %v3955_v17  ;;  %v1700_v34 = vsel %vm1657_vm0, %v1697_v24, %v1699_v3  ;;  %v1702_v39 = vsel %vm1657_vm0, %v1699_v3, %v9407_v11 }
 0x25d   : > { %v9668_v51 = vrot.slane %v8194_v54, 2  ;;  %v1823_v20 = vadd.f32 %v1700_v34, %v1528_v49  ;;  %v1824_v30 = vadd.f32 %v1702_v39, %v1529_v23  ;;  %v1997_v63 = vsel %vm1952_vm1, %v1994_v38, %v9404_v22 }
 0x25e   : > { %v3602_v46 = vpack.c.bf16 %v3577_v32, %v3576_v37  ;;  %v4246_v17 = vpack.c.bf16 %v4197_v44, %v4197_v44  ;;  %v2174_v35 = vmul.f32 %v7573_v53, %v6120_v2  ;;  %v2273_v24 = vmul.f32 %v7573_v53, %v6123_v4 }
 0x25f   : > { %v1995_v25 = vsel %vm1952_vm1, %v9668_v51, %v1994_v38  ;;  %v8439_v3 = vmul.f32 %v9655_v6, %v6123_v4  ;;  %v2119_v37 = vadd.f32 %v1997_v63, %v1824_v30  ;;  %v2567_v49 = vmul.f32 %v7573_v53, %v6133_v19 }
 0x260   : > { %3790 = vmatmul.bf16.gmra.mxu3 %v3602_v46  ;;  %v2118_v54 = vadd.f32 %v1995_v25, %v1823_v20  ;;  %v8445_v23 = vmul.f32 %v9655_v6, %v6133_v19  ;;  %v4334_v38 = vshll.u32 %v4246_v17, 16  ;;  %v4338_v32 = vshrl.u32 %v4246_v17, 16 }
 0x261   : > { %v2391_v21 = vrot.slane %v2273_v24, 1  ;;  %v9406_v44 = vrot.slane %v8439_v3, 1  ;;  %v2222_v39 = vadd.f32 %v2174_v35, %v2119_v37  ;;  %v2685_v51 = vrot.slane %v2567_v49, 2  ;;  %v3753_v37 = vpop.f32.mrf.mxu3 }
 0x262   : > { %v2221_v34 = vadd.f32 %v2173_v27, %v2118_v54  ;;  %v9405_v46 = vrot.slane %v8445_v23, 2  ;;  %v4336_v25 = vrot.slane %v4334_v38, 5  ;;  %v4340_v20 = vrot.slane %v4338_v32, 4  ;;  %v9671_v32 = vld [vmem:[#allocation44_spill] sm:$0xff] }
 0x263   : > { %v9669_v30 = vrot.slane %v8220_v57, 1  ;;  %v2394_v17 = vsel %vm1657_vm0, %v2391_v21, %v9406_v44  ;;  %v9670_v27 = vrot.slane %v8226_v52, 2  ;;  %v2864_v38 = vmul.f32 %v9656_v10, %v6168_v42 }
 0x264   : > { %v2516_v22 = vadd.f32 %v2394_v17, %v2222_v39  ;;  %v2688_v54 = vsel %vm1952_vm1, %v2685_v51, %v9405_v46  ;;  %v4337_v57 = vsel %vm8093_vm5, %v8355_v14, %v4336_v25  ;;  %v4341_v49 = vor.u32 %v4340_v20, %v4336_v25  ;;  %v3693_v17 = vpop.f32.mrf.mxu1 }
 0x265   : > { %v2392_v63 = vsel %vm1657_vm0, %v9669_v30, %v2391_v21  ;;  %v2686_v35 = vsel %vm1952_vm1, %v9670_v27, %v2685_v51  ;;  %v2865_v21 = vmul.f32 %v9671_v32, %v6168_v42  ;;  %4829 = vst [vmem:[%s8110_s23 + $0xc] sm:$0xf] %v4337_v57  ;;  %v2964_v39 = vmul.f32 %v9671_v32, %v6171_v18  ;;  %v9672_v51 = vld [vmem:[#allocation17_spill] sm:$0xff] }
 0x266   : > { %v2515_v24 = vadd.f32 %v2392_v63, %v2221_v34  ;;  %v2810_v34 = vadd.f32 %v2688_v54, %v2516_v22  ;;  %v8473_v30 = vmul.f32 %v9672_v51, %v6171_v18  ;;  %v8476_v63 = vld [vmem:[%s5854_s22 + $0x80] sm:$0xff]   ;;  %v8478_v14 = vrot.slane %v4341_v49, 4 }
 0x267   : > { %v3258_v25 = vmul.f32 %v9671_v32, %v6173_v16  ;;  %v8484_v20 = vmul.f32 %v9672_v51, %v6173_v16  ;;  %v3754_v22 = vadd.f32 %v7895_v55, %v3753_v37  ;;  %v3082_v54 = vrot.slane %v2964_v39, 1 }
 0x268   : > { %v2809_v52 = vadd.f32 %v2686_v35, %v2515_v24  ;;  %v8488_v24 = vld [vmem:[%s5854_s22 + $0x20] sm:$0xff]   ;;  %v2913_v35 = vadd.f32 %v2865_v21, %v2810_v34  ;;  %v9411_v57 = vrot.slane %v8473_v30, 1  ;;  %v5514_v11 = vunpack.c.l.bf16 %v8476_v63 }
 0x269   : > { %v3376_v46 = vrot.slane %v3258_v25, 2  ;;  %v9412_v49 = vrot.slane %v8484_v20, 2  ;;  %v3830_v44 = vmax.f32 %v3754_v22, 0.0  ;;  %v9673_v12 = vrot.slane %v8259_v62, 1  ;;  %v1556_v22 = vld [vmem:[#allocation2 + $0xc0] sm:$0x1] }
 0x26a   : > { %v2912_v27 = vadd.f32 %v2864_v38, %v2809_v52  ;;  %v3085_v37 = vsel %vm1657_vm0, %v3082_v54, %v9411_v57  ;;  %v3694_v38 = vadd.f32 %v7895_v55, %v3693_v17  ;;  %v5466_v21 = vunpack.c.l.bf16 %v8488_v24 }
 0x26b   : > { %v3083_v60 = vsel %vm1657_vm0, %v9673_v12, %v3082_v54  ;;  %v3207_v34 = vadd.f32 %v3085_v37, %v2913_v35  ;;  %v9674_v39 = vrot.slane %v8265_v56, 2  ;;  %v3379_v62 = vsel %vm1952_vm1, %v3376_v46, %v9412_v49 }
 0x26c   : > { %v3206_v52 = vadd.f32 %v3083_v60, %v2912_v27  ;;  %v3980_v12 = vmul.f32 %v7919_v8, %v5514_v11  ;;  %v8508_v1 = vrot.slane %v3830_v44, 7  ;;  %v3806_v54 = vmax.f32 %v3694_v38, 0.0 }
 0x26d   : > { %v3377_v25 = vsel %vm1952_vm1, %v9674_v39, %v3376_v46  ;;  %v3956_v55 = vmul.f32 %v7919_v8, %v5466_v21  ;;  %v3501_v57 = vadd.f32 %v3379_v62, %v3207_v34  ;;  %v1554_v60 = vmul.f32 %v7247_v9, %v6103_v43 }
 0x26e   : > { %v3500_v17 = vadd.f32 %v3377_v25, %v3206_v52  ;;  %v1555_v56 = vmul.f32 %v9631_v47, %v6103_v43  ;;  %v4107_v46 = vsel %vm4048_vm2, %v8395_v45, %v8508_v1  ;;  %v8518_v27 = vrot.slane %v3806_v54, 7  ;;  %v2249_v45 = vld [vmem:[#allocation2 + $0xcc] sm:$0x1] }
 0x26f   : > { %v1557_v11 = vunpack.c.l.bf16 %v1556_v22  ;;  %v1606_v44 = vmul.f32 %v9631_v47, %v6085_v13  ;;  %v3553_v35 = vadd.f32 %v8064_v29, %v3501_v57  ;;  %v4222_v37 = vadd.f32 %v4107_v46, %v3980_v12 }
 0x270   : > { %v3552_v8 = vadd.f32 %v8064_v29, %v3500_v17  ;;  %v1901_v9 = vmul.f32 %v9631_v47, %v6094_v26  ;;  %v4059_v38 = vsel %vm4048_vm2, %v8406_v33, %v8518_v27  ;;  %v9675_v54 = vrot.slane %v8294_v28, 1 }
 0x271   : > { %v1607_v21 = vmul.f32 %v6085_v13, %v1557_v11  ;;  %v1751_v52 = vrot.slane %v1606_v44, 1  ;;  %v1902_v34 = vmul.f32 %v6094_v26, %v1557_v11  ;;  %v4271_v25 = vpack.c.bf16 %v4222_v37, %v4222_v37 }
 0x272   : > { %v3590_v39 = vpack.c.bf16 %v3553_v35, %v3552_v8  ;;  %v4198_v62 = vadd.f32 %v4059_v38, %v3956_v55  ;;  %v2046_v22 = vrot.slane %v1901_v9, 2  ;;  %v2199_v47 = vmul.f32 %v8076_v5, %v6120_v2 }
 0x273   : > { %v1752_v57 = vsel %vm1657_vm0, %v9675_v54, %v1751_v52  ;;  %v1753_v12 = vrot.slane %v1607_v21, 1  ;;  %v2048_v17 = vrot.slane %v1902_v34, 2  ;;  %v4584_v33 = vshll.u32 %v4271_v25, 16 }
 0x274   : > { %3730 = vmatmul.bf16.gmra.mxu1 %v3590_v39  ;;  %v4588_v46 = vshrl.u32 %v4271_v25, 16  ;;  %v4247_v49 = vpack.c.bf16 %v4198_v62, %v4198_v62  ;;  %v1849_v44 = vadd.f32 %v1752_v57, %v1554_v60  ;;  %v9676_v55 = vrot.slane %v8303_v48, 2 }
 0x275   : > { %v1754_v11 = vsel %vm1657_vm0, %v1751_v52, %v1753_v12  ;;  %v2049_v28 = vsel %vm1952_vm1, %v2046_v22, %v2048_v17  ;;  %v2200_v35 = vmul.f32 %v6120_v2, %v8081_v0  ;;  %v8543_v37 = vrot.slane %v4584_v33, 5  ;;  %v2940_v33 = vld [vmem:[#allocation2 + $0xd8] sm:$0x1] }
 0x276   : > { %v2047_v8 = vsel %vm1952_vm1, %v9676_v55, %v2046_v22  ;;  %v4590_v5 = vrot.slane %v4588_v46, 4  ;;  %v4344_v9 = vshll.u32 %v4247_v49, 16  ;;  %v4348_v38 = vshrl.u32 %v4247_v49, 16 }
 0x277   : > { %v1850_v21 = vadd.f32 %v1754_v11, %v1555_v56  ;;  %v2144_v34 = vadd.f32 %v2047_v8, %v1849_v44  ;;  %v2250_v60 = vunpack.c.l.bf16 %v2249_v45  ;;  %v2299_v52 = vmul.f32 %v6123_v4, %v8081_v0 }
 0x278   : > { %v4591_v48 = vor.u32 %v4590_v5, %v8543_v37  ;;  %v4346_v39 = vrot.slane %v4344_v9, 5  ;;  %v4350_v25 = vrot.slane %v4348_v38, 4  ;;  %v2593_v62 = vmul.f32 %v6133_v19, %v8081_v0  ;;  %v5685_v5 = vld [vmem:[#allocation2 + $0xd0] sm:$0xff] }
 0x279   : > { %v2145_v22 = vadd.f32 %v2049_v28, %v1850_v21  ;;  %v2247_v54 = vadd.f32 %v2199_v47, %v2144_v34  ;;  %v2300_v57 = vmul.f32 %v6123_v4, %v2250_v60  ;;  %v2443_v12 = vrot.slane %v2299_v52, 1  ;;  %v3756_v34 = vpop.f32.mrf.mxu3 }
 0x27a   : > { %v8551_v49 = vrot.slane %v4591_v48, 4  ;;  %v4347_v45 = vsel %vm8093_vm5, %v8478_v14, %v4346_v39  ;;  %v4351_v56 = vor.u32 %v4350_v25, %v4346_v39  ;;  %v2594_v17 = vmul.f32 %v6133_v19, %v2250_v60 }
 0x27b   : > { %4830 = vst [vmem:[%s8110_s23 + $0x10] sm:$0xf] %v4347_v45  ;;  %v2248_v46 = vadd.f32 %v2200_v35, %v2145_v22  ;;  %v9677_v44 = vrot.slane %v8329_v50, 1  ;;  %v2445_v47 = vrot.slane %v2300_v57, 1  ;;  %v2737_v11 = vrot.slane %v2593_v62, 2 }
 0x27c   : > { %v8561_v55 = vrot.slane %v4351_v56, 4  ;;  %v2739_v28 = vrot.slane %v2594_v17, 2  ;;  %v5455_v9 = vunpack.c.h.bf16 %v5685_v5  ;;  %v9678_v38 = vrot.slane %v8335_v59, 2 }
 0x27d   : > { %v2444_v0 = vsel %vm1657_vm0, %v9677_v44, %v2443_v12  ;;  %v2446_v14 = vsel %vm1657_vm0, %v2443_v12, %v2445_v47  ;;  %v2890_v35 = vmul.f32 %v8353_v41, %v6168_v42  ;;  %v2941_v50 = vunpack.c.l.bf16 %v2940_v33  ;;  %v8578_v41 = vld [vmem:[%s9244_s7] ss:$0 sm:$0xff] }
 0x27e   : > { %v2541_v8 = vadd.f32 %v2444_v0, %v2247_v54  ;;  %v2738_v21 = vsel %vm1952_vm1, %v9678_v38, %v2737_v11  ;;  %v2542_v60 = vadd.f32 %v2446_v14, %v2248_v46  ;;  %v2740_v52 = vsel %vm1952_vm1, %v2737_v11, %v2739_v28  ;;  %v3696_v54 = vpop.f32.mrf.mxu1  ;;  %v8585_v11 = vld [vmem:[%s9245_s8] ss:$0 sm:$0xff] }
 0x27f   : > { %v2891_v39 = vmul.f32 %v5455_v9, %v6168_v42  ;;  %v2990_v25 = vmul.f32 %v5455_v9, %v6171_v18  ;;  %v2991_v62 = vmul.f32 %v6171_v18, %v2941_v50  ;;  %v3284_v22 = vmul.f32 %v5455_v9, %v6173_v16 }
 0x280   : > { %v2835_v48 = vadd.f32 %v2738_v21, %v2541_v8  ;;  %v3285_v59 = vmul.f32 %v6173_v16, %v2941_v50  ;;  %v2836_v57 = vadd.f32 %v2740_v52, %v2542_v60  ;;  %v3757_v45 = vadd.f32 %v8578_v41, %v3756_v34 }
 0x281   : > { %v5515_v56 = vunpack.c.h.bf16 %v8476_v63  ;;  %v3134_v17 = vrot.slane %v2990_v25, 1  ;;  %v3136_v33 = vrot.slane %v2991_v62, 1  ;;  %v3428_v46 = vrot.slane %v3284_v22, 2 }
 0x282   : > { %v2938_v12 = vadd.f32 %v2890_v35, %v2835_v48  ;;  %v3430_v44 = vrot.slane %v3285_v59, 2  ;;  %v2939_v0 = vadd.f32 %v2891_v39, %v2836_v57  ;;  %v3831_v47 = vmax.f32 %v3757_v45, 0.0 }
 0x283   : > { %v3981_v8 = vmul.f32 %v8585_v11, %v5515_v56  ;;  %v3697_v28 = vadd.f32 %v8578_v41, %v3696_v54  ;;  %v9679_v5 = vrot.slane %v8365_v61, 1  ;;  %v3137_v63 = vsel %vm1657_vm0, %v3134_v17, %v3136_v33 }
 0x284   : > { %v9680_v14 = vrot.slane %v8369_v40, 2  ;;  %v3431_v21 = vsel %vm1952_vm1, %v3428_v46, %v3430_v44  ;;  %v3233_v50 = vadd.f32 %v3137_v63, %v2939_v0  ;;  %v8597_v34 = vrot.slane %v3831_v47, 7 }
 0x285   : > { %v3135_v9 = vsel %vm1657_vm0, %v9679_v5, %v3134_v17  ;;  %v3807_v60 = vmax.f32 %v3697_v28, 0.0  ;;  %v5467_v52 = vunpack.c.h.bf16 %v8488_v24  ;;  %v1530_v61 = vmul.f32 %v9624_v7, %v6103_v43 }
 0x286   : > { %v3429_v38 = vsel %vm1952_vm1, %v9680_v14, %v3428_v46  ;;  %v3232_v35 = vadd.f32 %v3135_v9, %v2938_v12  ;;  %v1531_v48 = vmul.f32 %v9639_v36, %v6103_v43  ;;  %v1582_v40 = vmul.f32 %v9639_v36, %v6085_v13 }
 0x287   : > { %v3527_v25 = vadd.f32 %v3431_v21, %v3233_v50  ;;  %v4109_v62 = vsel %vm4048_vm2, %v8508_v1, %v8597_v34  ;;  %v8609_v22 = vrot.slane %v3807_v60, 7  ;;  %v3957_v24 = vmul.f32 %v8585_v11, %v5467_v52 }
 0x288   : > { %v3526_v39 = vadd.f32 %v3429_v38, %v3232_v35  ;;  %v4223_v59 = vadd.f32 %v4109_v62, %v3981_v8  ;;  %v8614_v7 = vmul.f32 %v7573_v53, %v6085_v13  ;;  %v1703_v54 = vrot.slane %v1582_v40, 1  ;;  %v3758_v40 = vpop.f32.mrf.mxu3 }
 0x289   : > { %v3579_v12 = vadd.f32 %v8064_v29, %v3527_v25  ;;  %v4061_v45 = vsel %vm4048_vm2, %v8518_v27, %v8609_v22  ;;  %v1877_v1 = vmul.f32 %v9639_v36, %v6094_v26  ;;  %v9681_v33 = vrot.slane %v8402_v31, 1 }
 0x28a   : > { %v3578_v57 = vadd.f32 %v8064_v29, %v3526_v39  ;;  %v4272_v56 = vpack.c.bf16 %v4223_v59, %v4223_v59  ;;  %v4199_v17 = vadd.f32 %v4061_v45, %v3957_v24  ;;  %v1705_v44 = vrot.slane %v8614_v7, 1  ;;  %v3698_v24 = vpop.f32.mrf.mxu1 }
 0x28b   : > { %v1704_v46 = vsel %vm1657_vm0, %v9681_v33, %v1703_v54  ;;  %v8629_v29 = vmul.f32 %v7573_v53, %v6094_v26  ;;  %v1998_v8 = vrot.slane %v1877_v1, 2  ;;  %v9682_v9 = vrot.slane %v8410_v58, 2 }
 0x28c   : > { %v3603_v0 = vpack.c.bf16 %v3579_v12, %v3578_v57  ;;  %v1825_v47 = vadd.f32 %v1704_v46, %v1530_v61  ;;  %v4594_v28 = vshll.u32 %v4272_v56, 16  ;;  %v4598_v27 = vshrl.u32 %v4272_v56, 16 }
 0x28d   : > { %v4248_v5 = vpack.c.bf16 %v4199_v17, %v4199_v17  ;;  %v1706_v36 = vsel %vm1657_vm0, %v1703_v54, %v1705_v44  ;;  %v1999_v63 = vsel %vm1952_vm1, %v9682_v9, %v1998_v8  ;;  %v2000_v14 = vrot.slane %v8629_v29, 2 }
 0x28e   : > { %3795 = vmatmul.bf16.gmra.mxu3 %v3603_v0  ;;  %v1826_v31 = vadd.f32 %v1706_v36, %v1531_v48  ;;  %v2175_v38 = vmul.f32 %v9655_v6, %v6120_v2  ;;  %v4596_v21 = vrot.slane %v4594_v28, 5  ;;  %v4600_v35 = vrot.slane %v4598_v27, 4 }
 0x28f   : > { %v4354_v50 = vshll.u32 %v4248_v5, 16  ;;  %v4358_v60 = vshrl.u32 %v4248_v5, 16  ;;  %v2001_v52 = vsel %vm1952_vm1, %v1998_v8, %v2000_v14  ;;  %v2120_v61 = vadd.f32 %v1999_v63, %v1825_v47 }
 0x290   : > { %v2176_v58 = vmul.f32 %v9656_v10, %v6120_v2  ;;  %v2275_v48 = vmul.f32 %v9656_v10, %v6123_v4  ;;  %v4597_v39 = vsel %vm8093_vm5, %v8551_v49, %v4596_v21  ;;  %v4601_v25 = vor.u32 %v4600_v35, %v4596_v21 }
 0x291   : > { %v4356_v62 = vrot.slane %v4354_v50, 5  ;;  %v4360_v59 = vrot.slane %v4358_v60, 4  ;;  %4855 = vst [vmem:[%s8110_s23 + $0x74] sm:$0xf] %v4597_v39  ;;  %v2121_v54 = vadd.f32 %v2001_v52, %v1826_v31  ;;  %v2223_v57 = vadd.f32 %v2175_v38, %v2120_v61  ;;  %v9684_v31 = vld [vmem:[#allocation18_spill] sm:$0xff]  ;;  %v5615_v61 = vld [vmem:[%s5854_s22 + $0x88] sm:$0xff]  }
 0x292   : > { %v8653_v12 = vmul.f32 %v9671_v32, %v6123_v4  ;;  %v2395_v45 = vrot.slane %v2275_v48, 1  ;;  %v8655_v1 = vrot.slane %v4601_v25, 4  ;;  %v2569_v49 = vmul.f32 %v9656_v10, %v6133_v19  ;;  %v9686_v50 = vld [vmem:[#allocation26_spill] sm:$0xff] }
 0x293   : > { %v4357_v56 = vsel %vm8093_vm5, %v8561_v55, %v4356_v62  ;;  %v4361_v17 = vor.u32 %v4360_v59, %v4356_v62  ;;  %v2224_v33 = vadd.f32 %v2176_v58, %v2121_v54  ;;  %v9683_v46 = vrot.slane %v8439_v3, 1 }
 0x294   : > { %4831 = vst [vmem:[%s8110_s23 + $0x14] sm:$0xf] %v4357_v56  ;;  %v2397_v47 = vrot.slane %v8653_v12, 1  ;;  %v8669_v8 = vmul.f32 %v9671_v32, %v6133_v19  ;;  %v2689_v27 = vrot.slane %v2569_v49, 2  ;;  %v2866_v5 = vmul.f32 %v9672_v51, %v6168_v42 }
 0x295   : > { %v2396_v0 = vsel %vm1657_vm0, %v9683_v46, %v2395_v45  ;;  %v8671_v28 = vrot.slane %v4361_v17, 4  ;;  %v2867_v9 = vmul.f32 %v9684_v31, %v6168_v42  ;;  %v2966_v63 = vmul.f32 %v9684_v31, %v6171_v18  ;;  %v3761_v46 = vpop.f32.mrf.mxu3 }
 0x296   : > { %v2517_v55 = vadd.f32 %v2396_v0, %v2223_v57  ;;  %v2398_v3 = vsel %vm1657_vm0, %v2395_v45, %v2397_v47  ;;  %v2691_v36 = vrot.slane %v8669_v8, 2  ;;  %v9685_v21 = vrot.slane %v8445_v23, 2 }
 0x297   : > { %v2518_v38 = vadd.f32 %v2398_v3, %v2224_v33  ;;  %v8688_v60 = vmul.f32 %v9686_v50, %v6171_v18  ;;  %v3260_v52 = vmul.f32 %v9684_v31, %v6173_v16  ;;  %v3086_v39 = vrot.slane %v2966_v63, 1  ;;  %v5603_v33 = vld [vmem:[%s5854_s22 + $0x28] sm:$0xff]  }
 0x298   : > { %v2690_v35 = vsel %vm1952_vm1, %v9685_v21, %v2689_v27  ;;  %v2692_v58 = vsel %vm1952_vm1, %v2689_v27, %v2691_v36  ;;  %v8698_v23 = vmul.f32 %v9686_v50, %v6173_v16  ;;  %v3759_v54 = vadd.f32 %v8578_v41, %v3758_v40 }
 0x299   : > { %v2811_v48 = vadd.f32 %v2690_v35, %v2517_v55  ;;  %v2812_v25 = vadd.f32 %v2692_v58, %v2518_v38  ;;  %v3088_v62 = vrot.slane %v8688_v60, 1  ;;  %v3380_v59 = vrot.slane %v3260_v52, 2 }
 0x29a   : > { %v9687_v45 = vrot.slane %v8473_v30, 1  ;;  %v3382_v17 = vrot.slane %v8698_v23, 2  ;;  %v5518_v49 = vunpack.c.l.bf16 %v5615_v61  ;;  %v9688_v27 = vrot.slane %v8484_v20, 2 }
 0x29b   : > { %v2914_v57 = vadd.f32 %v2866_v5, %v2811_v48  ;;  %v2915_v0 = vadd.f32 %v2867_v9, %v2812_v25  ;;  %v3089_v55 = vsel %vm1657_vm0, %v3086_v39, %v3088_v62  ;;  %v3832_v40 = vmax.f32 %v3759_v54, 0.0  ;;  %v3701_v5 = vpop.f32.mrf.mxu1 }
 0x29c   : > { %v3087_v56 = vsel %vm1657_vm0, %v9687_v45, %v3086_v39  ;;  %v3381_v3 = vsel %vm1952_vm1, %v9688_v27, %v3380_v59  ;;  %v3383_v30 = vsel %vm1952_vm1, %v3380_v59, %v3382_v17  ;;  %v3982_v38 = vmul.f32 %v8585_v11, %v5518_v49 }
 0x29d   : > { %v3208_v63 = vadd.f32 %v3087_v56, %v2914_v57  ;;  %v3699_v21 = vadd.f32 %v8578_v41, %v3698_v24  ;;  %v3209_v9 = vadd.f32 %v3089_v55, %v2915_v0  ;;  %v4110_v35 = vrot.slane %v3832_v40, 7  ;;  %v8726_v24 = vld [vmem:[%s9242_s5] ss:$0 sm:$0xff] }
 0x29e   : > { %v5470_v52 = vunpack.c.l.bf16 %v5603_v33  ;;  %v3762_v58 = vadd.f32 %v8578_v41, %v3761_v46  ;;  %v5519_v39 = vunpack.c.h.bf16 %v5615_v61  ;;  %v3702_v25 = vadd.f32 %v8578_v41, %v3701_v5 }
 0x29f   : > { %v3502_v48 = vadd.f32 %v3381_v3, %v3208_v63  ;;  %v3808_v20 = vmax.f32 %v3699_v21, 0.0  ;;  %v3503_v54 = vadd.f32 %v3383_v30, %v3209_v9  ;;  %v4111_v57 = vsel %vm4048_vm2, %v8597_v34, %v4110_v35 }
 0x2a0   : > { %v3958_v59 = vmul.f32 %v8585_v11, %v5470_v52  ;;  %v3833_v45 = vmax.f32 %v3762_v58, 0.0  ;;  %v4224_v49 = vadd.f32 %v4111_v57, %v3982_v38  ;;  %v3983_v61 = vmul.f32 %v8585_v11, %v5519_v39 }
 0x2a1   : > { %v3554_v56 = vadd.f32 %v8726_v24, %v3502_v48  ;;  %v4062_v46 = vrot.slane %v3808_v20, 7  ;;  %v3555_v0 = vadd.f32 %v8726_v24, %v3503_v54  ;;  %v3809_v27 = vmax.f32 %v3702_v25, 0.0 }
 0x2a2   : > { %v8731_v55 = vrot.slane %v3833_v45, 7  ;;  %v5471_v34 = vunpack.c.h.bf16 %v5603_v33  ;;  %v4273_v3 = vpack.c.bf16 %v4224_v49, %v4224_v49  ;;  %v1532_v5 = vmul.f32 %v7573_v53, %v6103_v43 }
 0x2a3   : > { %v4063_v40 = vsel %vm4048_vm2, %v8609_v22, %v4062_v46  ;;  %v1533_v63 = vmul.f32 %v9655_v6, %v6103_v43  ;;  %v3591_v30 = vpack.c.bf16 %v3555_v0, %v3554_v56  ;;  %v8742_v48 = vrot.slane %v3809_v27, 7 }
 0x2a4   : > { %v4200_v38 = vadd.f32 %v4063_v40, %v3958_v59  ;;  %v4113_v21 = vsel %vm4048_vm2, %v4110_v35, %v8731_v55  ;;  %v3959_v9 = vmul.f32 %v8585_v11, %v5471_v34  ;;  %v4604_v52 = vshll.u32 %v4273_v3, 16 }
 0x2a5   : > { %v4608_v58 = vshrl.u32 %v4273_v3, 16  ;;  %v4225_v33 = vadd.f32 %v4113_v21, %v3983_v61  ;;  %3735 = vmatmul.bf16.gmra.mxu1 %v3591_v30  ;;  %v1584_v53 = vmul.f32 %v9655_v6, %v6085_v13  ;;  %v8748_v20 = vmul.f32 %v9656_v10, %v6085_v13 }
 0x2a6   : > { %v4249_v22 = vpack.c.bf16 %v4200_v38, %v4200_v38  ;;  %v1879_v35 = vmul.f32 %v9655_v6, %v6094_v26  ;;  %v4606_v39 = vrot.slane %v4604_v52, 5  ;;  %v4065_v57 = vsel %vm4048_vm2, %v4062_v46, %v8742_v48 }
 0x2a7   : > { %v4610_v25 = vrot.slane %v4608_v58, 4  ;;  %v4274_v54 = vpack.c.bf16 %v4225_v33, %v4225_v33  ;;  %v4201_v56 = vadd.f32 %v4065_v57, %v3959_v9  ;;  %v1707_v49 = vrot.slane %v1584_v53, 1 }
 0x2a8   : > { %v4364_v59 = vshll.u32 %v4249_v22, 16  ;;  %v4368_v45 = vshrl.u32 %v4249_v22, 16  ;;  %v4607_v61 = vsel %vm8093_vm5, %v8655_v1, %v4606_v39  ;;  %v1709_v9 = vrot.slane %v8748_v20, 1 }
 0x2a9   : > { %v4611_v0 = vor.u32 %v4610_v25, %v4606_v39  ;;  %v4614_v27 = vshll.u32 %v4274_v54, 16  ;;  %v4618_v34 = vshrl.u32 %v4274_v54, 16  ;;  %4856 = vst [vmem:[%s8110_s23 + $0x78] sm:$0xf] %v4607_v61  ;;  %v4250_v40 = vpack.c.bf16 %v4201_v56, %v4201_v56 }
 0x2aa   : > { %v4366_v6 = vrot.slane %v4364_v59, 5  ;;  %v4370_v3 = vrot.slane %v4368_v45, 4  ;;  %v1708_v46 = vsel %vm1657_vm0, %v1705_v44, %v1707_v49  ;;  %v1710_v44 = vsel %vm1657_vm0, %v1707_v49, %v1709_v9 }
 0x2ab   : > { %v4612_v30 = vrot.slane %v4611_v0, 4  ;;  %v4616_v38 = vrot.slane %v4614_v27, 5  ;;  %v4620_v21 = vrot.slane %v4618_v34, 4  ;;  %v4374_v58 = vshll.u32 %v4250_v40, 16  ;;  %v3703_v27 = vpop.f32.mrf.mxu1 }
 0x2ac   : > { %v4367_v1 = vsel %vm8093_vm5, %v8671_v28, %v4366_v6  ;;  %v4371_v52 = vor.u32 %v4370_v3, %v4366_v6  ;;  %v4378_v33 = vshrl.u32 %v4250_v40, 16  ;;  %v1827_v53 = vadd.f32 %v1708_v46, %v1532_v5  ;;  %v3763_v28 = vpop.f32.mrf.mxu3 }
 0x2ad   : > { %4832 = vst [vmem:[%s8110_s23 + $0x18] sm:$0xf] %v4367_v1  ;;  %v4617_v22 = vsel %vm8093_vm5, %v4612_v30, %v4616_v38  ;;  %v4621_v7 = vor.u32 %v4620_v21, %v4616_v38  ;;  %v4376_v25 = vrot.slane %v4374_v58, 5  ;;  %v1828_v57 = vadd.f32 %v1710_v44, %v1533_v63  ;;  %v9689_v44 = vld [vmem:[#allocation27_spill] sm:$0xff] }
 0x2ae   : > { %v4372_v39 = vrot.slane %v4371_v52, 4  ;;  %4857 = vst [vmem:[%s8110_s23 + $0x7c] sm:$0xf] %v4617_v22  ;;  %v4380_v54 = vrot.slane %v4378_v33, 4  ;;  %v8776_v45 = vmul.f32 %v9656_v10, %v6094_v26  ;;  %v2002_v56 = vrot.slane %v1879_v35, 2 }
 0x2af   : > { %v8772_v59 = vrot.slane %v4621_v7, 4  ;;  %v2177_v61 = vmul.f32 %v9671_v32, %v6120_v2  ;;  %v2178_v0 = vmul.f32 %v9672_v51, %v6120_v2  ;;  %v2277_v63 = vmul.f32 %v9672_v51, %v6123_v4 }
 0x2b0   : > { %v4377_v5 = vsel %vm8093_vm5, %v4372_v39, %v4376_v25  ;;  %v4381_v49 = vor.u32 %v4380_v54, %v4376_v25  ;;  %v2003_v34 = vsel %vm1952_vm1, %v2000_v14, %v2002_v56  ;;  %v2004_v35 = vrot.slane %v8776_v45, 2  ;;  %v5616_v25 = vld [vmem:[%s5854_s22 + $0x90] sm:$0xff]  }
 0x2b1   : > { %4833 = vst [vmem:[%s8110_s23 + $0x1c] sm:$0xf] %v4377_v5  ;;  %v8793_v6 = vmul.f32 %v9684_v31, %v6123_v4  ;;  %v2571_v3 = vmul.f32 %v9672_v51, %v6133_v19  ;;  %v2122_v46 = vadd.f32 %v2003_v34, %v1827_v53  ;;  %v2399_v30 = vrot.slane %v2277_v63, 1 }
 0x2b2   : > { %v8797_v40 = vrot.slane %v4381_v49, 4  ;;  %v8801_v38 = vmul.f32 %v9684_v31, %v6133_v19  ;;  %v2005_v29 = vsel %vm1952_vm1, %v2002_v56, %v2004_v35  ;;  %v2868_v1 = vmul.f32 %v9686_v50, %v6168_v42 }
 0x2b3   : > { %v2401_v14 = vrot.slane %v8793_v6, 1  ;;  %v2693_v21 = vrot.slane %v2571_v3, 2  ;;  %v2123_v51 = vadd.f32 %v2005_v29, %v1828_v57  ;;  %v2225_v52 = vadd.f32 %v2177_v61, %v2122_v46  ;;  %v9690_v57 = vld [vmem:[#allocation40_spill] sm:$0xff] }
 0x2b4   : > { %v2400_v58 = vsel %vm1657_vm0, %v2397_v47, %v2399_v30  ;;  %v2695_v33 = vrot.slane %v8801_v38, 2  ;;  %v2869_v53 = vmul.f32 %v9689_v44, %v6168_v42  ;;  %v2968_v39 = vmul.f32 %v9689_v44, %v6171_v18  ;;  %v3766_v3 = vpop.f32.mrf.mxu3 }
 0x2b5   : > { %v2402_v22 = vsel %vm1657_vm0, %v2399_v30, %v2401_v14  ;;  %v2694_v7 = vsel %vm1952_vm1, %v2691_v36, %v2693_v21  ;;  %v2226_v12 = vadd.f32 %v2178_v0, %v2123_v51  ;;  %v2519_v54 = vadd.f32 %v2400_v58, %v2225_v52  ;;  %v5604_v51 = vld [vmem:[%s5854_s22 + $0x30] sm:$0xff]  }
 0x2b6   : > { %v2696_v47 = vsel %vm1952_vm1, %v2693_v21, %v2695_v33  ;;  %v8829_v56 = vmul.f32 %v9690_v57, %v6171_v18  ;;  %v3090_v8 = vrot.slane %v2968_v39, 1  ;;  %v3262_v36 = vmul.f32 %v9689_v44, %v6173_v16 }
 0x2b7   : > { %v8835_v61 = vmul.f32 %v9690_v57, %v6173_v16  ;;  %v3764_v5 = vadd.f32 %v8578_v41, %v3763_v28  ;;  %v2520_v49 = vadd.f32 %v2402_v22, %v2226_v12  ;;  %v2813_v0 = vadd.f32 %v2694_v7, %v2519_v54  ;;  %v3706_v7 = vpop.f32.mrf.mxu1 }
 0x2b8   : > { %v3092_v63 = vrot.slane %v8829_v56, 1  ;;  %v5522_v34 = vunpack.c.l.bf16 %v5616_v25  ;;  %v3091_v46 = vsel %vm1657_vm0, %v3088_v62, %v3090_v8  ;;  %v3384_v30 = vrot.slane %v3262_v36, 2 }
 0x2b9   : > { %v3386_v29 = vrot.slane %v8835_v61, 2  ;;  %v3834_v21 = vmax.f32 %v3764_v5, 0.0  ;;  %v2814_v52 = vadd.f32 %v2696_v47, %v2520_v49  ;;  %v2916_v58 = vadd.f32 %v2868_v1, %v2813_v0 }
 0x2ba   : > { %v3093_v28 = vsel %vm1657_vm0, %v3090_v8, %v3092_v63  ;;  %v3984_v22 = vmul.f32 %v8585_v11, %v5522_v34  ;;  %v3385_v60 = vsel %vm1952_vm1, %v3382_v17, %v3384_v30  ;;  %v3704_v39 = vadd.f32 %v8578_v41, %v3703_v27 }
 0x2bb   : > { %v3387_v62 = vsel %vm1952_vm1, %v3384_v30, %v3386_v29  ;;  %v4114_v44 = vrot.slane %v3834_v21, 7  ;;  %v2917_v12 = vadd.f32 %v2869_v53, %v2814_v52  ;;  %v3210_v1 = vadd.f32 %v3091_v46, %v2916_v58 }
 0x2bc   : > { %v5474_v54 = vunpack.c.l.bf16 %v5604_v51  ;;  %v3767_v47 = vadd.f32 %v8578_v41, %v3766_v3  ;;  %v3810_v36 = vmax.f32 %v3704_v39, 0.0  ;;  %v5523_v5 = vunpack.c.h.bf16 %v5616_v25 }
 0x2bd   : > { %v4115_v8 = vsel %vm4048_vm2, %v8731_v55, %v4114_v44  ;;  %v3707_v23 = vadd.f32 %v8578_v41, %v3706_v7  ;;  %v3211_v17 = vadd.f32 %v3093_v28, %v2917_v12  ;;  %v3504_v49 = vadd.f32 %v3385_v60, %v3210_v1 }
 0x2be   : > { %v4226_v0 = vadd.f32 %v4115_v8, %v3984_v22  ;;  %v3960_v34 = vmul.f32 %v8585_v11, %v5474_v54  ;;  %v4066_v30 = vrot.slane %v3810_v36, 7  ;;  %v3835_v21 = vmax.f32 %v3767_v47, 0.0 }
 0x2bf   : > { %v3985_v27 = vmul.f32 %v8585_v11, %v5523_v5  ;;  %v3811_v53 = vmax.f32 %v3707_v23, 0.0  ;;  %v3505_v46 = vadd.f32 %v3387_v62, %v3211_v17  ;;  %v3556_v3 = vadd.f32 %v8726_v24, %v3504_v49  ;;  %v8871_v62 = vpop.f32.mrf.mxu3  ;;  %v8880_v5 = vpop.f32.mrf.mxu1 }
 0x2c0   : > { %v4275_v52 = vpack.c.bf16 %v4226_v0, %v4226_v0  ;;  %v5475_v58 = vunpack.c.h.bf16 %v5604_v51  ;;  %v4067_v55 = vsel %vm4048_vm2, %v8742_v48, %v4066_v30  ;;  %v8864_v25 = vrot.slane %v3835_v21, 7 }
 0x2c1   : > { %v8866_v28 = vrot.slane %v3811_v53, 7  ;;  %v1534_v22 = vmul.f32 %v9656_v10, %v6103_v43  ;;  %v3557_v7 = vadd.f32 %v8726_v24, %v3505_v46  ;;  %v4202_v12 = vadd.f32 %v4067_v55, %v3960_v34 }
 0x2c2   : > { %v4624_v60 = vshll.u32 %v4275_v52, 16  ;;  %v4628_v39 = vshrl.u32 %v4275_v52, 16  ;;  %v4117_v51 = vsel %vm4048_vm2, %v4114_v44, %v8864_v25  ;;  %v3961_v1 = vmul.f32 %v8585_v11, %v5475_v58 }
 0x2c3   : > { %v4069_v48 = vsel %vm4048_vm2, %v4066_v30, %v8866_v28  ;;  %v1535_v54 = vmul.f32 %v9671_v32, %v6103_v43  ;;  %v3592_v10 = vpack.c.bf16 %v3557_v7, %v3556_v3  ;;  %v4251_v36 = vpack.c.bf16 %v4202_v12, %v4202_v12  ;;  %v9691_v12 = vld [vmem:[#allocation22_spill] sm:$0xff] }
 0x2c4   : > { %v4626_v47 = vrot.slane %v4624_v60, 5  ;;  %v4630_v8 = vrot.slane %v4628_v39, 4  ;;  %v4227_v23 = vadd.f32 %v4117_v51, %v3985_v27  ;;  %v4203_v17 = vadd.f32 %v4069_v48, %v3961_v1 }
 0x2c5   : > { %v1586_v44 = vmul.f32 %v9671_v32, %v6085_v13  ;;  %v1881_v49 = vmul.f32 %v9671_v32, %v6094_v26  ;;  %3740 = vmatmul.bf16.gmra.mxu1 %v3592_v10  ;;  %v4384_v34 = vshll.u32 %v4251_v36, 16  ;;  %v4388_v30 = vshrl.u32 %v4251_v36, 16 }
 0x2c6   : > { %v4627_v0 = vsel %vm8093_vm5, %v8772_v59, %v4626_v47  ;;  %v4631_v43 = vor.u32 %v4630_v8, %v4626_v47  ;;  %v4276_v21 = vpack.c.bf16 %v4227_v23, %v4227_v23  ;;  %v4252_v53 = vpack.c.bf16 %v4203_v17, %v4203_v17 }
 0x2c7   : > { %4858 = vst [vmem:[%s8110_s23 + $0x80] sm:$0xf] %v4627_v0  ;;  %v1711_v27 = vrot.slane %v1586_v44, 1  ;;  %v2006_v46 = vrot.slane %v1881_v49, 2  ;;  %v4386_v52 = vrot.slane %v4384_v34, 5  ;;  %v4390_v13 = vrot.slane %v4388_v30, 4  ;;  %v8901_v48 = vpop.f32.mrf.mxu3 }
 0x2c8   : > { %v4632_v3 = vrot.slane %v4631_v43, 4  ;;  %v2179_v26 = vmul.f32 %v9684_v31, %v6120_v2  ;;  %v4634_v32 = vshll.u32 %v4276_v21, 16  ;;  %v4638_v58 = vshrl.u32 %v4276_v21, 16  ;;  %v9693_v0 = vld [vmem:[#allocation23_spill] sm:$0xff] }
 0x2c9   : > { %v4394_v55 = vshll.u32 %v4252_v53, 16  ;;  %v4398_v7 = vshrl.u32 %v4252_v53, 16  ;;  %v4387_v59 = vsel %vm8093_vm5, %v8797_v40, %v4386_v52  ;;  %v4391_v60 = vor.u32 %v4390_v13, %v4386_v52 }
 0x2ca   : > { %v1712_v39 = vsel %vm1657_vm0, %v1709_v9, %v1711_v27  ;;  %v9692_v51 = vrot.slane %v9691_v12, 1  ;;  %4834 = vst [vmem:[%s8110_s23 + $0x20] sm:$0xf] %v4387_v59  ;;  %v4636_v31 = vrot.slane %v4634_v32, 5  ;;  %v4640_v10 = vrot.slane %v4638_v58, 4  ;;  %v3711_v9 = vpop.f32.mrf.mxu1 }
 0x2cb   : > { %v4396_v47 = vrot.slane %v4394_v55, 5  ;;  %v4400_v8 = vrot.slane %v4398_v7, 4  ;;  %v4392_v36 = vrot.slane %v4391_v60, 4  ;;  %v1829_v40 = vadd.f32 %v1712_v39, %v1534_v22  ;;  %v9696_v39 = vld [vmem:[#allocation34_spill] sm:$0xff] }
 0x2cc   : > { %v1714_v1 = vsel %vm1657_vm0, %v1711_v27, %v9692_v51  ;;  %v2007_v20 = vsel %vm1952_vm1, %v2004_v35, %v2006_v46  ;;  %v4637_v17 = vsel %vm8093_vm5, %v4632_v3, %v4636_v31  ;;  %v4641_v44 = vor.u32 %v4640_v10, %v4636_v31  ;;  %v5605_v3 = vld [vmem:[%s5854_s22 + $0x38] sm:$0xff]   ;;  %v9698_v51 = vld [vmem:[#allocation35_spill] sm:$0xff] }
 0x2cd   : > { %v1830_v23 = vadd.f32 %v1714_v1, %v1535_v54  ;;  %v4401_v49 = vor.u32 %v4400_v8, %v4396_v47  ;;  %v9694_v43 = vrot.slane %v9693_v0, 2  ;;  %4859 = vst [vmem:[%s8110_s23 + $0x84] sm:$0xf] %v4637_v17  ;;  %v4397_v22 = vsel %vm8093_vm5, %v4392_v36, %v4396_v47  ;;  %v9702_v0 = vld [vmem:[#allocation50_spill] sm:$0xff] }
 0x2ce   : > { %v2124_v54 = vadd.f32 %v2007_v20, %v1829_v40  ;;  %v2180_v35 = vmul.f32 %v9686_v50, %v6120_v2  ;;  %v8917_v30 = vrot.slane %v4641_v44, 4  ;;  %4835 = vst [vmem:[%s8110_s23 + $0x24] sm:$0xf] %v4397_v22  ;;  %v2279_v53 = vmul.f32 %v9686_v50, %v6123_v4  ;;  %v9695_v2 = vld [vmem:[#allocation41_spill] sm:$0xff] }
 0x2cf   : > { %v2009_v34 = vsel %vm1952_vm1, %v2006_v46, %v9694_v43  ;;  %v8919_v21 = vrot.slane %v4401_v49, 4  ;;  %v2573_v27 = vmul.f32 %v9686_v50, %v6133_v19  ;;  %v5617_v46 = vld [vmem:[%s5854_s22 + $0x98] sm:$0xff]   ;;  %v2870_v32 = vmul.f32 %v9690_v57, %v6168_v42  ;;  %v3773_v57 = vpop.f32.mrf.mxu3 }
 0x2d0   : > { %v2125_v45 = vadd.f32 %v2009_v34, %v1830_v23  ;;  %v2227_v52 = vadd.f32 %v2179_v26, %v2124_v54  ;;  %v2871_v58 = vmul.f32 %v9695_v2, %v6168_v42  ;;  %v2403_v55 = vrot.slane %v2279_v53, 1  ;;  %v9700_v20 = vld [vmem:[#allocation49_spill] sm:$0xff] }
 0x2d1   : > { %v2697_v7 = vrot.slane %v2573_v27, 2  ;;  %v2970_v59 = vmul.f32 %v9695_v2, %v6171_v18  ;;  %v3264_v4 = vmul.f32 %v9695_v2, %v6173_v16  ;;  %v3769_v19 = vadd.f32 %v8578_v41, %v8871_v62 }
 0x2d2   : > { %v2228_v13 = vadd.f32 %v2180_v35, %v2125_v45  ;;  %v5526_v50 = vunpack.c.l.bf16 %v5617_v46  ;;  %v3709_v26 = vadd.f32 %v8578_v41, %v8880_v5  ;;  %v5478_v60 = vunpack.c.l.bf16 %v5605_v3  ;;  %v8952_v8 = vpop.f32.mrf.mxu1 }
 0x2d3   : > { %v2404_v42 = vsel %vm1657_vm0, %v2401_v14, %v2403_v55  ;;  %v9697_v12 = vrot.slane %v9696_v39, 1  ;;  %v2698_v16 = vsel %vm1952_vm1, %v2695_v33, %v2697_v7  ;;  %v9699_v62 = vrot.slane %v9698_v51, 2 }
 0x2d4   : > { %v2521_v31 = vadd.f32 %v2404_v42, %v2227_v52  ;;  %v3094_v10 = vrot.slane %v2970_v59, 1  ;;  %v3388_v47 = vrot.slane %v3264_v4, 2  ;;  %v3836_v6 = vmax.f32 %v3769_v19, 0.0 }
 0x2d5   : > { %v2406_v18 = vsel %vm1657_vm0, %v2403_v55, %v9697_v12  ;;  %v2700_v1 = vsel %vm1952_vm1, %v2697_v7, %v9699_v62  ;;  %v3986_v14 = vmul.f32 %v8585_v11, %v5526_v50  ;;  %v3812_v36 = vmax.f32 %v3709_v26, 0.0  ;;  %v8976_v7 = vld [vmem:[%s5854_s22 + $0xa0] sm:$0xff]  }
 0x2d6   : > { %v2522_v5 = vadd.f32 %v2406_v18, %v2228_v13  ;;  %v3962_v40 = vmul.f32 %v8585_v11, %v5478_v60  ;;  %v2815_v23 = vadd.f32 %v2698_v16, %v2521_v31  ;;  %v3095_v33 = vsel %vm1657_vm0, %v3092_v63, %v3094_v10 }
 0x2d7   : > { %v9701_v17 = vrot.slane %v9700_v20, 1  ;;  %v3389_v49 = vsel %vm1952_vm1, %v3386_v29, %v3388_v47  ;;  %v9703_v43 = vrot.slane %v9702_v0, 2  ;;  %v4118_v22 = vrot.slane %v3836_v6, 7 }
 0x2d8   : > { %v2816_v38 = vadd.f32 %v2700_v1, %v2522_v5  ;;  %v4070_v54 = vrot.slane %v3812_v36, 7  ;;  %v2918_v45 = vadd.f32 %v2870_v32, %v2815_v23  ;;  %v3772_v56 = vadd.f32 %v8578_v41, %v8901_v48  ;;  %v3776_v32 = vpop.f32.mrf.mxu3 }
 0x2d9   : > { %v3097_v44 = vsel %vm1657_vm0, %v3094_v10, %v9701_v17  ;;  %v3391_v34 = vsel %vm1952_vm1, %v3388_v47, %v9703_v43  ;;  %v5527_v63 = vunpack.c.h.bf16 %v5617_v46  ;;  %v4119_v53 = vsel %vm4048_vm2, %v8864_v25, %v4118_v22 }
 0x2da   : > { %v2919_v35 = vadd.f32 %v2871_v58, %v2816_v38  ;;  %v4071_v61 = vsel %vm4048_vm2, %v8866_v28, %v4070_v54  ;;  %v3712_v29 = vadd.f32 %v8578_v41, %v3711_v9  ;;  %v5479_v27 = vunpack.c.h.bf16 %v5605_v3  ;;  %v8980_v50 = vpop.f32.mrf.mxu1 }
 0x2db   : > { %v3212_v52 = vadd.f32 %v3095_v33, %v2918_v45  ;;  %v4228_v2 = vadd.f32 %v4119_v53, %v3986_v14  ;;  %v4204_v55 = vadd.f32 %v4071_v61, %v3962_v40  ;;  %v3837_v58 = vmax.f32 %v3772_v56, 0.0 }
 0x2dc   : > { %v3213_v13 = vadd.f32 %v3097_v44, %v2919_v35  ;;  %v3987_v48 = vmul.f32 %v8585_v11, %v5527_v63  ;;  %v3813_v46 = vmax.f32 %v3712_v29, 0.0  ;;  %v3963_v59 = vmul.f32 %v8585_v11, %v5479_v27 }
 0x2dd   : > { %v3506_v25 = vadd.f32 %v3389_v49, %v3212_v52  ;;  %v4277_v19 = vpack.c.bf16 %v4228_v2, %v4228_v2  ;;  %v4253_v28 = vpack.c.bf16 %v4204_v55, %v4204_v55  ;;  %v4120_v9 = vrot.slane %v3837_v58, 7 }
 0x2de   : > { %v3507_v4 = vadd.f32 %v3391_v34, %v3213_v13  ;;  %v8982_v3 = vrot.slane %v3813_v46, 7  ;;  %v3774_v26 = vadd.f32 %v8578_v41, %v3773_v57  ;;  %v5530_v60 = vunpack.c.l.bf16 %v8976_v7 }
 0x2df   : > { %v3558_v42 = vadd.f32 %v8726_v24, %v3506_v25  ;;  %v4644_v12 = vshll.u32 %v4277_v19, 16  ;;  %v4648_v18 = vshrl.u32 %v4277_v19, 16  ;;  %v4404_v16 = vshll.u32 %v4253_v28, 16 }
 0x2e0   : > { %v3559_v39 = vadd.f32 %v8726_v24, %v3507_v4  ;;  %v4408_v51 = vshrl.u32 %v4253_v28, 16  ;;  %v4121_v62 = vsel %vm4048_vm2, %v4118_v22, %v4120_v9  ;;  %v4073_v1 = vsel %vm4048_vm2, %v4070_v54, %v8982_v3  ;;  %v3778_v33 = vpop.f32.mrf.mxu3  ;;  %v5606_v22 = vld [vmem:[%s5854_s22 + $0x40] sm:$0xff]  }
 0x2e1   : > { %v4646_v5 = vrot.slane %v4644_v12, 5  ;;  %v4650_v10 = vrot.slane %v4648_v18, 4  ;;  %v4229_v57 = vadd.f32 %v4121_v62, %v3987_v48  ;;  %v4406_v47 = vrot.slane %v4404_v16, 5 }
 0x2e2   : > { %v3593_v31 = vpack.c.bf16 %v3559_v39, %v3558_v42  ;;  %v4410_v6 = vrot.slane %v4408_v51, 4  ;;  %v4205_v14 = vadd.f32 %v4073_v1, %v3963_v59  ;;  %v3838_v36 = vmax.f32 %v3774_v26, 0.0  ;;  %v3718_v54 = vpop.f32.mrf.mxu1 }
 0x2e3   : > { %v4647_v24 = vsel %vm8093_vm5, %v8917_v30, %v4646_v5  ;;  %v4651_v40 = vor.u32 %v4650_v10, %v4646_v5  ;;  %v4278_v23 = vpack.c.bf16 %v4229_v57, %v4229_v57  ;;  %v3988_v38 = vmul.f32 %v8585_v11, %v5530_v60  ;;  %v5619_v57 = vld [vmem:[%s5854_s22 + $0xa8] sm:$0xff]  }
 0x2e4   : > { %3745 = vmatmul.bf16.gmra.mxu1 %v3593_v31  ;;  %4860 = vst [vmem:[%s8110_s23 + $0x88] sm:$0xf] %v4647_v24  ;;  %v4407_v20 = vsel %vm8093_vm5, %v8919_v21, %v4406_v47  ;;  %v4411_v17 = vor.u32 %v4410_v6, %v4406_v47  ;;  %v4254_v44 = vpack.c.bf16 %v4205_v14, %v4205_v14  ;;  %v4122_v49 = vrot.slane %v3838_v36, 7 }
 0x2e5   : > { %v4652_v0 = vrot.slane %v4651_v40, 4  ;;  %4836 = vst [vmem:[%s8110_s23 + $0x28] sm:$0xf] %v4407_v20  ;;  %v4654_v43 = vshll.u32 %v4278_v23, 16  ;;  %v4658_v34 = vshrl.u32 %v4278_v23, 16  ;;  %v3714_v30 = vadd.f32 %v8578_v41, %v8952_v8  ;;  %v9028_v23 = vld [vmem:[%s5854_s22 + $0x48] sm:$0xff]  }
 0x2e6   : > { %v4412_v45 = vrot.slane %v4411_v17, 4  ;;  %v4414_v35 = vshll.u32 %v4254_v44, 16  ;;  %v4418_v56 = vshrl.u32 %v4254_v44, 16  ;;  %v4123_v63 = vsel %vm4048_vm2, %v4120_v9, %v4122_v49 }
 0x2e7   : > { %v4656_v53 = vrot.slane %v4654_v43, 5  ;;  %v4660_v21 = vrot.slane %v4658_v34, 4  ;;  %v4230_v61 = vadd.f32 %v4123_v63, %v3988_v38  ;;  %v3814_v29 = vmax.f32 %v3714_v30, 0.0 }
 0x2e8   : > { %v4416_v27 = vrot.slane %v4414_v35, 5  ;;  %v4420_v52 = vrot.slane %v4418_v56, 4  ;;  %v5482_v13 = vunpack.c.l.bf16 %v5606_v22  ;;  %v3777_v2 = vadd.f32 %v8578_v41, %v3776_v32  ;;  %v3781_v26 = vpop.f32.mrf.mxu3 }
 0x2e9   : > { %v4657_v8 = vsel %vm8093_vm5, %v4652_v0, %v4656_v53  ;;  %v4661_v55 = vor.u32 %v4660_v21, %v4656_v53  ;;  %v4279_v58 = vpack.c.bf16 %v4230_v61, %v4230_v61  ;;  %v4074_v48 = vrot.slane %v3814_v29, 7 }
 0x2ea   : > { %4861 = vst [vmem:[%s8110_s23 + $0x8c] sm:$0xf] %v4657_v8  ;;  %v4417_v46 = vsel %vm8093_vm5, %v4412_v45, %v4416_v27  ;;  %v4421_v59 = vor.u32 %v4420_v52, %v4416_v27  ;;  %v3964_v25 = vmul.f32 %v8585_v11, %v5482_v13  ;;  %v3839_v4 = vmax.f32 %v3777_v2, 0.0  ;;  %v9017_v1 = vpop.f32.mrf.mxu1 }
 0x2eb   : > { %v4662_v19 = vrot.slane %v4661_v55, 4  ;;  %4837 = vst [vmem:[%s8110_s23 + $0x2c] sm:$0xf] %v4417_v46  ;;  %v4664_v28 = vshll.u32 %v4279_v58, 16  ;;  %v4668_v9 = vshrl.u32 %v4279_v58, 16  ;;  %v4075_v32 = vsel %vm4048_vm2, %v8982_v3, %v4074_v48 }
 0x2ec   : > { %v4422_v60 = vrot.slane %v4421_v59, 4  ;;  %v4206_v42 = vadd.f32 %v4075_v32, %v3964_v25  ;;  %v5531_v39 = vunpack.c.h.bf16 %v8976_v7  ;;  %v4124_v12 = vrot.slane %v3839_v4, 7 }
 0x2ed   : > { %v4666_v18 = vrot.slane %v4664_v28, 5  ;;  %v4670_v16 = vrot.slane %v4668_v9, 4  ;;  %v3717_v51 = vadd.f32 %v8578_v41, %v8980_v50  ;;  %v5483_v62 = vunpack.c.h.bf16 %v5606_v22 }
 0x2ee   : > { %v4255_v31 = vpack.c.bf16 %v4206_v42, %v4206_v42  ;;  %v3989_v5 = vmul.f32 %v8585_v11, %v5531_v39  ;;  %v4125_v3 = vsel %vm4048_vm2, %v4122_v49, %v4124_v12  ;;  %v3779_v10 = vadd.f32 %v8578_v41, %v3778_v33 }
 0x2ef   : > { %v4667_v7 = vsel %vm8093_vm5, %v4662_v19, %v4666_v18  ;;  %v4671_v47 = vor.u32 %v4670_v16, %v4666_v18  ;;  %v3815_v6 = vmax.f32 %v3717_v51, 0.0  ;;  %v3965_v14 = vmul.f32 %v8585_v11, %v5483_v62 }
 0x2f0   : > { %4862 = vst [vmem:[%s8110_s23 + $0x90] sm:$0xf] %v4667_v7  ;;  %v4424_v50 = vshll.u32 %v4255_v31, 16  ;;  %v4428_v36 = vshrl.u32 %v4255_v31, 16  ;;  %v4231_v24 = vadd.f32 %v4125_v3, %v3989_v5  ;;  %v3840_v40 = vmax.f32 %v3779_v10, 0.0  ;;  %v3783_v35 = vpop.f32.mrf.mxu3 }
 0x2f1   : > { %v4672_v38 = vrot.slane %v4671_v47, 4  ;;  %v4076_v20 = vrot.slane %v3815_v6, 7  ;;  %v5534_v17 = vunpack.c.l.bf16 %v5619_v57  ;;  %v3719_v33 = vadd.f32 %v8578_v41, %v3718_v54 }
 0x2f2   : > { %v4426_v44 = vrot.slane %v4424_v50, 5  ;;  %v4430_v49 = vrot.slane %v4428_v36, 4  ;;  %v4280_v0 = vpack.c.bf16 %v4231_v24, %v4231_v24  ;;  %v4126_v43 = vrot.slane %v3840_v40, 7  ;;  %v3723_v27 = vpop.f32.mrf.mxu1  ;;  %v5620_v36 = vld [vmem:[%s5854_s22 + $0xb0] sm:$0xff]  }
 0x2f3   : > { %v4077_v34 = vsel %vm4048_vm2, %v4074_v48, %v4076_v20  ;;  %v3990_v30 = vmul.f32 %v8585_v11, %v5534_v17  ;;  %v3816_v22 = vmax.f32 %v3719_v33, 0.0  ;;  %v5486_v45 = vunpack.c.l.bf16 %v9028_v23  ;;  %v9043_v48 = vld [vmem:[%s9244_s7] ss:$0 sm:$0xff] }
 0x2f4   : > { %v4427_v56 = vsel %vm8093_vm5, %v4422_v60, %v4426_v44  ;;  %v4431_v63 = vor.u32 %v4430_v49, %v4426_v44  ;;  %v4674_v53 = vshll.u32 %v4280_v0, 16  ;;  %v4678_v21 = vshrl.u32 %v4280_v0, 16  ;;  %v9052_v60 = vld [vmem:[%s9245_s8] ss:$0 sm:$0xff] }
 0x2f5   : > { %4838 = vst [vmem:[%s8110_s23 + $0x30] sm:$0xf] %v4427_v56  ;;  %v4207_v41 = vadd.f32 %v4077_v34, %v3965_v14  ;;  %v4127_v54 = vsel %vm4048_vm2, %v4124_v12, %v4126_v43  ;;  %v3966_v61 = vmul.f32 %v8585_v11, %v5486_v45  ;;  %v4078_v29 = vrot.slane %v3816_v22, 7  ;;  %v5608_v22 = vld [vmem:[%s5854_s22 + $0x50] sm:$0xff]  }
 0x2f6   : > { %v4432_v52 = vrot.slane %v4431_v63, 4  ;;  %v4676_v13 = vrot.slane %v4674_v53, 5  ;;  %v4680_v2 = vrot.slane %v4678_v21, 4  ;;  %v4232_v8 = vadd.f32 %v4127_v54, %v3990_v30 }
 0x2f7   : > { %v4256_v55 = vpack.c.bf16 %v4207_v41, %v4207_v41  ;;  %v4079_v58 = vsel %vm4048_vm2, %v4076_v20, %v4078_v29  ;;  %v3782_v46 = vadd.f32 %v9043_v48, %v3781_v26  ;;  %v5535_v59 = vunpack.c.h.bf16 %v5619_v57 }
 0x2f8   : > { %v4677_v11 = vsel %vm8093_vm5, %v4672_v38, %v4676_v13  ;;  %v4681_v25 = vor.u32 %v4680_v2, %v4676_v13  ;;  %v4281_v4 = vpack.c.bf16 %v4232_v8, %v4232_v8  ;;  %v4208_v19 = vadd.f32 %v4079_v58, %v3966_v61  ;;  %v3786_v5 = vpop.f32.mrf.mxu3 }
 0x2f9   : > { %4863 = vst [vmem:[%s8110_s23 + $0x94] sm:$0xf] %v4677_v11  ;;  %v4434_v28 = vshll.u32 %v4256_v55, 16  ;;  %v4438_v9 = vshrl.u32 %v4256_v55, 16  ;;  %v3841_v32 = vmax.f32 %v3782_v46, 0.0  ;;  %v3991_v42 = vmul.f32 %v9052_v60, %v5535_v59 }
 0x2fa   : > { %v4682_v39 = vrot.slane %v4681_v25, 4  ;;  %v4684_v26 = vshll.u32 %v4281_v4, 16  ;;  %v4688_v12 = vshrl.u32 %v4281_v4, 16  ;;  %v4257_v18 = vpack.c.bf16 %v4208_v19, %v4208_v19  ;;  %v3726_v24 = vpop.f32.mrf.mxu1 }
 0x2fb   : > { %v4436_v16 = vrot.slane %v4434_v28, 5  ;;  %v4440_v51 = vrot.slane %v4438_v9, 4  ;;  %v4128_v62 = vrot.slane %v3841_v32, 7  ;;  %v3722_v31 = vadd.f32 %v9043_v48, %v9017_v1 }
 0x2fc   : > { %v4686_v3 = vrot.slane %v4684_v26, 5  ;;  %v4690_v10 = vrot.slane %v4688_v12, 4  ;;  %v4444_v57 = vshll.u32 %v4257_v18, 16  ;;  %v4448_v7 = vshrl.u32 %v4257_v18, 16 }
 0x2fd   : > { %v4437_v47 = vsel %vm8093_vm5, %v4432_v52, %v4436_v16  ;;  %v4441_v6 = vor.u32 %v4440_v51, %v4436_v16  ;;  %v4129_v14 = vsel %vm4048_vm2, %v4126_v43, %v4128_v62  ;;  %v3817_v50 = vmax.f32 %v3722_v31, 0.0 }
 0x2fe   : > { %4839 = vst [vmem:[%s8110_s23 + $0x34] sm:$0xf] %v4437_v47  ;;  %v4687_v1 = vsel %vm8093_vm5, %v4682_v39, %v4686_v3  ;;  %v4691_v40 = vor.u32 %v4690_v10, %v4686_v3  ;;  %v4446_v38 = vrot.slane %v4444_v57, 5  ;;  %v4450_v20 = vrot.slane %v4448_v7, 4 }
 0x2ff   : > { %v4442_v17 = vrot.slane %v4441_v6, 4  ;;  %4864 = vst [vmem:[%s8110_s23 + $0x98] sm:$0xf] %v4687_v1  ;;  %v4233_v33 = vadd.f32 %v4129_v14, %v3991_v42  ;;  %v5487_v44 = vunpack.c.h.bf16 %v9028_v23  ;;  %v4080_v49 = vrot.slane %v3817_v50, 7 }
 0x300   : > { %v4692_v0 = vrot.slane %v4691_v40, 4  ;;  %v4451_v43 = vor.u32 %v4450_v20, %v4446_v38  ;;  %v3784_v34 = vadd.f32 %v9043_v48, %v3783_v35  ;;  %v5538_v30 = vunpack.c.l.bf16 %v5620_v36  ;;  %v3788_v2 = vpop.f32.mrf.mxu3 }
 0x301   : > { %v4447_v45 = vsel %vm8093_vm5, %v4442_v17, %v4446_v38  ;;  %v4282_v56 = vpack.c.bf16 %v4233_v33, %v4233_v33  ;;  %v3967_v63 = vmul.f32 %v9052_v60, %v5487_v44  ;;  %v4081_v53 = vsel %vm4048_vm2, %v4078_v29, %v4080_v49 }
 0x302   : > { %v4452_v21 = vrot.slane %v4451_v43, 4  ;;  %4840 = vst [vmem:[%s8110_s23 + $0x38] sm:$0xf] %v4447_v45  ;;  %v3842_v41 = vmax.f32 %v3784_v34, 0.0  ;;  %v3992_v23 = vmul.f32 %v9052_v60, %v5538_v30  ;;  %v3724_v54 = vadd.f32 %v9043_v48, %v3723_v27  ;;  %v9077_v4 = vpop.f32.mrf.mxu1 }
 0x303   : > { %v4694_v61 = vshll.u32 %v4282_v56, 16  ;;  %v4698_v52 = vshrl.u32 %v4282_v56, 16  ;;  %v4209_v35 = vadd.f32 %v4081_v53, %v3967_v63  ;;  %v5490_v13 = vunpack.c.l.bf16 %v5608_v22  ;;  %v5621_v53 = vld [vmem:[%s5854_s22 + $0xb8] sm:$0xff]  }
 0x304   : > { %v4130_v8 = vrot.slane %v3842_v41, 7  ;;  %v3818_v55 = vmax.f32 %v3724_v54, 0.0  ;;  %v3787_v58 = vadd.f32 %v9043_v48, %v3786_v5  ;;  %v5539_v46 = vunpack.c.h.bf16 %v5620_v36 }
 0x305   : > { %v4696_v59 = vrot.slane %v4694_v61, 5  ;;  %v4700_v29 = vrot.slane %v4698_v52, 4  ;;  %v4258_v11 = vpack.c.bf16 %v4209_v35, %v4209_v35  ;;  %v3968_v25 = vmul.f32 %v9052_v60, %v5490_v13  ;;  %v5609_v52 = vld [vmem:[%s5854_s22 + $0x58] sm:$0xff]  }
 0x306   : > { %v4131_v27 = vsel %vm4048_vm2, %v4128_v62, %v4130_v8  ;;  %v4082_v19 = vrot.slane %v3818_v55, 7  ;;  %v3843_v28 = vmax.f32 %v3787_v58, 0.0  ;;  %v3993_v9 = vmul.f32 %v9052_v60, %v5539_v46 }
 0x307   : > { %v4697_v32 = vsel %vm8093_vm5, %v4692_v0, %v4696_v59  ;;  %v4701_v42 = vor.u32 %v4700_v29, %v4696_v59  ;;  %v4454_v39 = vshll.u32 %v4258_v11, 16  ;;  %v4458_v26 = vshrl.u32 %v4258_v11, 16 }
 0x308   : > { %4865 = vst [vmem:[%s8110_s23 + $0x9c] sm:$0xf] %v4697_v32  ;;  %v4234_v12 = vadd.f32 %v4131_v27, %v3992_v23  ;;  %v4083_v18 = vsel %vm4048_vm2, %v4080_v49, %v4082_v19  ;;  %v4132_v16 = vrot.slane %v3843_v28, 7  ;;  %v3727_v51 = vadd.f32 %v9043_v48, %v3726_v24  ;;  %v3791_v20 = vpop.f32.mrf.mxu3 }
 0x309   : > { %v4702_v31 = vrot.slane %v4701_v42, 4  ;;  %v4456_v62 = vrot.slane %v4454_v39, 5  ;;  %v4460_v5 = vrot.slane %v4458_v26, 4  ;;  %v4210_v3 = vadd.f32 %v4083_v18, %v3968_v25 }
 0x30a   : > { %v4283_v10 = vpack.c.bf16 %v4234_v12, %v4234_v12  ;;  %v4133_v57 = vsel %vm4048_vm2, %v4130_v8, %v4132_v16  ;;  %v3819_v7 = vmax.f32 %v3727_v51, 0.0  ;;  %v5491_v47 = vunpack.c.h.bf16 %v5608_v22 }
 0x30b   : > { %v4457_v6 = vsel %vm8093_vm5, %v4452_v21, %v4456_v62  ;;  %v4461_v14 = vor.u32 %v4460_v5, %v4456_v62  ;;  %v4259_v50 = vpack.c.bf16 %v4210_v3, %v4210_v3  ;;  %v4235_v36 = vadd.f32 %v4133_v57, %v3993_v9  ;;  %v3731_v21 = vpop.f32.mrf.mxu1 }
 0x30c   : > { %4841 = vst [vmem:[%s8110_s23 + $0x3c] sm:$0xf] %v4457_v6  ;;  %v4704_v1 = vshll.u32 %v4283_v10, 16  ;;  %v4708_v40 = vshrl.u32 %v4283_v10, 16  ;;  %v3969_v24 = vmul.f32 %v9052_v60, %v5491_v47  ;;  %v4084_v38 = vrot.slane %v3819_v7, 7 }
 0x30d   : > { %v4462_v17 = vrot.slane %v4461_v14, 4  ;;  %v4464_v33 = vshll.u32 %v4259_v50, 16  ;;  %v4468_v44 = vshrl.u32 %v4259_v50, 16  ;;  %v4284_v49 = vpack.c.bf16 %v4235_v36, %v4235_v36  ;;  %v9114_v14 = vld [vmem:[%s5854_s22 + $0xc0] sm:$0xff]  }
 0x30e   : > { %v4706_v0 = vrot.slane %v4704_v1, 5  ;;  %v4710_v43 = vrot.slane %v4708_v40, 4  ;;  %v4085_v34 = vsel %vm4048_vm2, %v4082_v19, %v4084_v38  ;;  %v3789_v30 = vadd.f32 %v9043_v48, %v3788_v2 }
 0x30f   : > { %v4466_v22 = vrot.slane %v4464_v33, 5  ;;  %v4470_v45 = vrot.slane %v4468_v44, 4  ;;  %v4714_v56 = vshll.u32 %v4284_v49, 16  ;;  %v4718_v63 = vshrl.u32 %v4284_v49, 16 }
 0x310   : > { %v4707_v41 = vsel %vm8093_vm5, %v4702_v31, %v4706_v0  ;;  %v4711_v23 = vor.u32 %v4710_v43, %v4706_v0  ;;  %v4211_v54 = vadd.f32 %v4085_v34, %v3969_v24  ;;  %v3844_v61 = vmax.f32 %v3789_v30, 0.0  ;;  %v3793_v62 = vpop.f32.mrf.mxu3 }
 0x311   : > { %4866 = vst [vmem:[%s8110_s23 + $0xa0] sm:$0xf] %v4707_v41  ;;  %v4467_v35 = vsel %vm8093_vm5, %v4462_v17, %v4466_v22  ;;  %v4471_v13 = vor.u32 %v4470_v45, %v4466_v22  ;;  %v4716_v2 = vrot.slane %v4714_v56, 5  ;;  %v4720_v8 = vrot.slane %v4718_v63, 4  ;;  %v9127_v41 = vld [vmem:[%s5854_s22 + $0x60] sm:$0xff]  }
 0x312   : > { %v4712_v55 = vrot.slane %v4711_v23, 4  ;;  %4842 = vst [vmem:[%s8110_s23 + $0x40] sm:$0xf] %v4467_v35  ;;  %v4260_v58 = vpack.c.bf16 %v4211_v54, %v4211_v54  ;;  %v5542_v46 = vunpack.c.l.bf16 %v5621_v53  ;;  %v4134_v59 = vrot.slane %v3844_v61, 7 }
 0x313   : > { %v4472_v29 = vrot.slane %v4471_v13, 4  ;;  %v4721_v11 = vor.u32 %v4720_v8, %v4716_v2  ;;  %v3729_v25 = vadd.f32 %v9043_v48, %v9077_v4  ;;  %v5494_v27 = vunpack.c.l.bf16 %v5609_v52  ;;  %v3733_v24 = vpop.f32.mrf.mxu1 }
 0x314   : > { %v4717_v19 = vsel %vm8093_vm5, %v4712_v55, %v4716_v2  ;;  %v4474_v28 = vshll.u32 %v4260_v58, 16  ;;  %v4478_v9 = vshrl.u32 %v4260_v58, 16  ;;  %v3994_v32 = vmul.f32 %v9052_v60, %v5542_v46 }
 0x315   : > { %v4722_v42 = vrot.slane %v4721_v11, 4  ;;  %4867 = vst [vmem:[%s8110_s23 + $0xa4] sm:$0xf] %v4717_v19  ;;  %v4135_v39 = vsel %vm4048_vm2, %v4132_v16, %v4134_v59  ;;  %v3820_v26 = vmax.f32 %v3729_v25, 0.0  ;;  %v3970_v12 = vmul.f32 %v9052_v60, %v5494_v27 }
 0x316   : > { %v4476_v18 = vrot.slane %v4474_v28, 5  ;;  %v4480_v51 = vrot.slane %v4478_v9, 4  ;;  %v4236_v4 = vadd.f32 %v4135_v39, %v3994_v32  ;;  %v3792_v31 = vadd.f32 %v9043_v48, %v3791_v20 }
 0x317   : > { %v4086_v5 = vrot.slane %v3820_v26, 7  ;;  %v5543_v3 = vunpack.c.h.bf16 %v5621_v53  ;;  %v3732_v10 = vadd.f32 %v9043_v48, %v3731_v21  ;;  %v5495_v57 = vunpack.c.h.bf16 %v5609_v52 }
 0x318   : > { %v4477_v7 = vsel %vm8093_vm5, %v4472_v29, %v4476_v18  ;;  %v4481_v16 = vor.u32 %v4480_v51, %v4476_v18  ;;  %v4285_v47 = vpack.c.bf16 %v4236_v4, %v4236_v4  ;;  %v3845_v6 = vmax.f32 %v3792_v31, 0.0  ;;  %v3796_v29 = vpop.f32.mrf.mxu3 }
 0x319   : > { %4843 = vst [vmem:[%s8110_s23 + $0x44] sm:$0xf] %v4477_v7  ;;  %v4087_v50 = vsel %vm4048_vm2, %v4084_v38, %v4086_v5  ;;  %v3995_v36 = vmul.f32 %v9052_v60, %v5543_v3  ;;  %v3821_v1 = vmax.f32 %v3732_v10, 0.0  ;;  %v3971_v40 = vmul.f32 %v9052_v60, %v5495_v57 }
 0x31a   : > { %v4482_v20 = vrot.slane %v4481_v16, 4  ;;  %v4724_v17 = vshll.u32 %v4285_v47, 16  ;;  %v4728_v33 = vshrl.u32 %v4285_v47, 16  ;;  %v4212_v44 = vadd.f32 %v4087_v50, %v3970_v12 }
 0x31b   : > { %v4136_v49 = vrot.slane %v3845_v6, 7  ;;  %v4088_v0 = vrot.slane %v3821_v1, 7  ;;  %v3794_v43 = vadd.f32 %v9043_v48, %v3793_v62  ;;  %v5546_v34 = vunpack.c.l.bf16 %v9114_v14 }
 0x31c   : > { %v4726_v30 = vrot.slane %v4724_v17, 5  ;;  %v4730_v38 = vrot.slane %v4728_v33, 4  ;;  %v4261_v22 = vpack.c.bf16 %v4212_v44, %v4212_v44  ;;  %v3734_v45 = vadd.f32 %v9043_v48, %v3733_v24 }
 0x31d   : > { %v4137_v56 = vsel %vm4048_vm2, %v4134_v59, %v4136_v49  ;;  %v4089_v63 = vsel %vm4048_vm2, %v4086_v5, %v4088_v0  ;;  %v3846_v53 = vmax.f32 %v3794_v43, 0.0  ;;  %v3996_v21 = vmul.f32 %v9052_v60, %v5546_v34 }
 0x31e   : > { %v4727_v23 = vsel %vm8093_vm5, %v4722_v42, %v4726_v30  ;;  %v4731_v54 = vor.u32 %v4730_v38, %v4726_v30  ;;  %v4484_v61 = vshll.u32 %v4261_v22, 16  ;;  %v4488_v52 = vshrl.u32 %v4261_v22, 16 }
 0x31f   : > { %4868 = vst [vmem:[%s8110_s23 + $0xa8] sm:$0xf] %v4727_v23  ;;  %v4237_v35 = vadd.f32 %v4137_v56, %v3995_v36  ;;  %v4213_v13 = vadd.f32 %v4089_v63, %v3971_v40  ;;  %v4138_v2 = vrot.slane %v3846_v53, 7  ;;  %v3822_v8 = vmax.f32 %v3734_v45, 0.0  ;;  %v3896_v56 = vld [vmem:[%s5854_s22 + $0xc8] sm:$0xf] }
 0x320   : > { %v4732_v55 = vrot.slane %v4731_v54, 4  ;;  %v4486_v58 = vrot.slane %v4484_v61, 5  ;;  %v4490_v46 = vrot.slane %v4488_v52, 4  ;;  %v5498_v59 = vunpack.c.l.bf16 %v9127_v41  ;;  %v3798_v45 = vpop.f32.mrf.mxu3  ;;  %v3897_v23 = vld [vmem:[%s5854_s22 + $0xcc] sm:$0x1] }
 0x321   : > { %v4286_v11 = vpack.c.bf16 %v4237_v35, %v4237_v35  ;;  %v4262_v25 = vpack.c.bf16 %v4213_v13, %v4213_v13  ;;  %v4139_v27 = vsel %vm4048_vm2, %v4136_v49, %v4138_v2  ;;  %v9134_v19 = vrot.slane %v3822_v8, 7 }
 0x322   : > { %v4487_v28 = vsel %vm8093_vm5, %v4482_v20, %v4486_v58  ;;  %v4491_v9 = vor.u32 %v4490_v46, %v4486_v58  ;;  %v4238_v32 = vadd.f32 %v4139_v27, %v3996_v21  ;;  %v3972_v42 = vmul.f32 %v9052_v60, %v5498_v59  ;;  %v3736_v5 = vpop.f32.mrf.mxu1 }
 0x323   : > { %4844 = vst [vmem:[%s8110_s23 + $0x48] sm:$0xf] %v4487_v28  ;;  %v4734_v39 = vshll.u32 %v4286_v11, 16  ;;  %v4738_v26 = vshrl.u32 %v4286_v11, 16  ;;  %v4494_v12 = vshll.u32 %v4262_v25, 16  ;;  %v4498_v18 = vshrl.u32 %v4262_v25, 16 }
 0x324   : > { %v4492_v51 = vrot.slane %v4491_v9, 4  ;;  %v4287_v4 = vpack.c.bf16 %v4238_v32, %v4238_v32  ;;  %v4091_v31 = vsel %vm4048_vm2, %v4088_v0, %v9134_v19  ;;  %v3797_v62 = vadd.f32 %v9043_v48, %v3796_v29 }
 0x325   : > { %v4736_v3 = vrot.slane %v4734_v39, 5  ;;  %v4740_v10 = vrot.slane %v4738_v26, 4  ;;  %v4496_v57 = vrot.slane %v4494_v12, 5  ;;  %v4500_v7 = vrot.slane %v4498_v18, 4 }
 0x326   : > { %v4744_v16 = vshll.u32 %v4287_v4, 16  ;;  %v4748_v47 = vshrl.u32 %v4287_v4, 16  ;;  %v4214_v6 = vadd.f32 %v4091_v31, %v3972_v42  ;;  %v3847_v50 = vmax.f32 %v3797_v62, 0.0 }
 0x327   : > { %v4737_v36 = vsel %vm8093_vm5, %v4732_v55, %v4736_v3  ;;  %v4741_v1 = vor.u32 %v4740_v10, %v4736_v3  ;;  %v4497_v40 = vsel %vm8093_vm5, %v4492_v51, %v4496_v57  ;;  %v4501_v24 = vor.u32 %v4500_v7, %v4496_v57 }
 0x328   : > { %4869 = vst [vmem:[%s8110_s23 + $0xac] sm:$0xf] %v4737_v36  ;;  %v4746_v20 = vrot.slane %v4744_v16, 5  ;;  %v4750_v17 = vrot.slane %v4748_v47, 4  ;;  %v4263_v33 = vpack.c.bf16 %v4214_v6, %v4214_v6  ;;  %v5547_v44 = vunpack.c.h.bf16 %v9114_v14 }
 0x329   : > { %v4742_v49 = vrot.slane %v4741_v1, 4  ;;  %4845 = vst [vmem:[%s8110_s23 + $0x4c] sm:$0xf] %v4497_v40  ;;  %v4140_v0 = vrot.slane %v3847_v50, 7  ;;  %v3737_v43 = vadd.f32 %v9043_v48, %v3736_v5  ;;  %v5499_v14 = vunpack.c.h.bf16 %v9127_v41  ;;  %v9164_v41 = vld [vmem:[%s5854_s22 + $0x68] sm:$0xff]  }
 0x32a   : > { %v4751_v34 = vor.u32 %v4750_v17, %v4746_v20  ;;  %v4504_v30 = vshll.u32 %v4263_v33, 16  ;;  %v4508_v38 = vshrl.u32 %v4263_v33, 16  ;;  %v3997_v22 = vmul.f32 %v9052_v60, %v5547_v44  ;;  %v3738_v35 = vpop.f32.mrf.mxu1 }
 0x32b   : > { %v4747_v63 = vsel %vm8093_vm5, %v4742_v49, %v4746_v20  ;;  %v4141_v53 = vsel %vm4048_vm2, %v4138_v2, %v4140_v0  ;;  %v3823_v21 = vmax.f32 %v3737_v43, 0.0  ;;  %v4502_v54 = vrot.slane %v4501_v24, 4 }
 0x32c   : > { %4870 = vst [vmem:[%s8110_s23 + $0xb0] sm:$0xf] %v4747_v63  ;;  %v4506_v61 = vrot.slane %v4504_v30, 5  ;;  %v4239_v52 = vadd.f32 %v4141_v53, %v3997_v22  ;;  %v3973_v13 = vmul.f32 %v9052_v60, %v5499_v14  ;;  %v3799_v55 = vadd.f32 %v9043_v48, %v3798_v45 }
 0x32d   : > { %v4092_v8 = vrot.slane %v3823_v21, 7  ;;  %v3946_v58 = vunpack.c.l.bf16 %v3896_v56  ;;  %v4510_v46 = vrot.slane %v4508_v38, 4  ;;  %v3947_v29 = vunpack.c.l.bf16 %v3897_v23 }
 0x32e   : > { %v4507_v2 = vsel %vm8093_vm5, %v4502_v54, %v4506_v61  ;;  %v4288_v59 = vpack.c.bf16 %v4239_v52, %v4239_v52  ;;  %v4752_v11 = vrot.slane %v4751_v34, 4  ;;  %v3848_v27 = vmax.f32 %v3799_v55, 0.0 }
 0x32f   : > { %4846 = vst [vmem:[%s8110_s23 + $0x50] sm:$0xf] %v4507_v2  ;;  %v4093_v25 = vsel %vm4048_vm2, %v9134_v19, %v4092_v8  ;;  %v3739_v28 = vadd.f32 %v9043_v48, %v3738_v35  ;;  %v3998_v39 = vmul.f32 %v9052_v60, %v3946_v58  ;;  %v3999_v26 = vmul.f32 %v9052_v60, %v3947_v29 }
 0x330   : > { %v4754_v9 = vshll.u32 %v4288_v59, 16  ;;  %v4758_v32 = vshrl.u32 %v4288_v59, 16  ;;  %v4215_v42 = vadd.f32 %v4093_v25, %v3973_v13  ;;  %v4142_v12 = vrot.slane %v3848_v27, 7  ;;  %v5612_v59 = vld [vmem:[%s5854_s22 + $0x70] sm:$0xff]  }
 0x331   : > { %v3824_v18 = vmax.f32 %v3739_v28, 0.0  ;;  %v5502_v51 = vunpack.c.l.bf16 %v9164_v41  ;;  %v4511_v4 = vor.u32 %v4510_v46, %v4506_v61  ;;  %v5503_v13 = vunpack.c.h.bf16 %v9164_v41 }
 0x332   : > { %v4756_v31 = vrot.slane %v4754_v9, 5  ;;  %v4760_v62 = vrot.slane %v4758_v32, 4  ;;  %v4264_v5 = vpack.c.bf16 %v4215_v42, %v4215_v42  ;;  %v4143_v19 = vsel %vm4048_vm2, %v4140_v0, %v4142_v12 }
 0x333   : > { %v4241_v3 = vadd.f32 %v4142_v12, %v3999_v26  ;;  %v3974_v10 = vmul.f32 %v9052_v60, %v5502_v51  ;;  %v4094_v57 = vrot.slane %v3824_v18, 7  ;;  %v4240_v6 = vadd.f32 %v4143_v19, %v3998_v39 }
 0x334   : > { %v4757_v7 = vsel %vm8093_vm5, %v4752_v11, %v4756_v31  ;;  %v4514_v16 = vshll.u32 %v4264_v5, 16  ;;  %v4518_v47 = vshrl.u32 %v4264_v5, 16  ;;  %v4512_v36 = vrot.slane %v4511_v4, 4 }
 0x335   : > { %4871 = vst [vmem:[%s8110_s23 + $0xb4] sm:$0xf] %v4757_v7  ;;  %v4095_v50 = vsel %vm4048_vm2, %v4092_v8, %v4094_v57  ;;  %v4761_v20 = vor.u32 %v4760_v62, %v4756_v31  ;;  %v4289_v17 = vpack.c.bf16 %v4240_v6, %v4240_v6  ;;  %v4290_v33 = vpack.c.bf16 %v4241_v3, %v4241_v3 }
 0x336   : > { %v4516_v1 = vrot.slane %v4514_v16, 5  ;;  %v4520_v40 = vrot.slane %v4518_v47, 4  ;;  %v4216_v24 = vadd.f32 %v4095_v50, %v3974_v10  ;;  %v3975_v2 = vmul.f32 %v9052_v60, %v5503_v13 }
 0x337   : > { %v4764_v43 = vshll.u32 %v4289_v17, 16  ;;  %v4768_v34 = vshrl.u32 %v4289_v17, 16  ;;  %v4762_v38 = vrot.slane %v4761_v20, 4  ;;  %v4774_v56 = vshll.u32 %v4290_v33, 16  ;;  %v5613_v17 = vld [vmem:[%s5854_s22 + $0x78] sm:$0xff]  }
 0x338   : > { %v4517_v44 = vsel %vm8093_vm5, %v4512_v36, %v4516_v1  ;;  %v4521_v49 = vor.u32 %v4520_v40, %v4516_v1  ;;  %v4265_v0 = vpack.c.bf16 %v4216_v24, %v4216_v24  ;;  %v5506_v28 = vunpack.c.l.bf16 %v5612_v59 }
 0x339   : > { %4847 = vst [vmem:[%s8110_s23 + $0x54] sm:$0xf] %v4517_v44  ;;  %v4766_v22 = vrot.slane %v4764_v43, 5  ;;  %v4770_v45 = vrot.slane %v4768_v34, 4  ;;  %v4776_v61 = vrot.slane %v4774_v56, 5  ;;  %v5507_v50 = vunpack.c.h.bf16 %v5612_v59 }
 0x33a   : > { %v4524_v30 = vshll.u32 %v4265_v0, 16  ;;  %v4522_v63 = vrot.slane %v4521_v49, 4  ;;  %v4528_v55 = vshrl.u32 %v4265_v0, 16  ;;  %v3976_v12 = vmul.f32 %v9052_v60, %v5506_v28 }
 0x33b   : > { %v4767_v21 = vsel %vm8093_vm5, %v4762_v38, %v4766_v22  ;;  %v4771_v14 = vor.u32 %v4770_v45, %v4766_v22  ;;  %v3977_v24 = vmul.f32 %v9052_v60, %v5507_v50  ;;  %v5510_v43 = vunpack.c.l.bf16 %v5613_v17 }
 0x33c   : > { %v4526_v53 = vrot.slane %v4524_v30, 5  ;;  %4872 = vst [vmem:[%s8110_s23 + $0xb8] sm:$0xf] %v4767_v21  ;;  %v4530_v29 = vrot.slane %v4528_v55, 4  ;;  %v5511_v34 = vunpack.c.h.bf16 %v5613_v17 }
 0x33d   : > { %v4772_v54 = vrot.slane %v4771_v14, 4 }
 0x33e   : > { %v4527_v23 = vsel %vm8093_vm5, %v4522_v63, %v4526_v53  ;;  %v4531_v32 = vor.u32 %v4530_v29, %v4526_v53  ;;  %v3978_v53 = vmul.f32 %v9052_v60, %v5510_v43  ;;  %v3979_v21 = vmul.f32 %v9052_v60, %v5511_v34 }
 0x33f   : > { %4848 = vst [vmem:[%s8110_s23 + $0x58] sm:$0xf] %v4527_v23  ;;  %v4777_v52 = vsel %vm8093_vm5, %v4772_v54, %v4776_v61 }
 0x340   : > { %4873 = vst [vmem:[%s8110_s23 + $0xbc] sm:$0xf] %v4777_v52  ;;  %v4532_v51 = vrot.slane %v4531_v32, 4 }
 0x342   : > { %v3741_v35 = vpop.f32.mrf.mxu1 }
 0x343   : > { %v3742_v8 = vadd.f32 %v9043_v48, %v3741_v35  ;;  %v9704_v35 = vld [vmem:[#allocation36_spill] sm:$0xff] }
 0x345   : > { %v3825_v58 = vmax.f32 %v3742_v8, 0.0 }
 0x347   : > { %v4096_v46 = vrot.slane %v3825_v58, 7 }
 0x349   : > { %v4097_v11 = vsel %vm4048_vm2, %v4094_v57, %v4096_v46 }
 0x34a   : > { %v4217_v25 = vadd.f32 %v4097_v11, %v3975_v2  ;;  %v3743_v27 = vpop.f32.mrf.mxu1 }
 0x34b   : > { %v3744_v9 = vadd.f32 %v9043_v48, %v3743_v27 }
 0x34c   : > { %v4266_v42 = vpack.c.bf16 %v4217_v25, %v4217_v25 }
 0x34d   : > { %v3826_v41 = vmax.f32 %v3744_v9, 0.0 }
 0x34e   : > { %v4534_v39 = vshll.u32 %v4266_v42, 16  ;;  %v4538_v26 = vshrl.u32 %v4266_v42, 16 }
 0x34f   : > { %v4098_v18 = vrot.slane %v3826_v41, 7 }
 0x350   : > { %v4536_v4 = vrot.slane %v4534_v39, 5  ;;  %v4540_v31 = vrot.slane %v4538_v26, 4 }
 0x351   : > { %v4099_v62 = vsel %vm4048_vm2, %v4096_v46, %v4098_v18 }
 0x352   : > { %v4537_v5 = vsel %vm8093_vm5, %v4532_v51, %v4536_v4  ;;  %v4218_v19 = vadd.f32 %v4099_v62, %v3976_v12  ;;  %v4541_v3 = vor.u32 %v4540_v31, %v4536_v4 }
 0x353   : > { %4849 = vst [vmem:[%s8110_s23 + $0x5c] sm:$0xf] %v4537_v5 }
 0x354   : > { %v4267_v10 = vpack.c.bf16 %v4218_v19, %v4218_v19  ;;  %v4542_v7 = vrot.slane %v4541_v3, 4 }
 0x356   : > { %v4544_v57 = vshll.u32 %v4267_v10, 16  ;;  %v4548_v1 = vshrl.u32 %v4267_v10, 16 }
 0x358   : > { %v4546_v16 = vrot.slane %v4544_v57, 5  ;;  %v4550_v33 = vrot.slane %v4548_v1, 4 }
 0x35a   : > { %v4547_v47 = vsel %vm8093_vm5, %v4542_v7, %v4546_v16  ;;  %v4551_v38 = vor.u32 %v4550_v33, %v4546_v16 }
 0x35b   : > { %4850 = vst [vmem:[%s8110_s23 + $0x60] sm:$0xf] %v4547_v47 }
 0x35c   : > { %v4552_v23 = vrot.slane %v4551_v38, 4 }
 0x361   : > { %v3746_v6 = vpop.f32.mrf.mxu1 }
 0x362   : > { %v3747_v36 = vadd.f32 %v9043_v48, %v3746_v6 }
 0x364   : > { %v3827_v40 = vmax.f32 %v3747_v36, 0.0 }
 0x366   : > { %v4100_v20 = vrot.slane %v3827_v40, 7 }
 0x368   : > { %v4101_v44 = vsel %vm4048_vm2, %v4098_v18, %v4100_v20 }
 0x369   : > { %v4219_v49 = vadd.f32 %v4101_v44, %v3977_v24  ;;  %v3748_v0 = vpop.f32.mrf.mxu1 }
 0x36a   : > { %v3749_v30 = vadd.f32 %v9043_v48, %v3748_v0 }
 0x36b   : > { %v4268_v22 = vpack.c.bf16 %v4219_v49, %v4219_v49 }
 0x36c   : > { %v3828_v45 = vmax.f32 %v3749_v30, 0.0 }
 0x36d   : > { %v4554_v56 = vshll.u32 %v4268_v22, 16  ;;  %v4558_v63 = vshrl.u32 %v4268_v22, 16 }
 0x36e   : > { %v4102_v14 = vrot.slane %v3828_v45, 7 }
 0x36f   : > { %v4556_v54 = vrot.slane %v4554_v56, 5  ;;  %v4560_v61 = vrot.slane %v4558_v63, 4 }
 0x370   : > { %v4103_v52 = vsel %vm4048_vm2, %v4100_v20, %v4102_v14  ;;  %v4105_v13 = vsel %vm4048_vm2, %v4102_v14, %v9704_v35 }
 0x371   : > { %v4557_v48 = vsel %vm8093_vm5, %v4552_v23, %v4556_v54  ;;  %v4220_v8 = vadd.f32 %v4103_v52, %v3978_v53  ;;  %v4221_v55 = vadd.f32 %v4105_v13, %v3979_v21  ;;  %v4561_v58 = vor.u32 %v4560_v61, %v4556_v54 }
 0x372   : > { %4851 = vst [vmem:[%s8110_s23 + $0x64] sm:$0xf] %v4557_v48 }
 0x373   : > { %v4269_v2 = vpack.c.bf16 %v4220_v8, %v4220_v8  ;;  %v4270_v46 = vpack.c.bf16 %v4221_v55, %v4221_v55  ;;  %v4562_v25 = vrot.slane %v4561_v58, 4 }
 0x375   : > { %v4564_v60 = vshll.u32 %v4269_v2, 16  ;;  %v4568_v59 = vshrl.u32 %v4269_v2, 16  ;;  %v4574_v29 = vshll.u32 %v4270_v46, 16  ;;  %v4578_v11 = vshrl.u32 %v4270_v46, 16 }
 0x377   : > { %v4566_v27 = vrot.slane %v4564_v60, 5  ;;  %v4570_v28 = vrot.slane %v4568_v59, 4  ;;  %v4576_v9 = vrot.slane %v4574_v29, 5  ;;  %v4580_v32 = vrot.slane %v4578_v11, 4 }
 0x379   : > { %v4567_v42 = vsel %vm8093_vm5, %v4562_v25, %v4566_v27  ;;  %v4571_v41 = vor.u32 %v4570_v28, %v4566_v27  ;;  %v4581_v39 = vor.u32 %v4580_v32, %v4576_v9 }
 0x37a   : > { %4852 = vst [vmem:[%s8110_s23 + $0x68] sm:$0xf] %v4567_v42 }
 0x37b   : > { %v4572_v26 = vrot.slane %v4571_v41, 4  ;;  %v4582_v12 = vrot.slane %v4581_v39, 4 }
 0x37d   : > { %v4577_v18 = vsel %vm8093_vm5, %v4572_v26, %v4576_v9  ;;  %v4587_v51 = vsel %vm8093_vm5, %v4582_v12, %v8543_v37 }
 0x37e   : > { %4853 = vst [vmem:[%s8110_s23 + $0x6c] sm:$0xf] %v4577_v18 }
 0x37f   : > { %4854 = vst [vmem:[%s8110_s23 + $0x70] sm:$0xf] %v4587_v51 }
 0x380 PF: > { %s19_s11 = sadd.s32 1, %s5713_s11   ;;  %s9705_s30 = smov %s5709_s10 }
 0x381   : > { %p16_p5 = scmp.ge.s32.totalorder %s19_s11, 4   ;;  %s9706_s10 = smov %s9708_s12 }
 0x383   :  { %18 = sbr.rel (!%p16_p5) target bundleno = 2 (0x2), region = 89 }

</bundles_post_ra>
